<compile_context>
chip_gen: v6e
topology: v6e:2x2x1
jax: 0.10.0
libtpu: 0.0.40
codegen_flags: <defaults>
</compile_context>

<pallas_src>
import functools

import jax
import jax.numpy as jnp
from jax.experimental import pallas as pl
from jax.experimental.pallas import tpu as pltpu


_LANES = 128        # S and (D+1) are padded to multiples of this (lane width)
_STAT_LANES = 128   # lane-dense per-batch loss-sum / count outputs


def _round_up(x, m):
    return (x + m - 1) // m * m


# ----------------------------------------------------------------------------
# Fused kernel: bilinear label scorer + streaming CE(ignore_index=-1) + argmax
#   grid = (B, Lp // LC); label-chunk axis is the (last) reduction axis.
# ----------------------------------------------------------------------------
def _fused_scorer_ce_argmax_kernel(
        e_ref, et_ref, w_ref, tgt_ref,            # inputs
        pred_ref, loss_ref, cnt_ref,              # outputs
        m_ref, se_ref, idx_ref, pk_ref,           # VMEM scratch
        *, lc_chunk, d_pad):
    c = pl.program_id(1)

    @pl.when(c == 0)
    def _init():
        m_ref[...] = jnp.full(m_ref.shape, -1e30, jnp.float32)   # running max
        se_ref[...] = jnp.zeros(se_ref.shape, jnp.float32)       # sum exp(x-m)
        idx_ref[...] = jnp.zeros(idx_ref.shape, jnp.int32)       # running argmax
        pk_ref[...] = jnp.zeros(pk_ref.shape, jnp.float32)       # target logit

    e = e_ref[0]      # (Sp, Dp)      bf16   (ones lane at col D -> folded bias)
    et = et_ref[0]    # (Dp, Sp)      bf16   (hoisted transpose)
    w = w_ref[0]      # (Dp, LC*Dp)   bf16   (LC stacked W_l, bias at [D, D])
    t = tgt_ref[0]    # (Sp, Sp)      int32

    base = c * lc_chunk

    # One wide MXU matmul produces E @ W_l (incl. bias column) for all LC
    # labels of this chunk; kept in f32, lane-sliced + cast per label below.
    hw = jnp.dot(e, w, preferred_element_type=jnp.float32)    # (Sp, LC*Dp) f32

    # ---- phase 1: score tiles + chunk-local max / argmax / picked logits ----
    s_tiles = []
    chunk_max = None
    chunk_idx = None
    pk_add = None
    for l in range(lc_chunk):                                  # static unroll
        lab = base + l
        hw_l = hw[:, l * d_pad:(l + 1) * d_pad].astype(jnp.bfloat16)
        s = jnp.dot(hw_l, et, preferred_element_type=jnp.float32)   # (Sp, Sp)
        s_tiles.append(s)
        contrib = jnp.where(t == lab, s, 0.0)
        if l == 0:
            chunk_max = s
            chunk_idx = jnp.full(s.shape, lab, jnp.int32)
            pk_add = contrib
        else:
            # strict '>' keeps the earlier label on ties (first-occurrence)
            chunk_idx = jnp.where(s > chunk_max, lab, chunk_idx)
            chunk_max = jnp.maximum(chunk_max, s)
            pk_add = pk_add + contrib

    # ---- phase 2: merge chunk into running state (one RMW of each scratch) --
    m_old = m_ref[...]
    se_old = se_ref[...]
    idx_old = idx_ref[...]
    pk_old = pk_ref[...]

    m_new = jnp.maximum(m_old, chunk_max)
    se_new = se_old * jnp.exp(m_old - m_new)          # 1 rescale exp per chunk
    for s in s_tiles:
        se_new = se_new + jnp.exp(s - m_new)          # LC exps per chunk
    # strict '>' keeps the earlier chunk's winner on ties (first-occurrence)
    idx_new = jnp.where(chunk_max > m_old, chunk_idx, idx_old)
    pk_new = pk_old + pk_add

    m_ref[...] = m_new
    se_ref[...] = se_new
    idx_ref[...] = idx_new
    pk_ref[...] = pk_new

    @pl.when(c == pl.num_programs(1) - 1)
    def _finalize():
        pred_ref[0] = idx_new
        valid = t >= 0                                          # ignore_index=-1
        lse = m_new + jnp.log(se_new)
        loss_sum = jnp.sum(jnp.where(valid, lse - pk_new, 0.0))
        n_valid = jnp.sum(valid.astype(jnp.float32))
        loss_ref[...] = jnp.full((1, 1, _STAT_LANES), loss_sum, jnp.float32)
        cnt_ref[...] = jnp.full((1, 1, _STAT_LANES), n_valid, jnp.float32)


# ----------------------------------------------------------------------------
# Forward wrapper (== validation-mode forward of the PyTorch module)
# ----------------------------------------------------------------------------
def unfact_depgraph_parser_forward(params, token_ids, targets, *, label_chunk=8):
    """token_ids: (B, S) int32; targets: (B, S*S) int32 with ignore_index=-1.

    Returns:
      pred_label_ixs : (B, S, S) int32  -- torch.argmax(labels_logits, dim=-1),
                                           what _assemble_depgraphs consumes.
      labels_loss    : () float32       -- nn.CrossEntropyLoss(ignore_index=-1)
                                           (NaN when every target is -1,
                                            matching PyTorch).
    """
    W = params["bilinear"]                 # (L, D, D)
    bias = params["label_bias"]            # (L,)
    L, D, _ = W.shape
    B, S = token_ids.shape

    LC = max(1, min(label_chunk, L))
    Lp = _round_up(L, LC)
    NC = Lp // LC
    Sp = _round_up(S, _LANES)
    Da = D + 1                             # +1 ones lane for the folded bias
    Dp = _round_up(Da, _LANES)

    # ---- glue (plain JAX): bf16 gather + pad, ones lane, W-chunk layout -----
    emb_bf = params["embedding"].astype(jnp.bfloat16)
    E = emb_bf[token_ids]                                      # (B, S, D) bf16
    ones = jnp.ones((B, S, 1), jnp.bfloat16)
    E_aug = jnp.concatenate([E, ones], axis=-1)                # (B, S, D+1)
    E_bf = jnp.pad(E_aug, ((0, 0), (0, Sp - S), (0, Dp - Da)))   # (B, Sp, Dp)
    ET_bf = jnp.transpose(E_bf, (0, 2, 1))                       # (B, Dp, Sp)

    # W_pad[l]: [:D,:D] = W[l]; [D,D] = bias[l] (folded bias via ones lane).
    # Padded labels get [D,D] = -1e30 -> never win max, vanish from lse.
    # TODO(synk): hoist W_cat construction to param-prep time if params are
    # static across calls (XLA currently rebuilds it per jitted call).
    W_pad = jnp.zeros((Lp, Dp, Dp), jnp.float32)
    W_pad = W_pad.at[:L, :D, :D].set(W.astype(jnp.float32))
    bias_col = jnp.full((Lp,), -1e30, jnp.float32).at[:L].set(
        bias.astype(jnp.float32))
    W_pad = W_pad.at[:, D, D].set(bias_col)
    # (NC, Dp, LC*Dp) with W_cat[c, :, l*Dp:(l+1)*Dp] == W_pad[c*LC + l]
    W_cat_bf = jnp.transpose(W_pad.reshape(NC, LC, Dp, Dp),
                             (0, 2, 1, 3)).reshape(NC, Dp, LC * Dp
                                                   ).astype(jnp.bfloat16)

    # padded arcs get target -1 so they are ignored by the loss
    tgt_pad = jnp.pad(targets.reshape(B, S, S).astype(jnp.int32),
                      ((0, 0), (0, Sp - S), (0, Sp - S)), constant_values=-1)

    # ---- VMEM footprint estimate -> vmem_limit (don't blanket-set 64 MiB) ---
    vmem_est = (
        2 * Sp * Dp * 2            # E (double-buffered, bf16)
        + 2 * Dp * Sp * 2          # E^T
        + 2 * Dp * LC * Dp * 2     # W chunk
        + 2 * Sp * Sp * 4          # targets (i32)
        + 2 * Sp * Sp * 4          # pred out (i32)
        + 4 * Sp * Sp * 4          # scratch m / se / idx / pk
        + Sp * LC * Dp * 4         # hw f32 temporary
        + (LC + 4) * Sp * Sp * 4   # stored score tiles + elementwise temps
    )
    vmem_limit = max(32 * 1024 * 1024, int(vmem_est * 1.25))

    kernel = functools.partial(_fused_scorer_ce_argmax_kernel,
                               lc_chunk=LC, d_pad=Dp)

    pred_pad, loss_sums, counts = pl.pallas_call(
        kernel,
        out_shape=(
            jax.ShapeDtypeStruct((B, Sp, Sp), jnp.int32),
            jax.ShapeDtypeStruct((B, 1, _STAT_LANES), jnp.float32),
            jax.ShapeDtypeStruct((B, 1, _STAT_LANES), jnp.float32),
        ),
        grid=(B, NC),
        in_specs=[
            pl.BlockSpec((1, Sp, Dp), lambda b, c: (b, 0, 0)),         # E
            pl.BlockSpec((1, Dp, Sp), lambda b, c: (b, 0, 0)),         # E^T
            pl.BlockSpec((1, Dp, LC * Dp), lambda b, c: (c, 0, 0)),    # W chunk
            pl.BlockSpec((1, Sp, Sp), lambda b, c: (b, 0, 0)),         # targets
        ],
        out_specs=(
            pl.BlockSpec((1, Sp, Sp), lambda b, c: (b, 0, 0)),             # pred
            pl.BlockSpec((1, 1, _STAT_LANES), lambda b, c: (b, 0, 0)),     # loss
            pl.BlockSpec((1, 1, _STAT_LANES), lambda b, c: (b, 0, 0)),     # count
        ),
        scratch_shapes=[
            pltpu.VMEM((Sp, Sp), jnp.float32),   # running max m
            pltpu.VMEM((Sp, Sp), jnp.float32),   # running sum exp(x - m)
            pltpu.VMEM((Sp, Sp), jnp.int32),     # running argmax
            pltpu.VMEM((Sp, Sp), jnp.float32),   # picked (target) logit
        ],
        compiler_params=pltpu.CompilerParams(
            dimension_semantics=("parallel", "arbitrary"),
            vmem_limit_bytes=vmem_limit,
        ),
    )(E_bf, ET_bf, W_cat_bf, tgt_pad)

    pred = pred_pad[:, :S, :S]
    # mean over non-ignored targets; like PyTorch, NaN if every target is -1
    labels_loss = jnp.sum(loss_sums[:, 0, 0]) / jnp.sum(counts[:, 0, 0])
    return pred, labels_loss


if __name__ == "__main__":
    B, S, D, L, V = 2, 8, 32, 8, 20   # batch, padded seq len, embed, labels, vocab

    key = jax.random.PRNGKey(0)
    k_emb, k_root, k_w, k_b, k_tok, k_tgt = jax.random.split(key, 6)

    params = {
        "embedding": jax.random.normal(k_emb, (V, D), jnp.float32) * 0.1,
        # nn.Parameter(torch.randn(embedding_dim)) -- unused in forward()
        "root_embedding": jax.random.normal(k_root, (D,), jnp.float32),
        "bilinear": jax.random.normal(k_w, (L, D, D), jnp.float32) * 0.05,
        "label_bias": jax.random.normal(k_b, (L,), jnp.float32) * 0.1,
    }

    token_ids = jax.random.randint(k_tok, (B, S), 0, V, dtype=jnp.int32)
    targets = jax.random.randint(k_tgt, (B, S * S), -1, L, dtype=jnp.int32)

    fwd = jax.jit(functools.partial(unfact_depgraph_parser_forward,
                                    label_chunk=8))
    pred, loss = fwd(params, token_ids, targets)
    jax.block_until_ready((pred, loss))

    # ---- pure-JAX f32 reference (the kernel uses bf16 MXU operands) ---------
    E_ref = params["embedding"][token_ids].astype(jnp.float32)
    ref_logits = jnp.einsum("bsd,lde,bte->bstl", E_ref, params["bilinear"],
                            E_ref) + params["label_bias"]          # (B,S,S,L)
    ref_pred = jnp.argmax(ref_logits, axis=-1).astype(jnp.int32)
    flat = ref_logits.reshape(-1, L)
    tgt_flat = targets.reshape(-1)
    mask = tgt_flat >= 0
    lse = jax.scipy.special.logsumexp(flat, axis=-1)
    picked = jnp.take_along_axis(flat, jnp.clip(tgt_flat, 0)[:, None],
                                 axis=-1)[:, 0]
    ref_loss = jnp.sum(jnp.where(mask, lse - picked, 0.0)) / jnp.sum(
        mask.astype(jnp.float32))

    assert pred.shape == (B, S, S) and pred.dtype == jnp.int32
    assert jnp.allclose(loss, ref_loss, atol=2e-2, rtol=2e-2), (loss, ref_loss)
    # argmax must agree except where the f32 reference is itself a near-tie
    # (bf16 MXU operands / folded bf16 bias can legitimately flip those)
    srt = jnp.sort(ref_logits, axis=-1)
    gap = srt[..., -1] - srt[..., -2]
    assert bool(jnp.all((pred == ref_pred) | (gap < 1e-2)))

    print("KERNEL_OK")
</pallas_src>

<mosaic_0001>
module attributes {stable_mosaic.version = 11 : i64} {
  func.func @_fused_scorer_ce_argmax_kernel(%arg0: i32, %arg1: i32, %arg2: memref<1x128x128xbf16, #tpu.memory_space<vmem>>, %arg3: memref<1x128x128xbf16, #tpu.memory_space<vmem>>, %arg4: memref<1x128x1024xbf16, #tpu.memory_space<vmem>>, %arg5: memref<1x128x128xi32, #tpu.memory_space<vmem>>, %arg6: memref<1x128x128xi32, #tpu.memory_space<vmem>>, %arg7: memref<1x1x128xf32, #tpu.memory_space<vmem>>, %arg8: memref<1x1x128xf32, #tpu.memory_space<vmem>>, %arg9: memref<128x128xf32, #tpu.memory_space<vmem>>, %arg10: memref<128x128xf32, #tpu.memory_space<vmem>>, %arg11: memref<128x128xi32, #tpu.memory_space<vmem>>, %arg12: memref<128x128xf32, #tpu.memory_space<vmem>>) attributes {dimension_semantics = [#tpu.dimension_semantics<parallel>, #tpu.dimension_semantics<arbitrary>], iteration_bounds = array<i64: 2, 1>, scalar_prefetch = 0 : i64, scratch_operands = 4 : i64, tpu.core_type = #tpu.core_type<tc>, window_params = [{transform_indices = @transform_0, window_bounds = array<i64: 1, 128, 128>}, {transform_indices = @transform_1, window_bounds = array<i64: 1, 128, 128>}, {transform_indices = @transform_2, window_bounds = array<i64: 1, 128, 1024>}, {transform_indices = @transform_3, window_bounds = array<i64: 1, 128, 128>}, {transform_indices = @transform_4, window_bounds = array<i64: 1, 128, 128>}, {transform_indices = @transform_5, window_bounds = array<i64: 1, 1, 128>}, {transform_indices = @transform_6, window_bounds = array<i64: 1, 1, 128>}]} {
    %c0_i32 = arith.constant 0 : i32
    %0 = arith.cmpi eq, %arg1, %c0_i32 : i32
    %1 = arith.extui %0 : i1 to i32
    %c0_i32_0 = arith.constant 0 : i32
    %2 = arith.cmpi ne, %1, %c0_i32_0 : i32
    scf.if %2 {
      %cst_47 = arith.constant -1.000000e+30 : f32
      %155 = vector.broadcast %cst_47 : f32 to vector<128x128xf32>
      %c0_48 = arith.constant 0 : index
      %c0_49 = arith.constant 0 : index
      %156 = vector.load %arg9[%c0_48, %c0_49] : memref<128x128xf32, #tpu.memory_space<vmem>>, vector<128x128xf32>
      tpu.vector_store %arg9[%c0_48, %c0_49], %155 {strides = array<i32>} : memref<128x128xf32, #tpu.memory_space<vmem>>, vector<128x128xf32>,
      %cst_50 = arith.constant 0.000000e+00 : f32
      %157 = vector.broadcast %cst_50 : f32 to vector<128x128xf32>
      %c0_51 = arith.constant 0 : index
      %c0_52 = arith.constant 0 : index
      %158 = vector.load %arg10[%c0_51, %c0_52] : memref<128x128xf32, #tpu.memory_space<vmem>>, vector<128x128xf32>
      tpu.vector_store %arg10[%c0_51, %c0_52], %157 {strides = array<i32>} : memref<128x128xf32, #tpu.memory_space<vmem>>, vector<128x128xf32>,
      %c0_i32_53 = arith.constant 0 : i32
      %159 = vector.broadcast %c0_i32_53 : i32 to vector<128x128xi32>
      %c0_54 = arith.constant 0 : index
      %c0_55 = arith.constant 0 : index
      %160 = vector.load %arg11[%c0_54, %c0_55] : memref<128x128xi32, #tpu.memory_space<vmem>>, vector<128x128xi32>
      tpu.vector_store %arg11[%c0_54, %c0_55], %159 {strides = array<i32>} : memref<128x128xi32, #tpu.memory_space<vmem>>, vector<128x128xi32>,
      %cst_56 = arith.constant 0.000000e+00 : f32
      %161 = vector.broadcast %cst_56 : f32 to vector<128x128xf32>
      %c0_57 = arith.constant 0 : index
      %c0_58 = arith.constant 0 : index
      %162 = vector.load %arg12[%c0_57, %c0_58] : memref<128x128xf32, #tpu.memory_space<vmem>>, vector<128x128xf32>
      tpu.vector_store %arg12[%c0_57, %c0_58], %161 {strides = array<i32>} : memref<128x128xf32, #tpu.memory_space<vmem>>, vector<128x128xf32>,
    } else {
    }
    %c0 = arith.constant 0 : index
    %c0_1 = arith.constant 0 : index
    %c0_2 = arith.constant 0 : index
    %3 = vector.load %arg2[%c0, %c0_1, %c0_2] : memref<1x128x128xbf16, #tpu.memory_space<vmem>>, vector<1x128x128xbf16>
    %4 = vector.shape_cast %3 : vector<1x128x128xbf16> to vector<128x128xbf16>
    %c0_3 = arith.constant 0 : index
    %c0_4 = arith.constant 0 : index
    %c0_5 = arith.constant 0 : index
    %5 = vector.load %arg3[%c0_3, %c0_4, %c0_5] : memref<1x128x128xbf16, #tpu.memory_space<vmem>>, vector<1x128x128xbf16>
    %6 = vector.shape_cast %5 : vector<1x128x128xbf16> to vector<128x128xbf16>
    %c0_6 = arith.constant 0 : index
    %c0_7 = arith.constant 0 : index
    %c0_8 = arith.constant 0 : index
    %7 = vector.load %arg4[%c0_6, %c0_7, %c0_8] : memref<1x128x1024xbf16, #tpu.memory_space<vmem>>, vector<1x128x1024xbf16>
    %8 = vector.shape_cast %7 : vector<1x128x1024xbf16> to vector<128x1024xbf16>
    %c0_9 = arith.constant 0 : index
    %c0_10 = arith.constant 0 : index
    %c0_11 = arith.constant 0 : index
    %9 = vector.load %arg5[%c0_9, %c0_10, %c0_11] : memref<1x128x128xi32, #tpu.memory_space<vmem>>, vector<1x128x128xi32>
    %10 = vector.shape_cast %9 : vector<1x128x128xi32> to vector<128x128xi32>
    %c8_i32 = arith.constant 8 : i32
    %11 = arith.muli %arg1, %c8_i32 : i32
    %cst = arith.constant dense<0.000000e+00> : vector<128x1024xf32>
    %12 = tpu.matmul %4, %8, %cst {dimension_numbers = #tpu.dot_dimension_numbers<[1], [0], [0], [1], [0, 0, 1, 1], [], []>} : vector<128x128xbf16>, vector<128x1024xbf16>, vector<128x1024xf32> -> vector<128x1024xf32>
    %c0_i32_12 = arith.constant 0 : i32
    %13 = arith.addi %11, %c0_i32_12 : i32
    %14 = vector.extract_strided_slice %12 {offsets = [0, 0], sizes = [128, 128], strides = [1, 1]} : vector<128x1024xf32> to vector<128x128xf32>
    %15 = arith.truncf %14 : vector<128x128xf32> to vector<128x128xbf16>
    %cst_13 = arith.constant dense<0.000000e+00> : vector<128x128xf32>
    %16 = tpu.matmul %15, %6, %cst_13 {dimension_numbers = #tpu.dot_dimension_numbers<[1], [0], [0], [1], [0, 0, 1, 1], [], []>} : vector<128x128xbf16>, vector<128x128xbf16>, vector<128x128xf32> -> vector<128x128xf32>
    %17 = vector.broadcast %13 : i32 to vector<128x128xi32>
    %18 = arith.cmpi eq, %10, %17 : vector<128x128xi32>
    %cst_14 = arith.constant 0.000000e+00 : f32
    %19 = vector.broadcast %cst_14 : f32 to vector<128x128xf32>
    %20 = arith.select %18, %16, %19 : vector<128x128xi1>, vector<128x128xf32>
    %21 = vector.broadcast %13 : i32 to vector<128x128xi32>
    %c1_i32 = arith.constant 1 : i32
    %22 = arith.addi %11, %c1_i32 : i32
    %23 = vector.extract_strided_slice %12 {offsets = [0, 128], sizes = [128, 128], strides = [1, 1]} : vector<128x1024xf32> to vector<128x128xf32>
    %24 = arith.truncf %23 : vector<128x128xf32> to vector<128x128xbf16>
    %cst_15 = arith.constant dense<0.000000e+00> : vector<128x128xf32>
    %25 = tpu.matmul %24, %6, %cst_15 {dimension_numbers = #tpu.dot_dimension_numbers<[1], [0], [0], [1], [0, 0, 1, 1], [], []>} : vector<128x128xbf16>, vector<128x128xbf16>, vector<128x128xf32> -> vector<128x128xf32>
    %26 = vector.broadcast %22 : i32 to vector<128x128xi32>
    %27 = arith.cmpi eq, %10, %26 : vector<128x128xi32>
    %cst_16 = arith.constant 0.000000e+00 : f32
    %28 = vector.broadcast %cst_16 : f32 to vector<128x128xf32>
    %29 = arith.select %27, %25, %28 : vector<128x128xi1>, vector<128x128xf32>
    %30 = arith.cmpf ogt, %25, %16 : vector<128x128xf32>
    %31 = vector.broadcast %22 : i32 to vector<128x128xi32>
    %32 = arith.select %30, %31, %21 : vector<128x128xi1>, vector<128x128xi32>
    %33 = arith.maximumf %16, %25 : vector<128x128xf32>
    %34 = arith.addf %20, %29 : vector<128x128xf32>
    %c2_i32 = arith.constant 2 : i32
    %35 = arith.addi %11, %c2_i32 : i32
    %36 = vector.extract_strided_slice %12 {offsets = [0, 256], sizes = [128, 128], strides = [1, 1]} : vector<128x1024xf32> to vector<128x128xf32>
    %37 = arith.truncf %36 : vector<128x128xf32> to vector<128x128xbf16>
    %cst_17 = arith.constant dense<0.000000e+00> : vector<128x128xf32>
    %38 = tpu.matmul %37, %6, %cst_17 {dimension_numbers = #tpu.dot_dimension_numbers<[1], [0], [0], [1], [0, 0, 1, 1], [], []>} : vector<128x128xbf16>, vector<128x128xbf16>, vector<128x128xf32> -> vector<128x128xf32>
    %39 = vector.broadcast %35 : i32 to vector<128x128xi32>
    %40 = arith.cmpi eq, %10, %39 : vector<128x128xi32>
    %cst_18 = arith.constant 0.000000e+00 : f32
    %41 = vector.broadcast %cst_18 : f32 to vector<128x128xf32>
    %42 = arith.select %40, %38, %41 : vector<128x128xi1>, vector<128x128xf32>
    %43 = arith.cmpf ogt, %38, %33 : vector<128x128xf32>
    %44 = vector.broadcast %35 : i32 to vector<128x128xi32>
    %45 = arith.select %43, %44, %32 : vector<128x128xi1>, vector<128x128xi32>
    %46 = arith.maximumf %33, %38 : vector<128x128xf32>
    %47 = arith.addf %34, %42 : vector<128x128xf32>
    %c3_i32 = arith.constant 3 : i32
    %48 = arith.addi %11, %c3_i32 : i32
    %49 = vector.extract_strided_slice %12 {offsets = [0, 384], sizes = [128, 128], strides = [1, 1]} : vector<128x1024xf32> to vector<128x128xf32>
    %50 = arith.truncf %49 : vector<128x128xf32> to vector<128x128xbf16>
    %cst_19 = arith.constant dense<0.000000e+00> : vector<128x128xf32>
    %51 = tpu.matmul %50, %6, %cst_19 {dimension_numbers = #tpu.dot_dimension_numbers<[1], [0], [0], [1], [0, 0, 1, 1], [], []>} : vector<128x128xbf16>, vector<128x128xbf16>, vector<128x128xf32> -> vector<128x128xf32>
    %52 = vector.broadcast %48 : i32 to vector<128x128xi32>
    %53 = arith.cmpi eq, %10, %52 : vector<128x128xi32>
    %cst_20 = arith.constant 0.000000e+00 : f32
    %54 = vector.broadcast %cst_20 : f32 to vector<128x128xf32>
    %55 = arith.select %53, %51, %54 : vector<128x128xi1>, vector<128x128xf32>
    %56 = arith.cmpf ogt, %51, %46 : vector<128x128xf32>
    %57 = vector.broadcast %48 : i32 to vector<128x128xi32>
    %58 = arith.select %56, %57, %45 : vector<128x128xi1>, vector<128x128xi32>
    %59 = arith.maximumf %46, %51 : vector<128x128xf32>
    %60 = arith.addf %47, %55 : vector<128x128xf32>
    %c4_i32 = arith.constant 4 : i32
    %61 = arith.addi %11, %c4_i32 : i32
    %62 = vector.extract_strided_slice %12 {offsets = [0, 512], sizes = [128, 128], strides = [1, 1]} : vector<128x1024xf32> to vector<128x128xf32>
    %63 = arith.truncf %62 : vector<128x128xf32> to vector<128x128xbf16>
    %cst_21 = arith.constant dense<0.000000e+00> : vector<128x128xf32>
    %64 = tpu.matmul %63, %6, %cst_21 {dimension_numbers = #tpu.dot_dimension_numbers<[1], [0], [0], [1], [0, 0, 1, 1], [], []>} : vector<128x128xbf16>, vector<128x128xbf16>, vector<128x128xf32> -> vector<128x128xf32>
    %65 = vector.broadcast %61 : i32 to vector<128x128xi32>
    %66 = arith.cmpi eq, %10, %65 : vector<128x128xi32>
    %cst_22 = arith.constant 0.000000e+00 : f32
    %67 = vector.broadcast %cst_22 : f32 to vector<128x128xf32>
    %68 = arith.select %66, %64, %67 : vector<128x128xi1>, vector<128x128xf32>
    %69 = arith.cmpf ogt, %64, %59 : vector<128x128xf32>
    %70 = vector.broadcast %61 : i32 to vector<128x128xi32>
    %71 = arith.select %69, %70, %58 : vector<128x128xi1>, vector<128x128xi32>
    %72 = arith.maximumf %59, %64 : vector<128x128xf32>
    %73 = arith.addf %60, %68 : vector<128x128xf32>
    %c5_i32 = arith.constant 5 : i32
    %74 = arith.addi %11, %c5_i32 : i32
    %75 = vector.extract_strided_slice %12 {offsets = [0, 640], sizes = [128, 128], strides = [1, 1]} : vector<128x1024xf32> to vector<128x128xf32>
    %76 = arith.truncf %75 : vector<128x128xf32> to vector<128x128xbf16>
    %cst_23 = arith.constant dense<0.000000e+00> : vector<128x128xf32>
    %77 = tpu.matmul %76, %6, %cst_23 {dimension_numbers = #tpu.dot_dimension_numbers<[1], [0], [0], [1], [0, 0, 1, 1], [], []>} : vector<128x128xbf16>, vector<128x128xbf16>, vector<128x128xf32> -> vector<128x128xf32>
    %78 = vector.broadcast %74 : i32 to vector<128x128xi32>
    %79 = arith.cmpi eq, %10, %78 : vector<128x128xi32>
    %cst_24 = arith.constant 0.000000e+00 : f32
    %80 = vector.broadcast %cst_24 : f32 to vector<128x128xf32>
    %81 = arith.select %79, %77, %80 : vector<128x128xi1>, vector<128x128xf32>
    %82 = arith.cmpf ogt, %77, %72 : vector<128x128xf32>
    %83 = vector.broadcast %74 : i32 to vector<128x128xi32>
    %84 = arith.select %82, %83, %71 : vector<128x128xi1>, vector<128x128xi32>
    %85 = arith.maximumf %72, %77 : vector<128x128xf32>
    %86 = arith.addf %73, %81 : vector<128x128xf32>
    %c6_i32 = arith.constant 6 : i32
    %87 = arith.addi %11, %c6_i32 : i32
    %88 = vector.extract_strided_slice %12 {offsets = [0, 768], sizes = [128, 128], strides = [1, 1]} : vector<128x1024xf32> to vector<128x128xf32>
    %89 = arith.truncf %88 : vector<128x128xf32> to vector<128x128xbf16>
    %cst_25 = arith.constant dense<0.000000e+00> : vector<128x128xf32>
    %90 = tpu.matmul %89, %6, %cst_25 {dimension_numbers = #tpu.dot_dimension_numbers<[1], [0], [0], [1], [0, 0, 1, 1], [], []>} : vector<128x128xbf16>, vector<128x128xbf16>, vector<128x128xf32> -> vector<128x128xf32>
    %91 = vector.broadcast %87 : i32 to vector<128x128xi32>
    %92 = arith.cmpi eq, %10, %91 : vector<128x128xi32>
    %cst_26 = arith.constant 0.000000e+00 : f32
    %93 = vector.broadcast %cst_26 : f32 to vector<128x128xf32>
    %94 = arith.select %92, %90, %93 : vector<128x128xi1>, vector<128x128xf32>
    %95 = arith.cmpf ogt, %90, %85 : vector<128x128xf32>
    %96 = vector.broadcast %87 : i32 to vector<128x128xi32>
    %97 = arith.select %95, %96, %84 : vector<128x128xi1>, vector<128x128xi32>
    %98 = arith.maximumf %85, %90 : vector<128x128xf32>
    %99 = arith.addf %86, %94 : vector<128x128xf32>
    %c7_i32 = arith.constant 7 : i32
    %100 = arith.addi %11, %c7_i32 : i32
    %101 = vector.extract_strided_slice %12 {offsets = [0, 896], sizes = [128, 128], strides = [1, 1]} : vector<128x1024xf32> to vector<128x128xf32>
    %102 = arith.truncf %101 : vector<128x128xf32> to vector<128x128xbf16>
    %cst_27 = arith.constant dense<0.000000e+00> : vector<128x128xf32>
    %103 = tpu.matmul %102, %6, %cst_27 {dimension_numbers = #tpu.dot_dimension_numbers<[1], [0], [0], [1], [0, 0, 1, 1], [], []>} : vector<128x128xbf16>, vector<128x128xbf16>, vector<128x128xf32> -> vector<128x128xf32>
    %104 = vector.broadcast %100 : i32 to vector<128x128xi32>
    %105 = arith.cmpi eq, %10, %104 : vector<128x128xi32>
    %cst_28 = arith.constant 0.000000e+00 : f32
    %106 = vector.broadcast %cst_28 : f32 to vector<128x128xf32>
    %107 = arith.select %105, %103, %106 : vector<128x128xi1>, vector<128x128xf32>
    %108 = arith.cmpf ogt, %103, %98 : vector<128x128xf32>
    %109 = vector.broadcast %100 : i32 to vector<128x128xi32>
    %110 = arith.select %108, %109, %97 : vector<128x128xi1>, vector<128x128xi32>
    %111 = arith.maximumf %98, %103 : vector<128x128xf32>
    %112 = arith.addf %99, %107 : vector<128x128xf32>
    %c0_29 = arith.constant 0 : index
    %c0_30 = arith.constant 0 : index
    %113 = vector.load %arg9[%c0_29, %c0_30] : memref<128x128xf32, #tpu.memory_space<vmem>>, vector<128x128xf32>
    %c0_31 = arith.constant 0 : index
    %c0_32 = arith.constant 0 : index
    %114 = vector.load %arg10[%c0_31, %c0_32] : memref<128x128xf32, #tpu.memory_space<vmem>>, vector<128x128xf32>
    %c0_33 = arith.constant 0 : index
    %c0_34 = arith.constant 0 : index
    %115 = vector.load %arg11[%c0_33, %c0_34] : memref<128x128xi32, #tpu.memory_space<vmem>>, vector<128x128xi32>
    %c0_35 = arith.constant 0 : index
    %c0_36 = arith.constant 0 : index
    %116 = vector.load %arg12[%c0_35, %c0_36] : memref<128x128xf32, #tpu.memory_space<vmem>>, vector<128x128xf32>
    %117 = arith.maximumf %113, %111 : vector<128x128xf32>
    %118 = arith.subf %113, %117 : vector<128x128xf32>
    %119 = math.exp %118 : vector<128x128xf32>
    %120 = arith.mulf %114, %119 : vector<128x128xf32>
    %121 = arith.subf %16, %117 : vector<128x128xf32>
    %122 = math.exp %121 : vector<128x128xf32>
    %123 = arith.addf %120, %122 : vector<128x128xf32>
    %124 = arith.subf %25, %117 : vector<128x128xf32>
    %125 = math.exp %124 : vector<128x128xf32>
    %126 = arith.addf %123, %125 : vector<128x128xf32>
    %127 = arith.subf %38, %117 : vector<128x128xf32>
    %128 = math.exp %127 : vector<128x128xf32>
    %129 = arith.addf %126, %128 : vector<128x128xf32>
    %130 = arith.subf %51, %117 : vector<128x128xf32>
    %131 = math.exp %130 : vector<128x128xf32>
    %132 = arith.addf %129, %131 : vector<128x128xf32>
    %133 = arith.subf %64, %117 : vector<128x128xf32>
    %134 = math.exp %133 : vector<128x128xf32>
    %135 = arith.addf %132, %134 : vector<128x128xf32>
    %136 = arith.subf %77, %117 : vector<128x128xf32>
    %137 = math.exp %136 : vector<128x128xf32>
    %138 = arith.addf %135, %137 : vector<128x128xf32>
    %139 = arith.subf %90, %117 : vector<128x128xf32>
    %140 = math.exp %139 : vector<128x128xf32>
    %141 = arith.addf %138, %140 : vector<128x128xf32>
    %142 = arith.subf %103, %117 : vector<128x128xf32>
    %143 = math.exp %142 : vector<128x128xf32>
    %144 = arith.addf %141, %143 : vector<128x128xf32>
    %145 = arith.cmpf ogt, %111, %113 : vector<128x128xf32>
    %146 = arith.select %145, %110, %115 : vector<128x128xi1>, vector<128x128xi32>
    %147 = arith.addf %116, %112 : vector<128x128xf32>
    %c0_37 = arith.constant 0 : index
    %c0_38 = arith.constant 0 : index
    %148 = vector.load %arg9[%c0_37, %c0_38] : memref<128x128xf32, #tpu.memory_space<vmem>>, vector<128x128xf32>
    tpu.vector_store %arg9[%c0_37, %c0_38], %117 {strides = array<i32>} : memref<128x128xf32, #tpu.memory_space<vmem>>, vector<128x128xf32>,
    %c0_39 = arith.constant 0 : index
    %c0_40 = arith.constant 0 : index
    %149 = vector.load %arg10[%c0_39, %c0_40] : memref<128x128xf32, #tpu.memory_space<vmem>>, vector<128x128xf32>
    tpu.vector_store %arg10[%c0_39, %c0_40], %144 {strides = array<i32>} : memref<128x128xf32, #tpu.memory_space<vmem>>, vector<128x128xf32>,
    %c0_41 = arith.constant 0 : index
    %c0_42 = arith.constant 0 : index
    %150 = vector.load %arg11[%c0_41, %c0_42] : memref<128x128xi32, #tpu.memory_space<vmem>>, vector<128x128xi32>
    tpu.vector_store %arg11[%c0_41, %c0_42], %146 {strides = array<i32>} : memref<128x128xi32, #tpu.memory_space<vmem>>, vector<128x128xi32>,
    %c0_43 = arith.constant 0 : index
    %c0_44 = arith.constant 0 : index
    %151 = vector.load %arg12[%c0_43, %c0_44] : memref<128x128xf32, #tpu.memory_space<vmem>>, vector<128x128xf32>
    tpu.vector_store %arg12[%c0_43, %c0_44], %147 {strides = array<i32>} : memref<128x128xf32, #tpu.memory_space<vmem>>, vector<128x128xf32>,
    %c0_i32_45 = arith.constant 0 : i32
    %152 = arith.cmpi eq, %arg1, %c0_i32_45 : i32
    %153 = arith.extui %152 : i1 to i32
    %c0_i32_46 = arith.constant 0 : i32
    %154 = arith.cmpi ne, %153, %c0_i32_46 : i32
    scf.if %154 {
      %c0_47 = arith.constant 0 : index
      %c0_48 = arith.constant 0 : index
      %c0_49 = arith.constant 0 : index
      %155 = vector.load %arg6[%c0_47, %c0_48, %c0_49] : memref<1x128x128xi32, #tpu.memory_space<vmem>>, vector<1x128x128xi32>
      %156 = vector.shape_cast %155 : vector<1x128x128xi32> to vector<128x128xi32>
      %157 = vector.shape_cast %146 : vector<128x128xi32> to vector<1x128x128xi32>
      tpu.vector_store %arg6[%c0_47, %c0_48, %c0_49], %157 {strides = array<i32>} : memref<1x128x128xi32, #tpu.memory_space<vmem>>, vector<1x128x128xi32>,
      %c0_i32_50 = arith.constant 0 : i32
      %158 = vector.broadcast %c0_i32_50 : i32 to vector<128x128xi32>
      %159 = arith.cmpi sge, %10, %158 : vector<128x128xi32>
      %160 = math.log %144 : vector<128x128xf32>
      %161 = arith.addf %117, %160 : vector<128x128xf32>
      %162 = arith.subf %161, %147 : vector<128x128xf32>
      %cst_51 = arith.constant 0.000000e+00 : f32
      %163 = vector.broadcast %cst_51 : f32 to vector<128x128xf32>
      %164 = arith.select %159, %162, %163 : vector<128x128xi1>, vector<128x128xf32>
      %165 = vector.shape_cast %164 : vector<128x128xf32> to vector<1x128x128xf32>
      %cst_52 = arith.constant dense<0.000000e+00> : vector<1xf32>
      %166 = vector.multi_reduction <add>, %165, %cst_52 [1, 2] : vector<1x128x128xf32> to vector<1xf32>
      %167 = vector.shape_cast %166 : vector<1xf32> to vector<1x1x1xf32>
      %168 = vector.extract %167[0, 0, 0] : f32 from vector<1x1x1xf32>
      %169 = arith.extui %159 : vector<128x128xi1> to vector<128x128xi32>
      %170 = arith.sitofp %169 : vector<128x128xi32> to vector<128x128xf32>
      %171 = vector.shape_cast %170 : vector<128x128xf32> to vector<1x128x128xf32>
      %cst_53 = arith.constant dense<0.000000e+00> : vector<1xf32>
      %172 = vector.multi_reduction <add>, %171, %cst_53 [1, 2] : vector<1x128x128xf32> to vector<1xf32>
      %173 = vector.shape_cast %172 : vector<1xf32> to vector<1x1x1xf32>
      %174 = vector.extract %173[0, 0, 0] : f32 from vector<1x1x1xf32>
      %175 = vector.broadcast %168 : f32 to vector<1x1x128xf32>
      %c0_54 = arith.constant 0 : index
      %c0_55 = arith.constant 0 : index
      %c0_56 = arith.constant 0 : index
      %176 = vector.load %arg7[%c0_54, %c0_55, %c0_56] : memref<1x1x128xf32, #tpu.memory_space<vmem>>, vector<1x1x128xf32>
      tpu.vector_store %arg7[%c0_54, %c0_55, %c0_56], %175 {strides = array<i32>} : memref<1x1x128xf32, #tpu.memory_space<vmem>>, vector<1x1x128xf32>,
      %177 = vector.broadcast %174 : f32 to vector<1x1x128xf32>
      %c0_57 = arith.constant 0 : index
      %c0_58 = arith.constant 0 : index
      %c0_59 = arith.constant 0 : index
      %178 = vector.load %arg8[%c0_57, %c0_58, %c0_59] : memref<1x1x128xf32, #tpu.memory_space<vmem>>, vector<1x1x128xf32>
      tpu.vector_store %arg8[%c0_57, %c0_58, %c0_59], %177 {strides = array<i32>} : memref<1x1x128xf32, #tpu.memory_space<vmem>>, vector<1x1x128xf32>,
    } else {
    }
    return
  }
  func.func @transform_0(%arg0: i32, %arg1: i32) -> (i32, i32, i32) {
    %c0_i32 = arith.constant 0 : i32
    %c0_i32_0 = arith.constant 0 : i32
    %c0_i32_1 = arith.constant 0 : i32
    return %arg0, %c0_i32, %c0_i32_0 : i32, i32, i32
  }
  func.func @transform_1(%arg0: i32, %arg1: i32) -> (i32, i32, i32) {
    %c0_i32 = arith.constant 0 : i32
    %c0_i32_0 = arith.constant 0 : i32
    %c0_i32_1 = arith.constant 0 : i32
    return %arg0, %c0_i32, %c0_i32_0 : i32, i32, i32
  }
  func.func @transform_2(%arg0: i32, %arg1: i32) -> (i32, i32, i32) {
    %c0_i32 = arith.constant 0 : i32
    %c0_i32_0 = arith.constant 0 : i32
    %c0_i32_1 = arith.constant 0 : i32
    return %arg1, %c0_i32, %c0_i32_0 : i32, i32, i32
  }
  func.func @transform_3(%arg0: i32, %arg1: i32) -> (i32, i32, i32) {
    %c0_i32 = arith.constant 0 : i32
    %c0_i32_0 = arith.constant 0 : i32
    %c0_i32_1 = arith.constant 0 : i32
    return %arg0, %c0_i32, %c0_i32_0 : i32, i32, i32
  }
  func.func @transform_4(%arg0: i32, %arg1: i32) -> (i32, i32, i32) {
    %c0_i32 = arith.constant 0 : i32
    %c0_i32_0 = arith.constant 0 : i32
    %c0_i32_1 = arith.constant 0 : i32
    return %arg0, %c0_i32, %c0_i32_0 : i32, i32, i32
  }
  func.func @transform_5(%arg0: i32, %arg1: i32) -> (i32, i32, i32) {
    %c0_i32 = arith.constant 0 : i32
    %c0_i32_0 = arith.constant 0 : i32
    %c0_i32_1 = arith.constant 0 : i32
    return %arg0, %c0_i32, %c0_i32_0 : i32, i32, i32
  }
  func.func @transform_6(%arg0: i32, %arg1: i32) -> (i32, i32, i32) {
    %c0_i32 = arith.constant 0 : i32
    %c0_i32_0 = arith.constant 0 : i32
    %c0_i32_1 = arith.constant 0 : i32
    return %arg0, %c0_i32, %c0_i32_0 : i32, i32, i32
  }
}

</mosaic_0001>

<bundles_post_ra>
// kernel: unfact_depgraph_parser_forward.1
= control target key start
LH: loop header
LB: loop body
LE: loop exit
PB: predicated region body
PF: predicated region fallthrough
CT: control target
= control target key end

     0   :  { %s5016_s21 = smov 0   ;;  %s5018_s22 = smov 0   ;;  %s7984_s0 = inlined_call_operand.vmem [shape: bf16[2,128,128], index: 0, kind: input, shape index: {}]   ;;  %s7985_s1 = inlined_call_operand.vmem [shape: bf16[2,128,128], index: 1, kind: input, shape index: {}]   ;;  %s7986_s2 = inlined_call_operand.vmem [shape: bf16[1,128,1024], index: 2, kind: input, shape index: {}]   ;;  %s7987_s3 = inlined_call_operand.vmem [shape: s32[2,128,128], index: 3, kind: input, shape index: {}]   ;;  %s7988_s4 = inlined_call_operand.vmem [shape: s32[2,128,128], index: 4, kind: output, shape index: {0}]   ;;  %s7989_s5 = inlined_call_operand.vmem [shape: f32[2,1,128], index: 5, kind: output, shape index: {1}]   ;;  %s7990_s6 = inlined_call_operand.vmem [shape: f32[2,1,128], index: 6, kind: output, shape index: {2}]  }
   0x1   :  { %s5020_s23 = smov 0  }
   0x2 LB: > { %s29_s24 = sadd.s32 1, %s4973_s22  ;;  %p4075_p0 = scmp.ge.s32.totalorder %s4977_s23, 1  ;;  %s4977_s23 = sphi %s5020_s23, %s17_s23   ;;  %s4973_s22 = sphi %s5018_s22, %s8516_s22   ;;  %s4969_s21 = sphi %s5016_s21, %s8515_s21  }
   0x3   : > { %p31_p1 = scmp.ge.s32.totalorder %s29_s24, 2  ;;  %p259_p2 = scmp.lt.s32.totalorder %s4977_s23, 3 }
   0x5   : > { %s8518_s24 = smov (%p31_p1, %s29_s24), 0  ;;  %p260_p3 = pnand %p4075_p0, %p259_p2 }
   0x7   : > { %263 = sbr.rel (%p260_p3) target bundleno = 1080 (0x438), region = 36 }
   0xc   : > { %v498_v0 = vld [vmem:[%s7986_s2 + $0x1c0] sm:$0xff]  ;;  %p310_p4 = scmp.lt.s32.totalorder %s4969_s21, 1  ;;  %v7991_v6 = vmov 0   ;;  %v499_v11 = vld [vmem:[%s7986_s2 + $0x1c8] sm:$0xff]  ;;  %v500_v58 = vld [vmem:[%s7986_s2 + $0x1d0] sm:$0xff] }
   0xd   : > { %v502_v1 = vld [vmem:[%s7986_s2 + $0x1e0] sm:$0xff]  ;;  %923 = vmatprep.mubr.bf16.mxu0 %v7991_v6  ;;  %1036 = vmatprep.mubr.bf16.mxu1 %v7991_v6  ;;  %v503_v15 = vld [vmem:[%s7986_s2 + $0x1e8] sm:$0xff]  ;;  %v504_v59 = vld [vmem:[%s7986_s2 + $0x1f0] sm:$0xff] }
   0xe   : > { %v490_v2 = vld [vmem:[%s7986_s2 + $0x180] sm:$0xff]  ;;  %v4149_v3 = vcombine.high %v498_v0, %v502_v1  ;;  %v4148_v4 = vcombine.low %v498_v0, %v502_v1  ;;  %s8520_s21 = smov (!%p310_p4, %s4969_s21), 1  ;;  %v4151_v16 = vcombine.high %v499_v11, %v503_v15  ;;  %v4150_v17 = vcombine.low %v499_v11, %v503_v15  ;;  %v491_v18 = vld [vmem:[%s7986_s2 + $0x188] sm:$0xff]  ;;  %v492_v0 = vld [vmem:[%s7986_s2 + $0x190] sm:$0xff] }
   0xf   : > { %v494_v5 = vld [vmem:[%s7986_s2 + $0x1a0] sm:$0xff]  ;;  %s4182_s15 = sshll.u32 %s8520_s21, 6  ;;  %v495_v19 = vld [vmem:[%s7986_s2 + $0x1a8] sm:$0xff]  ;;  %v496_v1 = vld [vmem:[%s7986_s2 + $0x1b0] sm:$0xff]  ;;  %s337_s14 = scalar_lea.vmem %s7989_s5, %s8520_s21 }
  0x10   : > { %v4141_v7 = vcombine.high %v490_v2, %v494_v5  ;;  %v482_v8 = vld [vmem:[%s7986_s2 + $0x140] sm:$0xff]  ;;  %891 = vmatprep.subr.bf16.mxu0 %v4149_v3  ;;  %v4140_v10 = vcombine.low %v490_v2, %v494_v5  ;;  %s5074_s28 = scalar_lea.vmem %s7984_s0, %s4182_s15  ;;  %v4143_v20 = vcombine.high %v491_v18, %v495_v19  ;;  %1004 = vmatprep.subr.bf16.mxu1 %v4151_v16  ;;  %v483_v22 = vld [vmem:[%s7986_s2 + $0x148] sm:$0xff]  ;;  %s5153_s20 = scalar_lea.vmem %s7985_s1, %s4182_s15  ;;  %v501_v5 = vld [vmem:[%s7986_s2 + $0x1d8] sm:$0xff] }
  0x11   : > { %v486_v9 = vld [vmem:[%s7986_s2 + $0x160] sm:$0xff]  ;;  %892 = vmatpush1.bf16.msra.mxu0 %v4148_v4  ;;  %v487_v23 = vld [vmem:[%s7986_s2 + $0x168] sm:$0xff]  ;;  %1005 = vmatpush1.bf16.msra.mxu1 %v4150_v17  ;;  %v4142_v25 = vcombine.low %v491_v18, %v495_v19  ;;  %v4153_v3 = vcombine.high %v500_v58, %v504_v59  ;;  %v488_v11 = vld [vmem:[%s7986_s2 + $0x170] sm:$0xff]  ;;  %v4144_v17 = vcombine.low %v492_v0, %v496_v1  ;;  %s340_s19 = scalar_lea.vmem %s7990_s6, %s8520_s21 }
  0x12   : > { %893 = vmatprep.subr.bf16.mxu0 %v4141_v7  ;;  %v4133_v12 = vcombine.high %v482_v8, %v486_v9  ;;  %v474_v13 = vld [vmem:[%s7986_s2 + $0x100] sm:$0xff]  ;;  %v4132_v21 = vcombine.low %v482_v8, %v486_v9  ;;  %1006 = vmatprep.subr.bf16.mxu1 %v4143_v20  ;;  %v4135_v28 = vcombine.high %v483_v22, %v487_v23  ;;  %v475_v29 = vld [vmem:[%s7986_s2 + $0x108] sm:$0xff]  ;;  %v505_v7 = vld [vmem:[%s7986_s2 + $0x1f8] sm:$0xff] }
  0x13   : > { %v478_v14 = vld [vmem:[%s7986_s2 + $0x120] sm:$0xff]  ;;  %v479_v30 = vld [vmem:[%s7986_s2 + $0x128] sm:$0xff]  ;;  %v4134_v33 = vcombine.low %v483_v22, %v487_v23  ;;  %v4152_v9 = vcombine.low %v500_v58, %v504_v59  ;;  %v4155_v15 = vcombine.high %v501_v5, %v505_v7  ;;  %v497_v16 = vld [vmem:[%s7986_s2 + $0x1b8] sm:$0xff]  ;;  %v4154_v19 = vcombine.low %v501_v5, %v505_v7 }
  0x14   : > { %v4125_v24 = vcombine.high %v474_v13, %v478_v14  ;;  %v466_v26 = vld [vmem:[%s7986_s2 + $0xc0] sm:$0xff]  ;;  %v4124_v31 = vcombine.low %v474_v13, %v478_v14  ;;  %v4127_v36 = vcombine.high %v475_v29, %v479_v30  ;;  %v467_v37 = vld [vmem:[%s7986_s2 + $0xc8] sm:$0xff]  ;;  %v4126_v41 = vcombine.low %v475_v29, %v479_v30  ;;  %v493_v14 = vld [vmem:[%s7986_s2 + $0x198] sm:$0xff] }
  0x15   : > { %894 = vmatpush1.bf16.msra.mxu0 %v4140_v10  ;;  %v470_v27 = vld [vmem:[%s7986_s2 + $0xe0] sm:$0xff]  ;;  %1007 = vmatpush1.bf16.msra.mxu1 %v4142_v25  ;;  %v471_v38 = vld [vmem:[%s7986_s2 + $0xe8] sm:$0xff]  ;;  %v484_v10 = vld [vmem:[%s7986_s2 + $0x150] sm:$0xff]  ;;  %v4147_v22 = vcombine.high %v493_v14, %v497_v16 }
  0x16   : > { %895 = vmatprep.subr.bf16.mxu0 %v4133_v12  ;;  %v4117_v32 = vcombine.high %v466_v26, %v470_v27  ;;  %v458_v34 = vld [vmem:[%s7986_s2 + $0x80] sm:$0xff]  ;;  %1008 = vmatprep.subr.bf16.mxu1 %v4135_v28  ;;  %v4116_v39 = vcombine.low %v466_v26, %v470_v27  ;;  %v4119_v44 = vcombine.high %v467_v37, %v471_v38  ;;  %v459_v45 = vld [vmem:[%s7986_s2 + $0x88] sm:$0xff]  ;;  %v476_v20 = vld [vmem:[%s7986_s2 + $0x110] sm:$0xff] }
  0x17   : > { %v462_v35 = vld [vmem:[%s7986_s2 + $0xa0] sm:$0xff]  ;;  %v463_v46 = vld [vmem:[%s7986_s2 + $0xa8] sm:$0xff]  ;;  %v4118_v50 = vcombine.low %v467_v37, %v471_v38  ;;  %v4145_v12 = vcombine.high %v492_v0, %v496_v1  ;;  %v4137_v18 = vcombine.high %v484_v10, %v488_v11  ;;  %v489_v25 = vld [vmem:[%s7986_s2 + $0x178] sm:$0xff]  ;;  %v4136_v26 = vcombine.low %v484_v10, %v488_v11 }
  0x18   : > { %v4109_v40 = vcombine.high %v458_v34, %v462_v35  ;;  %v450_v42 = vld [vmem:[%s7986_s2 + $0x40] sm:$0xff]  ;;  %v4108_v47 = vcombine.low %v458_v34, %v462_v35  ;;  %v4111_v52 = vcombine.high %v459_v45, %v463_v46  ;;  %v451_v53 = vld [vmem:[%s7986_s2 + $0x48] sm:$0xff]  ;;  %v4110_v57 = vcombine.low %v459_v45, %v463_v46  ;;  %v468_v29 = vld [vmem:[%s7986_s2 + $0xd0] sm:$0xff] }
  0x19   : > { %896 = vmatpush1.bf16.msra.mxu0 %v4132_v21  ;;  %1009 = vmatpush1.bf16.msra.mxu1 %v4134_v33  ;;  %v454_v43 = vld [vmem:[%s7986_s2 + $0x60] sm:$0xff]  ;;  %v455_v54 = vld [vmem:[%s7986_s2 + $0x68] sm:$0xff]  ;;  %v480_v21 = vld [vmem:[%s7986_s2 + $0x130] sm:$0xff]  ;;  %v4146_v28 = vcombine.low %v493_v14, %v497_v16 }
  0x1a   : > { %897 = vmatprep.subr.bf16.mxu0 %v4125_v24  ;;  %1010 = vmatprep.subr.bf16.mxu1 %v4127_v36  ;;  %v4101_v48 = vcombine.high %v450_v42, %v454_v43  ;;  %v442_v49 = vld [vmem:[%s7986_s2] sm:$0xff]  ;;  %v4100_v55 = vcombine.low %v450_v42, %v454_v43  ;;  %v4103_v60 = vcombine.high %v451_v53, %v455_v54  ;;  %v443_v61 = vld [vmem:[%s7986_s2 + $0x8] sm:$0xff]  ;;  %v485_v24 = vld [vmem:[%s7986_s2 + $0x158] sm:$0xff] }
  0x1b   : > { %v446_v51 = vld [vmem:[%s7986_s2 + $0x20] sm:$0xff]  ;;  %v447_v62 = vld [vmem:[%s7986_s2 + $0x28] sm:$0xff]  ;;  %v4102_v4 = vcombine.low %v451_v53, %v455_v54  ;;  %v4129_v27 = vcombine.high %v476_v20, %v480_v21  ;;  %v472_v30 = vld [vmem:[%s7986_s2 + $0xf0] sm:$0xff]  ;;  %v4138_v38 = vcombine.low %v485_v24, %v489_v25 }
  0x1c   : > { %v4093_v56 = vcombine.high %v442_v49, %v446_v51  ;;  %v4092_v63 = vcombine.low %v442_v49, %v446_v51  ;;  %v5162_v2 = vld [vmem:[%s5074_s28] sm:$0xff]   ;;  %v4095_v8 = vcombine.high %v443_v61, %v447_v62  ;;  %v4094_v13 = vcombine.low %v443_v61, %v447_v62  ;;  %v5191_v23 = vld [vmem:[%s5074_s28 + $0x8] sm:$0xff]   ;;  %v477_v33 = vld [vmem:[%s7986_s2 + $0x118] sm:$0xff] }
  0x1d   : > { %898 = vmatpush1.bf16.msra.mxu0 %v4124_v31  ;;  %1011 = vmatpush1.bf16.msra.mxu1 %v4126_v41  ;;  %v4139_v31 = vcombine.high %v485_v24, %v489_v25  ;;  %v481_v34 = vld [vmem:[%s7986_s2 + $0x138] sm:$0xff]  ;;  %v4121_v35 = vcombine.high %v468_v29, %v472_v30  ;;  %v460_v36 = vld [vmem:[%s7986_s2 + $0x90] sm:$0xff]  ;;  %v4120_v41 = vcombine.low %v468_v29, %v472_v30  ;;  %v5275_v7 = vld [vmem:[%s5074_s28 + $0x20] sm:$0xff]  }
  0x1e   : > { %899 = vmatprep.subr.bf16.mxu0 %v4117_v32  ;;  %1012 = vmatprep.subr.bf16.mxu1 %v4119_v44  ;;  %v4128_v32 = vcombine.low %v476_v20, %v480_v21  ;;  %v464_v37 = vld [vmem:[%s7986_s2 + $0xb0] sm:$0xff]  ;;  %v469_v42 = vld [vmem:[%s7986_s2 + $0xd8] sm:$0xff]  ;;  %v5283_v10 = vld [vmem:[%s5074_s28 + $0x28] sm:$0xff]  }
  0x1f   : > { %v473_v43 = vld [vmem:[%s7986_s2 + $0xf8] sm:$0xff]  ;;  %v4113_v44 = vcombine.high %v460_v36, %v464_v37  ;;  %v452_v45 = vld [vmem:[%s7986_s2 + $0x50] sm:$0xff]  ;;  %v4112_v49 = vcombine.low %v460_v36, %v464_v37  ;;  %v5314_v14 = vld [vmem:[%s5153_s20 + $0x28] sm:$0xff]  }
  0x20   : > { %v456_v46 = vld [vmem:[%s7986_s2 + $0x70] sm:$0xff]  ;;  %v465_v51 = vld [vmem:[%s7986_s2 + $0xb8] sm:$0xff] }
  0x21   : > { %900 = vmatpush1.bf16.msra.mxu0 %v4116_v39  ;;  %1013 = vmatpush1.bf16.msra.mxu1 %v4118_v50  ;;  %v5222_v39 = vld [vmem:[%s5074_s28 + $0x10] sm:$0xff]   ;;  %v461_v50 = vld [vmem:[%s7986_s2 + $0x98] sm:$0xff]  ;;  %v4104_v58 = vcombine.low %v452_v45, %v456_v46 }
  0x22   : > { %901 = vmatprep.subr.bf16.mxu0 %v4109_v40  ;;  %1014 = vmatprep.subr.bf16.mxu1 %v4111_v52  ;;  %v4131_v40 = vcombine.high %v477_v33, %v481_v34  ;;  %v4105_v52 = vcombine.high %v452_v45, %v456_v46  ;;  %v444_v53 = vld [vmem:[%s7986_s2 + $0x10] sm:$0xff]  ;;  %v453_v59 = vld [vmem:[%s7986_s2 + $0x58] sm:$0xff]  ;;  %v4114_v62 = vcombine.low %v461_v50, %v465_v51 }
  0x23   : > { %v448_v54 = vld [vmem:[%s7986_s2 + $0x30] sm:$0xff]  ;;  %v445_v1 = vld [vmem:[%s7986_s2 + $0x18] sm:$0xff] }
  0x24   : > { %v4097_v61 = vcombine.high %v444_v53, %v448_v54  ;;  %v4096_v0 = vcombine.low %v444_v53, %v448_v54  ;;  %v5291_v11 = vld [vmem:[%s5074_s28 + $0x30] sm:$0xff]  }
  0x25   : > { %902 = vmatpush1.bf16.msra.mxu0 %v4108_v47  ;;  %1015 = vmatpush1.bf16.msra.mxu1 %v4110_v57  ;;  %v4130_v47 = vcombine.low %v477_v33, %v481_v34  ;;  %v4115_v57 = vcombine.high %v461_v50, %v465_v51  ;;  %v5339_v16 = vld [vmem:[%s5153_s20 + $0x10] sm:$0xff]  }
  0x26   : > { %903 = vmatprep.subr.bf16.mxu0 %v4101_v48  ;;  %1016 = vmatprep.subr.bf16.mxu1 %v4103_v60  ;;  %v4123_v48 = vcombine.high %v469_v42, %v473_v43  ;;  %v457_v60 = vld [vmem:[%s7986_s2 + $0x78] sm:$0xff] }
  0x27   : > { %v4106_v5 = vcombine.low %v453_v59, %v457_v60 }
  0x29   : > { %904 = vmatpush1.bf16.msra.mxu0 %v4100_v55  ;;  %1017 = vmatpush1.bf16.msra.mxu1 %v4102_v4  ;;  %v4122_v55 = vcombine.low %v469_v42, %v473_v43  ;;  %v5272_v4 = vld [vmem:[%s5153_s20 + $0x38] sm:$0xff]  }
  0x2a   : > { %905 = vmatprep.subr.bf16.mxu0 %v4093_v56  ;;  %1018 = vmatprep.subr.bf16.mxu1 %v4095_v8  ;;  %v5253_v56 = vld [vmem:[%s5074_s28 + $0x18] sm:$0xff]  }
  0x2d   : > { %906 = vmatpush1.bf16.msra.mxu0 %v4092_v63  ;;  %1019 = vmatpush1.bf16.msra.mxu1 %v4094_v13  ;;  %v4107_v63 = vcombine.high %v453_v59, %v457_v60  ;;  %v5307_v13 = vld [vmem:[%s5153_s20 + $0x30] sm:$0xff]  }
  0x2e   : > { %1117 = vmatprep.subr.bf16.mxu0 %v4153_v3  ;;  %1230 = vmatprep.subr.bf16.mxu1 %v4155_v15  ;;  %v449_v3 = vld [vmem:[%s7986_s2 + $0x38] sm:$0xff]  ;;  %v5321_v15 = vld [vmem:[%s5153_s20 + $0x20] sm:$0xff]  }
  0x2f   : > { %v4099_v8 = vcombine.high %v445_v1, %v449_v3 }
  0x30   : > { %924 = vmatmul.mubr.bf16.vlgmr.msra.gmra.mxu0 %v5162_v2  ;;  %1037 = vmatmul.mubr.bf16.vlgmr.msra.gmra.mxu1 %v5162_v2 }
  0x31   : > { %1118 = vmatpush1.bf16.msra.mxu0 %v4152_v9  ;;  %933 = vmatprep.mubr.bf16.mxu0 %v7991_v6  ;;  %v4098_v9 = vcombine.low %v445_v1, %v449_v3 }
  0x32   : > { %1119 = vmatprep.subr.bf16.mxu0 %v4145_v12  ;;  %1231 = vmatpush1.bf16.msra.mxu1 %v4154_v19  ;;  %v5298_v12 = vld [vmem:[%s5074_s28 + $0x38] sm:$0xff]   ;;  %s4184_s28 = sshll.u32 %s8520_s21, 7 }
  0x33   : > { %1046 = vmatprep.mubr.bf16.mxu1 %v7991_v6  ;;  %1232 = vmatprep.subr.bf16.mxu1 %v4147_v22  ;;  %s5737_s8 = scalar_lea.vmem %s7987_s3, %s4184_s28  ;;  %s6816_s11 = scalar_lea.vmem %s7988_s4, %s4184_s28 }
  0x35   : > { %1120 = vmatpush1.bf16.msra.mxu0 %v4144_v17  ;;  %v5350_v17 = vld [vmem:[%s5153_s20 + $0x8] sm:$0xff]  }
  0x36   : > { %1121 = vmatprep.subr.bf16.mxu0 %v4137_v18  ;;  %1233 = vmatpush1.bf16.msra.mxu1 %v4146_v28  ;;  %v5357_v18 = vld [vmem:[%s5153_s20] sm:$0xff]  }
  0x37   : > { %1234 = vmatprep.subr.bf16.mxu1 %v4139_v31 }
  0x38   : > { %934 = vmatmul.mubr.bf16.gmra.mxu0 %v5191_v23  ;;  %1047 = vmatmul.mubr.bf16.gmra.mxu1 %v5191_v23 }
  0x39   : > { %943 = vmatprep.mubr.bf16.mxu0 %v7991_v6  ;;  %1122 = vmatpush1.bf16.msra.mxu0 %v4136_v26 }
  0x3a   : > { %1123 = vmatprep.subr.bf16.mxu0 %v4129_v27  ;;  %1056 = vmatprep.mubr.bf16.mxu1 %v7991_v6 }
  0x3b   : > { %1235 = vmatpush1.bf16.msra.mxu1 %v4138_v38 }
  0x3c   : > { %1236 = vmatprep.subr.bf16.mxu1 %v4131_v40 }
  0x3d   : > { %1124 = vmatpush1.bf16.msra.mxu0 %v4128_v32 }
  0x3e   : > { %1125 = vmatprep.subr.bf16.mxu0 %v4121_v35 }
  0x3f   : > { %1237 = vmatpush1.bf16.msra.mxu1 %v4130_v47 }
  0x40   : > { %944 = vmatmul.mubr.bf16.gmra.mxu0 %v5222_v39  ;;  %1238 = vmatprep.subr.bf16.mxu1 %v4123_v48 }
  0x41   : > { %953 = vmatprep.mubr.bf16.mxu0 %v7991_v6  ;;  %1126 = vmatpush1.bf16.msra.mxu0 %v4120_v41 }
  0x42   : > { %1127 = vmatprep.subr.bf16.mxu0 %v4113_v44  ;;  %1057 = vmatmul.mubr.bf16.gmra.mxu1 %v5222_v39 }
  0x43   : > { %1066 = vmatprep.mubr.bf16.mxu1 %v7991_v6  ;;  %1239 = vmatpush1.bf16.msra.mxu1 %v4122_v55 }
  0x44   : > { %1240 = vmatprep.subr.bf16.mxu1 %v4115_v57 }
  0x45   : > { %1128 = vmatpush1.bf16.msra.mxu0 %v4112_v49 }
  0x46   : > { %1129 = vmatprep.subr.bf16.mxu0 %v4105_v52 }
  0x47   : > { %1241 = vmatpush1.bf16.msra.mxu1 %v4114_v62 }
  0x48   : > { %954 = vmatmul.mubr.bf16.gmra.mxu0 %v5253_v56  ;;  %1242 = vmatprep.subr.bf16.mxu1 %v4107_v63 }
  0x49   : > { %963 = vmatprep.mubr.bf16.mxu0 %v7991_v6  ;;  %1130 = vmatpush1.bf16.msra.mxu0 %v4104_v58 }
  0x4a   : > { %1131 = vmatprep.subr.bf16.mxu0 %v4097_v61  ;;  %1067 = vmatmul.mubr.bf16.gmra.mxu1 %v5253_v56 }
  0x4b   : > { %1076 = vmatprep.mubr.bf16.mxu1 %v7991_v6  ;;  %1243 = vmatpush1.bf16.msra.mxu1 %v4106_v5 }
  0x4c   : > { %1244 = vmatprep.subr.bf16.mxu1 %v4099_v8 }
  0x4d   : > { %1132 = vmatpush1.bf16.msra.mxu0 %v4096_v0 }
  0x4e   : > { %4314 = vmatprep.subr.bf16.mxu0 %v5272_v4 }
  0x4f   : > { %1245 = vmatpush1.bf16.msra.mxu1 %v4098_v9 }
  0x50   : > { %964 = vmatmul.mubr.bf16.gmra.mxu0 %v5275_v7  ;;  %4346 = vmatprep.subr.bf16.mxu1 %v5272_v4 }
  0x51   : > { %973 = vmatprep.mubr.bf16.mxu0 %v7991_v6 }
  0x52   : > { %1077 = vmatmul.mubr.bf16.gmra.mxu1 %v5275_v7 }
  0x53   : > { %1086 = vmatprep.mubr.bf16.mxu1 %v7991_v6 }
  0x58   : > { %974 = vmatmul.mubr.bf16.gmra.mxu0 %v5283_v10 }
  0x59   : > { %983 = vmatprep.mubr.bf16.mxu0 %v7991_v6 }
  0x5a   : > { %1087 = vmatmul.mubr.bf16.gmra.mxu1 %v5283_v10 }
  0x5b   : > { %1096 = vmatprep.mubr.bf16.mxu1 %v7991_v6 }
  0x60   : > { %984 = vmatmul.mubr.bf16.gmra.mxu0 %v5291_v11 }
  0x61   : > { %993 = vmatprep.mubr.bf16.mxu0 %v7991_v6 }
  0x62   : > { %1097 = vmatmul.mubr.bf16.gmra.mxu1 %v5291_v11 }
  0x63   : > { %1106 = vmatprep.mubr.bf16.mxu1 %v7991_v6 }
  0x68   : > { %994 = vmatmul.mubr.bf16.gmra.mxu0 %v5298_v12 }
  0x69   : > { %1149 = vmatprep.mubr.bf16.mxu0 %v7991_v6 }
  0x6a   : > { %1107 = vmatmul.mubr.bf16.gmra.mxu1 %v5298_v12 }
  0x6b   : > { %1262 = vmatprep.mubr.bf16.mxu1 %v7991_v6 }
  0x70   : > { %1150 = vmatmul.mubr.bf16.vlgmr.msra.gmra.mxu0 %v5162_v2 }
  0x71   : > { %1159 = vmatprep.mubr.bf16.mxu0 %v7991_v6  ;;  %4315 = vmatpush3.bf16.msra.mxu0 %v5272_v4 }
  0x72   : > { %4316 = vmatprep.subr.bf16.mxu0 %v5307_v13  ;;  %1263 = vmatmul.mubr.bf16.vlgmr.msra.gmra.mxu1 %v5162_v2  ;;  %v5332_v2 = vld [vmem:[%s5153_s20 + $0x18] sm:$0xff]  }
  0x73   : > { %1272 = vmatprep.mubr.bf16.mxu1 %v7991_v6  ;;  %4347 = vmatpush3.bf16.msra.mxu1 %v5272_v4 }
  0x74   : > { %4348 = vmatprep.subr.bf16.mxu1 %v5307_v13 }
  0x75   : > { %4317 = vmatpush3.bf16.msra.mxu0 %v5307_v13 }
  0x76   : > { %4318 = vmatprep.subr.bf16.mxu0 %v5314_v14 }
  0x77   : > { %4349 = vmatpush3.bf16.msra.mxu1 %v5307_v13 }
  0x78   : > { %1160 = vmatmul.mubr.bf16.gmra.mxu0 %v5191_v23  ;;  %4350 = vmatprep.subr.bf16.mxu1 %v5314_v14 }
  0x79   : > { %1169 = vmatprep.mubr.bf16.mxu0 %v7991_v6  ;;  %4319 = vmatpush3.bf16.msra.mxu0 %v5314_v14 }
  0x7a   : > { %4320 = vmatprep.subr.bf16.mxu0 %v5321_v15  ;;  %1273 = vmatmul.mubr.bf16.gmra.mxu1 %v5191_v23 }
  0x7b   : > { %1282 = vmatprep.mubr.bf16.mxu1 %v7991_v6  ;;  %4351 = vmatpush3.bf16.msra.mxu1 %v5314_v14 }
  0x7c   : > { %4352 = vmatprep.subr.bf16.mxu1 %v5321_v15 }
  0x7d   : > { %4321 = vmatpush3.bf16.msra.mxu0 %v5321_v15 }
  0x7e   : > { %4322 = vmatprep.subr.bf16.mxu0 %v5332_v2 }
  0x7f   : > { %4353 = vmatpush3.bf16.msra.mxu1 %v5321_v15 }
  0x80   : > { %1170 = vmatmul.mubr.bf16.gmra.mxu0 %v5222_v39  ;;  %4354 = vmatprep.subr.bf16.mxu1 %v5332_v2 }
  0x81   : > { %1179 = vmatprep.mubr.bf16.mxu0 %v7991_v6  ;;  %4323 = vmatpush3.bf16.msra.mxu0 %v5332_v2 }
  0x82   : > { %4324 = vmatprep.subr.bf16.mxu0 %v5339_v16  ;;  %1283 = vmatmul.mubr.bf16.gmra.mxu1 %v5222_v39 }
  0x83   : > { %1292 = vmatprep.mubr.bf16.mxu1 %v7991_v6  ;;  %4355 = vmatpush3.bf16.msra.mxu1 %v5332_v2 }
  0x84   : > { %4356 = vmatprep.subr.bf16.mxu1 %v5339_v16 }
  0x85   : > { %4325 = vmatpush3.bf16.msra.mxu0 %v5339_v16 }
  0x86   : > { %4326 = vmatprep.subr.bf16.mxu0 %v5350_v17 }
  0x87   : > { %4357 = vmatpush3.bf16.msra.mxu1 %v5339_v16 }
  0x88   : > { %1180 = vmatmul.mubr.bf16.gmra.mxu0 %v5253_v56  ;;  %4358 = vmatprep.subr.bf16.mxu1 %v5350_v17 }
  0x89   : > { %1189 = vmatprep.mubr.bf16.mxu0 %v7991_v6  ;;  %4327 = vmatpush3.bf16.msra.mxu0 %v5350_v17 }
  0x8a   : > { %4328 = vmatprep.subr.bf16.mxu0 %v5357_v18  ;;  %1293 = vmatmul.mubr.bf16.gmra.mxu1 %v5253_v56 }
  0x8b   : > { %1302 = vmatprep.mubr.bf16.mxu1 %v7991_v6  ;;  %4359 = vmatpush3.bf16.msra.mxu1 %v5350_v17 }
  0x8c   : > { %4360 = vmatprep.subr.bf16.mxu1 %v5357_v18 }
  0x8d   : > { %4329 = vmatpush3.bf16.msra.mxu0 %v5357_v18 }
  0x8e   : > { %4378 = vmatprep.subr.bf16.mxu0 %v5272_v4 }
  0x8f   : > { %4361 = vmatpush3.bf16.msra.mxu1 %v5357_v18 }
  0x90   : > { %1190 = vmatmul.mubr.bf16.gmra.mxu0 %v5275_v7  ;;  %4410 = vmatprep.subr.bf16.mxu1 %v5272_v4 }
  0x91   : > { %1199 = vmatprep.mubr.bf16.mxu0 %v7991_v6 }
  0x92   : > { %1303 = vmatmul.mubr.bf16.gmra.mxu1 %v5275_v7 }
  0x93   : > { %1312 = vmatprep.mubr.bf16.mxu1 %v7991_v6 }
  0x98   : > { %1200 = vmatmul.mubr.bf16.gmra.mxu0 %v5283_v10 }
  0x99   : > { %1209 = vmatprep.mubr.bf16.mxu0 %v7991_v6 }
  0x9a   : > { %1313 = vmatmul.mubr.bf16.gmra.mxu1 %v5283_v10 }
  0x9b   : > { %1322 = vmatprep.mubr.bf16.mxu1 %v7991_v6 }
  0xa0   : > { %1210 = vmatmul.mubr.bf16.gmra.mxu0 %v5291_v11 }
  0xa1   : > { %1219 = vmatprep.mubr.bf16.mxu0 %v7991_v6 }
  0xa2   : > { %1323 = vmatmul.mubr.bf16.gmra.mxu1 %v5291_v11 }
  0xa3   : > { %1332 = vmatprep.mubr.bf16.mxu1 %v7991_v6 }
  0xa8   : > { %1220 = vmatmul.mubr.bf16.gmra.mxu0 %v5298_v12 }
  0xaa   : > { %1333 = vmatmul.mubr.bf16.gmra.mxu1 %v5298_v12 }
  0xf0   : > { %v925_v19 = vpop.f32.mrf.mxu0  ;;  %v5389_v23 = vpop.f32.mrf.mxu1 }
  0xf2   : > { %v927_v20 = vpop.f32.mrf.mxu0  ;;  %v5391_v26 = vpop.f32.mrf.mxu1 }
  0xf4   : > { %v929_v21 = vpop.f32.mrf.mxu0  ;;  %v5393_v28 = vpop.f32.mrf.mxu1 }
  0xf5   : > { %v1343_v22 = vpack.c.bf16 %v929_v21, %v925_v19 }
  0xf6   : > { %v931_v24 = vpop.f32.mrf.mxu0  ;;  %v5395_v30 = vpop.f32.mrf.mxu1 }
  0xf7   : > { %v1530_v25 = vpack.c.bf16 %v931_v24, %v927_v20  ;;  %4330 = vmatprep.mubr.bf16.mxu0 %v1343_v22 }
  0xf8   : > { %v935_v27 = vpop.f32.mrf.mxu0  ;;  %v5397_v33 = vpop.f32.mrf.mxu1 }
  0xf9   : > { %4362 = vmatprep.mubr.bf16.mxu1 %v1530_v25 }
  0xfa   : > { %v937_v29 = vpop.f32.mrf.mxu0  ;;  %v5399_v36 = vpop.f32.mrf.mxu1 }
  0xfc   : > { %v939_v31 = vpop.f32.mrf.mxu0  ;;  %v5402_v38 = vpop.f32.mrf.mxu1 }
  0xfd   : > { %v1344_v32 = vpack.c.bf16 %v939_v31, %v935_v27 }
  0xfe   : > { %v941_v34 = vpop.f32.mrf.mxu0  ;;  %v5406_v40 = vpop.f32.mrf.mxu1 }
  0xff   : > { %v1531_v35 = vpack.c.bf16 %v941_v34, %v937_v29  ;;  %4331 = vmatmul.mubr.bf16.vlgmr.msra.gmra.mxu0 %v1344_v32 }
 0x100   : > { %v945_v37 = vpop.f32.mrf.mxu0  ;;  %4379 = vmatpush3.bf16.msra.mxu0 %v5272_v4 }
 0x101   : > { %4363 = vmatmul.mubr.bf16.vlgmr.msra.gmra.mxu1 %v1531_v35  ;;  %4380 = vmatprep.subr.bf16.mxu0 %v5307_v13 }
 0x102   : > { %v947_v39 = vpop.f32.mrf.mxu0  ;;  %4411 = vmatpush3.bf16.msra.mxu1 %v5272_v4  ;;  %v5410_v43 = vpop.f32.mrf.mxu1 }
 0x103   : > { %4412 = vmatprep.subr.bf16.mxu1 %v5307_v13 }
 0x104   : > { %v949_v41 = vpop.f32.mrf.mxu0  ;;  %4381 = vmatpush3.bf16.msra.mxu0 %v5307_v13  ;;  %v5414_v46 = vpop.f32.mrf.mxu1 }
 0x105   : > { %v1345_v42 = vpack.c.bf16 %v949_v41, %v945_v37  ;;  %4382 = vmatprep.subr.bf16.mxu0 %v5314_v14 }
 0x106   : > { %v951_v44 = vpop.f32.mrf.mxu0  ;;  %4413 = vmatpush3.bf16.msra.mxu1 %v5307_v13  ;;  %v5418_v48 = vpop.f32.mrf.mxu1 }
 0x107   : > { %v1532_v45 = vpack.c.bf16 %v951_v44, %v947_v39  ;;  %4334 = vmatprep.mubr.bf16.mxu0 %v1345_v42  ;;  %4414 = vmatprep.subr.bf16.mxu1 %v5314_v14 }
 0x108   : > { %v955_v47 = vpop.f32.mrf.mxu0  ;;  %4383 = vmatpush3.bf16.msra.mxu0 %v5314_v14  ;;  %v5422_v50 = vpop.f32.mrf.mxu1 }
 0x109   : > { %4366 = vmatprep.mubr.bf16.mxu1 %v1532_v45  ;;  %4384 = vmatprep.subr.bf16.mxu0 %v5321_v15 }
 0x10a   : > { %v957_v49 = vpop.f32.mrf.mxu0  ;;  %4415 = vmatpush3.bf16.msra.mxu1 %v5314_v14  ;;  %v5426_v53 = vpop.f32.mrf.mxu1 }
 0x10b   : > { %4416 = vmatprep.subr.bf16.mxu1 %v5321_v15 }
 0x10c   : > { %v959_v51 = vpop.f32.mrf.mxu0  ;;  %4385 = vmatpush3.bf16.msra.mxu0 %v5321_v15  ;;  %v5430_v56 = vpop.f32.mrf.mxu1 }
 0x10d   : > { %v1346_v52 = vpack.c.bf16 %v959_v51, %v955_v47  ;;  %4386 = vmatprep.subr.bf16.mxu0 %v5332_v2  ;;  %v1733_v51 = vpack.c.bf16 %v5393_v28, %v5389_v23  ;;  %v1734_v28 = vpack.c.bf16 %v5402_v38, %v5397_v33 }
 0x10e   : > { %v961_v54 = vpop.f32.mrf.mxu0  ;;  %4417 = vmatpush3.bf16.msra.mxu1 %v5321_v15  ;;  %v5434_v58 = vpop.f32.mrf.mxu1 }
 0x10f   : > { %v1533_v55 = vpack.c.bf16 %v961_v54, %v957_v49  ;;  %4335 = vmatmul.mubr.bf16.gmra.mxu0 %v1346_v52  ;;  %4418 = vmatprep.subr.bf16.mxu1 %v5332_v2 }
 0x110   : > { %v965_v57 = vpop.f32.mrf.mxu0  ;;  %4387 = vmatpush3.bf16.msra.mxu0 %v5332_v2  ;;  %v5438_v60 = vpop.f32.mrf.mxu1 }
 0x111   : > { %4367 = vmatmul.mubr.bf16.gmra.mxu1 %v1533_v55  ;;  %4388 = vmatprep.subr.bf16.mxu0 %v5339_v16 }
 0x112   : > { %v967_v59 = vpop.f32.mrf.mxu0  ;;  %4419 = vmatpush3.bf16.msra.mxu1 %v5332_v2  ;;  %v5442_v63 = vpop.f32.mrf.mxu1 }
 0x113   : > { %4420 = vmatprep.subr.bf16.mxu1 %v5339_v16 }
 0x114   : > { %v969_v61 = vpop.f32.mrf.mxu0  ;;  %4389 = vmatpush3.bf16.msra.mxu0 %v5339_v16  ;;  %v5446_v3 = vpop.f32.mrf.mxu1 }
 0x115   : > { %v1347_v62 = vpack.c.bf16 %v969_v61, %v965_v57  ;;  %4390 = vmatprep.subr.bf16.mxu0 %v5350_v17  ;;  %v1936_v57 = vpack.c.bf16 %v5395_v30, %v5391_v26  ;;  %v1735_v26 = vpack.c.bf16 %v5418_v48, %v5410_v43  ;;  %v1736_v43 = vpack.c.bf16 %v5434_v58, %v5426_v53 }
 0x116   : > { %v971_v0 = vpop.f32.mrf.mxu0  ;;  %4421 = vmatpush3.bf16.msra.mxu1 %v5339_v16  ;;  %v5450_v7 = vpop.f32.mrf.mxu1 }
 0x117   : > { %v1534_v1 = vpack.c.bf16 %v971_v0, %v967_v59  ;;  %4338 = vmatprep.mubr.bf16.mxu0 %v1347_v62  ;;  %4422 = vmatprep.subr.bf16.mxu1 %v5350_v17  ;;  %v1737_v48 = vpack.c.bf16 %v5450_v7, %v5442_v63 }
 0x118   : > { %v975_v5 = vpop.f32.mrf.mxu0  ;;  %4391 = vmatpush3.bf16.msra.mxu0 %v5350_v17  ;;  %v5454_v9 = vpop.f32.mrf.mxu1 }
 0x119   : > { %4370 = vmatprep.mubr.bf16.mxu1 %v1534_v1  ;;  %4392 = vmatprep.subr.bf16.mxu0 %v5357_v18  ;;  %v1940_v53 = vpack.c.bf16 %v5454_v9, %v5446_v3 }
 0x11a   : > { %v977_v8 = vpop.f32.mrf.mxu0  ;;  %4423 = vmatpush3.bf16.msra.mxu1 %v5350_v17  ;;  %v5458_v12 = vpop.f32.mrf.mxu1 }
 0x11b   : > { %4424 = vmatprep.subr.bf16.mxu1 %v5357_v18 }
 0x11c   : > { %v979_v10 = vpop.f32.mrf.mxu0  ;;  %4393 = vmatpush3.bf16.msra.mxu0 %v5357_v18  ;;  %v5462_v21 = vpop.f32.mrf.mxu1 }
 0x11d   : > { %v1348_v11 = vpack.c.bf16 %v979_v10, %v975_v5  ;;  %4442 = vmatprep.subr.bf16.mxu0 %v5272_v4  ;;  %v1937_v5 = vpack.c.bf16 %v5406_v40, %v5399_v36  ;;  %v1938_v10 = vpack.c.bf16 %v5422_v50, %v5414_v46 }
 0x11e   : > { %v981_v19 = vpop.f32.mrf.mxu0  ;;  %4425 = vmatpush3.bf16.msra.mxu1 %v5357_v18  ;;  %v5465_v24 = vpop.f32.mrf.mxu1 }
 0x11f   : > { %v1535_v20 = vpack.c.bf16 %v981_v19, %v977_v8  ;;  %4339 = vmatmul.mubr.bf16.gmra.mxu0 %v1348_v11  ;;  %4474 = vmatprep.subr.bf16.mxu1 %v5272_v4  ;;  %v1939_v19 = vpack.c.bf16 %v5438_v60, %v5430_v56  ;;  %v1738_v3 = vpack.c.bf16 %v5465_v24, %v5458_v12 }
 0x120   : > { %v985_v22 = vpop.f32.mrf.mxu0  ;;  %v5467_v27 = vpop.f32.mrf.mxu1 }
 0x121   : > { %4371 = vmatmul.mubr.bf16.gmra.mxu1 %v1535_v20 }
 0x122   : > { %v987_v25 = vpop.f32.mrf.mxu0  ;;  %v5469_v32 = vpop.f32.mrf.mxu1 }
 0x124   : > { %v989_v29 = vpop.f32.mrf.mxu0  ;;  %v5471_v37 = vpop.f32.mrf.mxu1 }
 0x125   : > { %v1349_v31 = vpack.c.bf16 %v989_v29, %v985_v22  ;;  %v1941_v29 = vpack.c.bf16 %v5467_v27, %v5462_v21 }
 0x126   : > { %v991_v34 = vpop.f32.mrf.mxu0  ;;  %v5473_v41 = vpop.f32.mrf.mxu1 }
 0x127   : > { %v1536_v35 = vpack.c.bf16 %v991_v34, %v987_v25  ;;  %4342 = vmatprep.mubr.bf16.mxu0 %v1349_v31  ;;  %v1739_v22 = vpack.c.bf16 %v5473_v41, %v5469_v32 }
 0x128   : > { %v995_v39 = vpop.f32.mrf.mxu0  ;;  %v5475_v44 = vpop.f32.mrf.mxu1 }
 0x129   : > { %4374 = vmatprep.mubr.bf16.mxu1 %v1536_v35  ;;  %v1942_v12 = vpack.c.bf16 %v5475_v44, %v5471_v37 }
 0x12a   : > { %v997_v42 = vpop.f32.mrf.mxu0  ;;  %v5477_v49 = vpop.f32.mrf.mxu1 }
 0x12c   : > { %v999_v45 = vpop.f32.mrf.mxu0  ;;  %v5481_v55 = vpop.f32.mrf.mxu1 }
 0x12d   : > { %v1350_v47 = vpack.c.bf16 %v999_v45, %v995_v39 }
 0x12e   : > { %v1001_v52 = vpop.f32.mrf.mxu0  ;;  %v5487_v61 = vpop.f32.mrf.mxu1 }
 0x12f   : > { %v1537_v54 = vpack.c.bf16 %v1001_v52, %v997_v42  ;;  %4343 = vmatmul.mubr.bf16.gmra.mxu0 %v1350_v47  ;;  %v1740_v35 = vpack.c.bf16 %v5487_v61, %v5477_v49 }
 0x130   : > { %v5485_v59 = vpop.f32.mrf.mxu0  ;;  %4394 = vmatprep.mubr.bf16.mxu0 %v1733_v51  ;;  %v5491_v0 = vpop.f32.mrf.mxu1 }
 0x131   : > { %4375 = vmatmul.mubr.bf16.gmra.mxu1 %v1537_v54  ;;  %v1943_v42 = vpack.c.bf16 %v5491_v0, %v5481_v55 }
 0x132   : > { %v5489_v62 = vpop.f32.mrf.mxu0  ;;  %4426 = vmatprep.mubr.bf16.mxu1 %v1936_v57  ;;  %v5497_v1 = vpop.f32.mrf.mxu1 }
 0x134   : > { %v5493_v23 = vpop.f32.mrf.mxu0  ;;  %v5505_v8 = vpop.f32.mrf.mxu1 }
 0x135   : > { %v2139_v39 = vpack.c.bf16 %v5493_v23, %v5485_v59 }
 0x136   : > { %v5501_v30 = vpop.f32.mrf.mxu0  ;;  %v5513_v33 = vpop.f32.mrf.mxu1 }
 0x137   : > { %4395 = vmatmul.mubr.bf16.vlgmr.msra.gmra.mxu0 %v1734_v28  ;;  %v2342_v45 = vpack.c.bf16 %v5501_v30, %v5489_v62 }
 0x138   : > { %v5509_v11 = vpop.f32.mrf.mxu0  ;;  %4398 = vmatprep.mubr.bf16.mxu0 %v1735_v26  ;;  %4443 = vmatpush3.bf16.msra.mxu0 %v5272_v4  ;;  %v5519_v36 = vpop.f32.mrf.mxu1 }
 0x139   : > { %4427 = vmatmul.mubr.bf16.vlgmr.msra.gmra.mxu1 %v1937_v5  ;;  %4444 = vmatprep.subr.bf16.mxu0 %v5307_v13 }
 0x13a   : > { %v5515_v38 = vpop.f32.mrf.mxu0  ;;  %4430 = vmatprep.mubr.bf16.mxu1 %v1938_v10  ;;  %4475 = vmatpush3.bf16.msra.mxu1 %v5272_v4  ;;  %v5527_v46 = vpop.f32.mrf.mxu1 }
 0x13b   : > { %4476 = vmatprep.subr.bf16.mxu1 %v5307_v13 }
 0x13c   : > { %v5521_v40 = vpop.f32.mrf.mxu0  ;;  %4445 = vmatpush3.bf16.msra.mxu0 %v5307_v13  ;;  %v5537_v20 = vpop.f32.mrf.mxu1 }
 0x13d   : > { %4446 = vmatprep.subr.bf16.mxu0 %v5314_v14  ;;  %v2140_v55 = vpack.c.bf16 %v5521_v40, %v5509_v11 }
 0x13e   : > { %v5531_v50 = vpop.f32.mrf.mxu0  ;;  %4477 = vmatpush3.bf16.msra.mxu1 %v5307_v13  ;;  %v5545_v63 = vpop.f32.mrf.mxu1 }
 0x13f   : > { %4399 = vmatmul.mubr.bf16.gmra.mxu0 %v1736_v43  ;;  %4478 = vmatprep.subr.bf16.mxu1 %v5314_v14  ;;  %v2343_v62 = vpack.c.bf16 %v5531_v50, %v5515_v38 }
 0x140   : > { %v5541_v58 = vpop.f32.mrf.mxu0  ;;  %4402 = vmatprep.mubr.bf16.mxu0 %v1737_v48  ;;  %4447 = vmatpush3.bf16.msra.mxu0 %v5314_v14  ;;  %v5551_v56 = vpop.f32.mrf.mxu1 }
 0x141   : > { %4431 = vmatmul.mubr.bf16.gmra.mxu1 %v1939_v19  ;;  %4448 = vmatprep.subr.bf16.mxu0 %v5321_v15 }
 0x142   : > { %v5547_v7 = vpop.f32.mrf.mxu0  ;;  %4434 = vmatprep.mubr.bf16.mxu1 %v1940_v53  ;;  %4479 = vmatpush3.bf16.msra.mxu1 %v5314_v14  ;;  %v5557_v9 = vpop.f32.mrf.mxu1 }
 0x143   : > { %4480 = vmatprep.subr.bf16.mxu1 %v5321_v15 }
 0x144   : > { %v1175_v60 = vpop.f32.mrf.mxu0  ;;  %4449 = vmatpush3.bf16.msra.mxu0 %v5321_v15  ;;  %v5565_v31 = vpop.f32.mrf.mxu1 }
 0x145   : > { %4450 = vmatprep.subr.bf16.mxu0 %v5332_v2  ;;  %v2141_v59 = vpack.c.bf16 %v1175_v60, %v5541_v58 }
 0x146   : > { %v1177_v25 = vpop.f32.mrf.mxu0  ;;  %4481 = vmatpush3.bf16.msra.mxu1 %v5321_v15  ;;  %v5573_v32 = vpop.f32.mrf.mxu1 }
 0x147   : > { %4403 = vmatmul.mubr.bf16.gmra.mxu0 %v1738_v3  ;;  %4482 = vmatprep.subr.bf16.mxu1 %v5332_v2  ;;  %v2344_v23 = vpack.c.bf16 %v1177_v25, %v5547_v7 }
 0x148   : > { %v5569_v24 = vpop.f32.mrf.mxu0  ;;  %4406 = vmatprep.mubr.bf16.mxu0 %v1739_v22  ;;  %4451 = vmatpush3.bf16.msra.mxu0 %v5332_v2  ;;  %v5579_v21 = vpop.f32.mrf.mxu1 }
 0x149   : > { %4435 = vmatmul.mubr.bf16.gmra.mxu1 %v1941_v29  ;;  %4452 = vmatprep.subr.bf16.mxu0 %v5339_v16 }
 0x14a   : > { %v5575_v34 = vpop.f32.mrf.mxu0  ;;  %4438 = vmatprep.mubr.bf16.mxu1 %v1942_v12  ;;  %4483 = vmatpush3.bf16.msra.mxu1 %v5332_v2  ;;  %v5585_v37 = vpop.f32.mrf.mxu1 }
 0x14b   : > { %4484 = vmatprep.subr.bf16.mxu1 %v5339_v16 }
 0x14c   : > { %v1185_v27 = vpop.f32.mrf.mxu0  ;;  %4453 = vmatpush3.bf16.msra.mxu0 %v5339_v16  ;;  %v5593_v44 = vpop.f32.mrf.mxu1 }
 0x14d   : > { %4454 = vmatprep.subr.bf16.mxu0 %v5350_v17  ;;  %v2142_v11 = vpack.c.bf16 %v1185_v27, %v5569_v24 }
 0x14e   : > { %v1187_v41 = vpop.f32.mrf.mxu0  ;;  %4485 = vmatpush3.bf16.msra.mxu1 %v5339_v16  ;;  %v5599_v49 = vpop.f32.mrf.mxu1 }
 0x14f   : > { %4407 = vmatmul.mubr.bf16.gmra.mxu0 %v1740_v35  ;;  %4486 = vmatprep.subr.bf16.mxu1 %v5350_v17  ;;  %v2345_v43 = vpack.c.bf16 %v1187_v41, %v5575_v34  ;;  %v2545_v34 = vpack.c.bf16 %v5513_v33, %v5497_v1  ;;  %v2546_v1 = vpack.c.bf16 %v5545_v63, %v5527_v46 }
 0x150   : > { %v1191_v47 = vpop.f32.mrf.mxu0  ;;  %4455 = vmatpush3.bf16.msra.mxu0 %v5350_v17  ;;  %4458 = vmatprep.mubr.bf16.mxu0 %v2139_v39  ;;  %v5603_v52 = vpop.f32.mrf.mxu1  ;;  %v2749_v33 = vpack.c.bf16 %v5551_v56, %v5537_v20  ;;  %v2548_v46 = vpack.c.bf16 %v5599_v49, %v5585_v37 }
 0x151   : > { %4439 = vmatmul.mubr.bf16.gmra.mxu1 %v1943_v42  ;;  %4456 = vmatprep.subr.bf16.mxu0 %v5357_v18 }
 0x152   : > { %v1193_v51 = vpop.f32.mrf.mxu0  ;;  %4487 = vmatpush3.bf16.msra.mxu1 %v5350_v17  ;;  %4490 = vmatprep.mubr.bf16.mxu1 %v2342_v45  ;;  %v5609_v57 = vpop.f32.mrf.mxu1 }
 0x153   : > { %4488 = vmatprep.subr.bf16.mxu1 %v5357_v18 }
 0x154   : > { %v1195_v54 = vpop.f32.mrf.mxu0  ;;  %4457 = vmatpush3.bf16.msra.mxu0 %v5357_v18  ;;  %v5616_v0 = vpop.f32.mrf.mxu1 }
 0x155   : > { %4506 = vmatprep.subr.bf16.mxu0 %v5272_v4  ;;  %v2143_v38 = vpack.c.bf16 %v1195_v54, %v1191_v47 }
 0x156   : > { %v1197_v61 = vpop.f32.mrf.mxu0  ;;  %4489 = vmatpush3.bf16.msra.mxu1 %v5357_v18  ;;  %v5621_v26 = vpop.f32.mrf.mxu1 }
 0x157   : > { %4459 = vmatmul.mubr.bf16.vlgmr.msra.gmra.mxu0 %v2140_v55  ;;  %4538 = vmatprep.subr.bf16.mxu1 %v5272_v4  ;;  %v2549_v63 = vpack.c.bf16 %v5621_v26, %v5609_v57 }
 0x158   : > { %v1201_v28 = vpop.f32.mrf.mxu0  ;;  %4462 = vmatprep.mubr.bf16.mxu0 %v2141_v59  ;;  %4507 = vmatpush3.bf16.msra.mxu0 %v5272_v4  ;;  %v5626_v10 = vpop.f32.mrf.mxu1 }
 0x159   : > { %4491 = vmatmul.mubr.bf16.vlgmr.msra.gmra.mxu1 %v2343_v62  ;;  %4508 = vmatprep.subr.bf16.mxu0 %v5307_v13  ;;  %v2752_v20 = vpack.c.bf16 %v5626_v10, %v5616_v0 }
 0x15a   : > { %v1203_v30 = vpop.f32.mrf.mxu0  ;;  %4494 = vmatprep.mubr.bf16.mxu1 %v2344_v23  ;;  %4539 = vmatpush3.bf16.msra.mxu1 %v5272_v4  ;;  %v2346_v4 = vpack.c.bf16 %v1197_v61, %v1193_v51  ;;  %v5634_v50 = vpop.f32.mrf.mxu1 }
 0x15b   : > { %4540 = vmatprep.subr.bf16.mxu1 %v5307_v13 }
 0x15c   : > { %v1205_v5 = vpop.f32.mrf.mxu0  ;;  %4509 = vmatpush3.bf16.msra.mxu0 %v5307_v13  ;;  %v5640_v53 = vpop.f32.mrf.mxu1 }
 0x15d   : > { %4510 = vmatprep.subr.bf16.mxu0 %v5314_v14  ;;  %v2144_v58 = vpack.c.bf16 %v1205_v5, %v1201_v28 }
 0x15e   : > { %v1207_v40 = vpop.f32.mrf.mxu0  ;;  %4541 = vmatpush3.bf16.msra.mxu1 %v5307_v13  ;;  %v1318_v25 = vpop.f32.mrf.mxu1 }
 0x15f   : > { %4463 = vmatmul.mubr.bf16.gmra.mxu0 %v2142_v11  ;;  %4542 = vmatprep.subr.bf16.mxu1 %v5314_v14  ;;  %v2347_v3 = vpack.c.bf16 %v1207_v40, %v1203_v30 }
 0x160   : > { %v1211_v48 = vpop.f32.mrf.mxu0  ;;  %4466 = vmatprep.mubr.bf16.mxu0 %v2143_v38  ;;  %4511 = vmatpush3.bf16.msra.mxu0 %v5314_v14  ;;  %v1320_v12 = vpop.f32.mrf.mxu1 }
 0x161   : > { %4495 = vmatmul.mubr.bf16.gmra.mxu1 %v2345_v43  ;;  %4512 = vmatprep.subr.bf16.mxu0 %v5321_v15 }
 0x162   : > { %v1213_v19 = vpop.f32.mrf.mxu0  ;;  %4498 = vmatprep.mubr.bf16.mxu1 %v2346_v4  ;;  %4543 = vmatpush3.bf16.msra.mxu1 %v5314_v14  ;;  %v1324_v39 = vpop.f32.mrf.mxu1 }
 0x163   : > { %4544 = vmatprep.subr.bf16.mxu1 %v5321_v15 }
 0x164   : > { %v1215_v13 = vpop.f32.mrf.mxu0  ;;  %4513 = vmatpush3.bf16.msra.mxu0 %v5321_v15 }
 0x165   : > { %v2145_v7 = vpack.c.bf16 %v1215_v13, %v1211_v48  ;;  %4514 = vmatprep.subr.bf16.mxu0 %v5332_v2 }
 0x166   : > { %v1217_v60 = vpop.f32.mrf.mxu0  ;;  %4545 = vmatpush3.bf16.msra.mxu1 %v5321_v15 }
 0x167   : > { %v2348_v22 = vpack.c.bf16 %v1217_v60, %v1213_v19  ;;  %4467 = vmatmul.mubr.bf16.gmra.mxu0 %v2144_v58  ;;  %4546 = vmatprep.subr.bf16.mxu1 %v5332_v2 }
 0x168   : > { %v1221_v14 = vpop.f32.mrf.mxu0  ;;  %4470 = vmatprep.mubr.bf16.mxu0 %v2145_v7  ;;  %4515 = vmatpush3.bf16.msra.mxu0 %v5332_v2  ;;  %v5744_v7 = vld [vmem:[%s5737_s8 + $0x10] sm:$0xff] }
 0x169   : > { %4499 = vmatmul.mubr.bf16.gmra.mxu1 %v2347_v3  ;;  %4516 = vmatprep.subr.bf16.mxu0 %v5339_v16  ;;  %vm1499_vm0 = vcmp.eq.s32.totalorder %v5744_v7, 0  ;;  %vm1638_vm2 = vcmp.eq.s32.totalorder %v5744_v7, 1 }
 0x16a   : > { %v1223_v29 = vpop.f32.mrf.mxu0  ;;  %4502 = vmatprep.mubr.bf16.mxu1 %v2348_v22  ;;  %4547 = vmatpush3.bf16.msra.mxu1 %v5332_v2  ;;  %v2748_v2 = vpack.c.bf16 %v5519_v36, %v5505_v8  ;;  %v2547_v8 = vpack.c.bf16 %v5573_v32, %v5557_v9  ;;  %v5751_v22 = vld [vmem:[%s5737_s8] sm:$0xff] }
 0x16b   : > { %4548 = vmatprep.subr.bf16.mxu1 %v5339_v16  ;;  %vm1497_vm1 = vcmp.eq.s32.totalorder %v5751_v22, 0  ;;  %vm1636_vm4 = vcmp.eq.s32.totalorder %v5751_v22, 1 }
 0x16c   : > { %v1225_v15 = vpop.f32.mrf.mxu0  ;;  %4517 = vmatpush3.bf16.msra.mxu0 %v5339_v16 }
 0x16d   : > { %v2146_v24 = vpack.c.bf16 %v1225_v15, %v1221_v14  ;;  %4518 = vmatprep.subr.bf16.mxu0 %v5350_v17  ;;  %v5754_v14 = vld [vmem:[%s5737_s8 + $0x18] sm:$0xff] }
 0x16e   : > { %v1227_v27 = vpop.f32.mrf.mxu0  ;;  %4549 = vmatpush3.bf16.msra.mxu1 %v5339_v16  ;;  %v1326_v16 = vpop.f32.mrf.mxu1  ;;  %vm1500_vm3 = vcmp.eq.s32.totalorder %v5754_v14, 0  ;;  %vm1639_vm6 = vcmp.eq.s32.totalorder %v5754_v14, 1 }
 0x16f   : > { %v2349_v35 = vpack.c.bf16 %v1227_v27, %v1223_v29  ;;  %4471 = vmatmul.mubr.bf16.gmra.mxu0 %v2146_v24  ;;  %4550 = vmatprep.subr.bf16.mxu1 %v5350_v17  ;;  %v5760_v29 = vld [vmem:[%s5737_s8 + $0x30] sm:$0xff]  ;;  %v5768_v24 = vld [vmem:[%s5737_s8 + $0x20] sm:$0xff]  ;;  %v5778_v27 = vld [vmem:[%s5737_s8 + $0x28] sm:$0xff] }
 0x170   : > { %4519 = vmatpush3.bf16.msra.mxu0 %v5350_v17  ;;  %4522 = vmatprep.mubr.bf16.mxu0 %v2545_v34  ;;  %v1328_v36 = vpop.f32.mrf.mxu1  ;;  %8173 = vst [vmem:[#allocation35_spill] sm:$0xff] %v5760_v29  ;;  %v5771_v34 = vld [vmem:[%s5737_s8 + $0x38] sm:$0xff]  ;;  %vm1503_vm8 = vcmp.eq.s32.totalorder %v5760_v29, 0  ;;  %vm1642_vm11 = vcmp.eq.s32.totalorder %v5760_v29, 1  ;;  %vm1640_vm13 = vcmp.eq.s32.totalorder %v5768_v24, 1  ;;  %vm1502_vm14 = vcmp.eq.s32.totalorder %v5778_v27, 0 }
 0x171   : > { %4503 = vmatmul.mubr.bf16.gmra.mxu1 %v2349_v35  ;;  %4520 = vmatprep.subr.bf16.mxu0 %v5357_v18  ;;  %v2551_v32 = vpack.c.bf16 %v1328_v36, %v1324_v39  ;;  %v5794_v39 = vld [vmem:[%s5737_s8 + $0x50] sm:$0xff]  ;;  %vm1643_vm15 = vcmp.eq.s32.totalorder %v5771_v34, 1  ;;  %vm1641_vm10 = vcmp.eq.s32.totalorder %v5778_v27, 1  ;;  %v5817_v36 = vld [vmem:[%s5737_s8 + $0x58] sm:$0xff] }
 0x172   : > { %4551 = vmatpush3.bf16.msra.mxu1 %v5350_v17  ;;  %4554 = vmatprep.mubr.bf16.mxu1 %v2748_v2  ;;  %v2750_v17 = vpack.c.bf16 %v5579_v21, %v5565_v31  ;;  %v1330_v41 = vpop.f32.mrf.mxu1  ;;  %v2550_v31 = vpack.c.bf16 %v1318_v25, %v5634_v50  ;;  %v2753_v21 = vpack.c.bf16 %v1320_v12, %v5640_v53  ;;  %v5757_v25 = vld [vmem:[%s5737_s8 + $0x8] sm:$0xff] }
 0x173   : > { %4552 = vmatprep.subr.bf16.mxu1 %v5357_v18  ;;  %v2754_v37 = vpack.c.bf16 %v1330_v41, %v1326_v16  ;;  %vm1498_vm5 = vcmp.eq.s32.totalorder %v5757_v25, 0  ;;  %vm1637_vm7 = vcmp.eq.s32.totalorder %v5757_v25, 1 }
 0x174   : > { %4521 = vmatpush3.bf16.msra.mxu0 %v5357_v18  ;;  %v1334_v56 = vpop.f32.mrf.mxu1 }
 0x176   : > { %4553 = vmatpush3.bf16.msra.mxu1 %v5357_v18  ;;  %v2751_v18 = vpack.c.bf16 %v5603_v52, %v5593_v44  ;;  %v1336_v9 = vpop.f32.mrf.mxu1 }
 0x177   : > { %4523 = vmatmul.mubr.bf16.vlgmr.msra.gmra.mxu0 %v2546_v1 }
 0x178   : > { %4526 = vmatprep.mubr.bf16.mxu0 %v2547_v8  ;;  %v1338_v42 = vpop.f32.mrf.mxu1 }
 0x179   : > { %4555 = vmatmul.mubr.bf16.vlgmr.msra.gmra.mxu1 %v2749_v33  ;;  %v2552_v45 = vpack.c.bf16 %v1338_v42, %v1334_v56  ;;  %v5807_v33 = vld [vmem:[%s5737_s8 + $0x40] sm:$0xff] }
 0x17a   : > { %4558 = vmatprep.mubr.bf16.mxu1 %v2750_v17  ;;  %v1340_v44 = vpop.f32.mrf.mxu1 }
 0x17b   : > { %v2755_v47 = vpack.c.bf16 %v1340_v44, %v1336_v9 }
 0x17f   : > { %4527 = vmatmul.mubr.bf16.gmra.mxu0 %v2548_v46 }
 0x180   : > { %4530 = vmatprep.mubr.bf16.mxu0 %v2549_v63 }
 0x181   : > { %4559 = vmatmul.mubr.bf16.gmra.mxu1 %v2751_v18 }
 0x182   : > { %4562 = vmatprep.mubr.bf16.mxu1 %v2752_v20 }
 0x187   : > { %4531 = vmatmul.mubr.bf16.gmra.mxu0 %v2550_v31 }
 0x188   : > { %4534 = vmatprep.mubr.bf16.mxu0 %v2551_v32 }
 0x189   : > { %4563 = vmatmul.mubr.bf16.gmra.mxu1 %v2753_v21  ;;  %v5853_v21 = vld [vmem:[%s5737_s8 + $0x48] sm:$0xff] }
 0x18a   : > { %4566 = vmatprep.mubr.bf16.mxu1 %v2754_v37 }
 0x18f   : > { %4535 = vmatmul.mubr.bf16.gmra.mxu0 %v2552_v45 }
 0x191   : > { %4567 = vmatmul.mubr.bf16.gmra.mxu1 %v2755_v47 }
 0x1bf   : > { %v5681_v49 = vpop.f32.mrf.mxu0 }
 0x1c0   : > { %8144 = vst [vmem:[#allocation6_spill] sm:$0xff] %v5681_v49  ;;  %v1515_v17 = vsel %vm1499_vm0, %v5681_v49, 0.0  ;;  %vm1507_vm0 = vcmp.eq.s32.totalorder %v5794_v39, 0 }
 0x1c1   : > { %v5683_v51 = vpop.f32.mrf.mxu1  ;;  %v5685_v52 = vpop.f32.mrf.mxu0 }
 0x1c2   : > { %8145 = vst [vmem:[#allocation7_spill] sm:$0xff] %v5683_v51  ;;  %8146 = vst [vmem:[#allocation8_spill] sm:$0xff] %v5685_v52  ;;  %vm1670_vm9 = vcmp.gt.f32.partialorder %v5683_v51, %v5681_v49  ;;  %v1654_v8 = vsel %vm1638_vm2, %v5683_v51, 0.0  ;;  %v1513_v63 = vsel %vm1497_vm1, %v5685_v52, 0.0  ;;  %v5834_v20 = vmax.f32 %v5681_v49, %v5683_v51 }
 0x1c3   : > { %v5687_v54 = vpop.f32.mrf.mxu1  ;;  %v5689_v55 = vpop.f32.mrf.mxu0  ;;  %v5830_v18 = vsel %vm1670_vm9, 1, %v7991_v6  ;;  %v5840_v9 = vadd.f32 %v1654_v8, %v1515_v17  ;;  %vm1505_vm9 = vcmp.eq.s32.totalorder %v5807_v33, 0  ;;  %vm1644_vm2 = vcmp.eq.s32.totalorder %v5807_v33, 1 }
 0x1c4   : > { %8147 = vst [vmem:[#allocation9_spill] sm:$0xff] %v5687_v54  ;;  %8148 = vst [vmem:[#allocation10_spill] sm:$0xff] %v5689_v55  ;;  %vm1668_vm12 = vcmp.gt.f32.partialorder %v5687_v54, %v5685_v52  ;;  %v1652_v56 = vsel %vm1636_vm4, %v5687_v54, 0.0  ;;  %v1516_v31 = vsel %vm1500_vm3, %v5689_v55, 0.0  ;;  %v5867_v45 = vmax.f32 %v5685_v52, %v5687_v54 }
 0x1c5   : > { %v5691_v57 = vpop.f32.mrf.mxu1  ;;  %v5693_v59 = vpop.f32.mrf.mxu0  ;;  %v5863_v44 = vsel %vm1668_vm12, 1, %v7991_v6  ;;  %vm1508_vm4 = vcmp.eq.s32.totalorder %v5817_v36, 0  ;;  %v5876_v8 = vadd.f32 %v1652_v56, %v1513_v63  ;;  %vm1645_vm12 = vcmp.eq.s32.totalorder %v5853_v21, 1 }
 0x1c6   : > { %8149 = vst [vmem:[#allocation11_spill] sm:$0xff] %v5691_v57  ;;  %8150 = vst [vmem:[#allocation12_spill] sm:$0xff] %v5693_v59  ;;  %v1655_v32 = vsel %vm1639_vm6, %v5691_v57, 0.0  ;;  %vm1671_vm1 = vcmp.gt.f32.partialorder %v5691_v57, %v5689_v55  ;;  %vm1647_vm6 = vcmp.eq.s32.totalorder %v5817_v36, 1  ;;  %v1514_v17 = vsel %vm1498_vm5, %v5693_v59, 0.0 }
 0x1c7   : > { %v5695_v61 = vpop.f32.mrf.mxu1  ;;  %v5883_v6 = vmax.f32 %v5689_v55, %v5691_v57  ;;  %v8186_v63 = vmov 0   ;;  %v5898_v51 = vadd.f32 %v1655_v32, %v1516_v31  ;;  %vm1506_vm5 = vcmp.eq.s32.totalorder %v5853_v21, 0  ;;  %v5929_v55 = vld [vmem:[%s5737_s8 + $0x78] sm:$0xff] }
 0x1c8   : > { %8151 = vst [vmem:[#allocation13_spill] sm:$0xff] %v5695_v61  ;;  %v1653_v47 = vsel %vm1637_vm7, %v5695_v61, 0.0  ;;  %vm1669_vm3 = vcmp.gt.f32.partialorder %v5695_v61, %v5693_v59  ;;  %v5896_v56 = vsel %vm1671_vm1, 1, %v8186_v63  ;;  %v5902_v49 = vmax.f32 %v5693_v59, %v5695_v61 }
 0x1c9   : > { %8187 = vst [vmem:[#allocation48_spill] sm:$0xff] %v5896_v56  ;;  %8188 = vst [vmem:[#allocation49_spill] sm:$0xff] %v5898_v51  ;;  %v5918_v31 = vsel %vm1669_vm3, 1, %v8186_v63  ;;  %v5920_v32 = vadd.f32 %v1653_v47, %v1514_v17  ;;  %vm8192_vm3 = vcmp.eq.s32.totalorder %v5768_v24, 0 }
 0x1cb   : > { %8189 = vst [vmem:[#allocation50_spill] sm:$0xff] %v5920_v32 }
 0x1cf   : > { %v5697_v62 = vpop.f32.mrf.mxu0 }
 0x1d0   : > { %8152 = vst [vmem:[#allocation14_spill] sm:$0xff] %v5697_v62  ;;  %v1519_v57 = vsel %vm1503_vm8, %v5697_v62, 0.0 }
 0x1d1   : > { %v5699_v0 = vpop.f32.mrf.mxu1  ;;  %v5701_v23 = vpop.f32.mrf.mxu0 }
 0x1d2   : > { %8153 = vst [vmem:[#allocation15_spill] sm:$0xff] %v5699_v0  ;;  %8154 = vst [vmem:[#allocation16_spill] sm:$0xff] %v5701_v23  ;;  %vm1674_vm7 = vcmp.gt.f32.partialorder %v5699_v0, %v5697_v62  ;;  %v1517_v47 = vsel %vm8192_vm3, %v5701_v23, 0.0  ;;  %v5946_v61 = vmax.f32 %v5697_v62, %v5699_v0  ;;  %vm8195_vm3 = vcmp.eq.s32.totalorder %v5771_v34, 0 }
 0x1d3   : > { %v5703_v28 = vpop.f32.mrf.mxu1  ;;  %v5705_v26 = vpop.f32.mrf.mxu0  ;;  %v5942_v17 = vsel %vm1674_vm7, 1, %v8186_v63 }
 0x1d4   : > { %8155 = vst [vmem:[#allocation17_spill] sm:$0xff] %v5703_v28  ;;  %8156 = vst [vmem:[#allocation18_spill] sm:$0xff] %v5705_v26  ;;  %v1656_v59 = vsel %vm1640_vm13, %v5703_v28, 0.0  ;;  %v1520_v32 = vsel %vm8195_vm3, %v5705_v26, 0.0  ;;  %vm1512_vm3 = vcmp.eq.s32.totalorder %v5929_v55, 0 }
 0x1d5   : > { %v5707_v30 = vpop.f32.mrf.mxu1  ;;  %v5709_v5 = vpop.f32.mrf.mxu0  ;;  %8193 = vst [vmem:[#allocation53_spill] sm:$0xff] %v5942_v17 }
 0x1d6   : > { %8157 = vst [vmem:[#allocation19_spill] sm:$0xff] %v5707_v30  ;;  %8158 = vst [vmem:[#allocation20_spill] sm:$0xff] %v5709_v5  ;;  %v1659_v17 = vsel %vm1643_vm15, %v5707_v30, 0.0  ;;  %vm1675_vm7 = vcmp.gt.f32.partialorder %v5707_v30, %v5705_v26 }
 0x1d7   : > { %v5711_v10 = vpop.f32.mrf.mxu1 }
 0x1d8   : > { %8159 = vst [vmem:[#allocation21_spill] sm:$0xff] %v5711_v10  ;;  %vm1673_vm15 = vcmp.gt.f32.partialorder %v5711_v10, %v5709_v5 }
 0x1df   : > { %v5713_v11 = vpop.f32.mrf.mxu0 }
 0x1e0   : > { %8160 = vst [vmem:[#allocation22_spill] sm:$0xff] %v5713_v11 }
 0x1e1   : > { %v5715_v38 = vpop.f32.mrf.mxu1  ;;  %v5717_v40 = vpop.f32.mrf.mxu0 }
 0x1e2   : > { %8161 = vst [vmem:[#allocation23_spill] sm:$0xff] %v5715_v38  ;;  %8162 = vst [vmem:[#allocation24_spill] sm:$0xff] %v5717_v40 }
 0x1e3   : > { %v5719_v43 = vpop.f32.mrf.mxu1  ;;  %v5721_v4 = vpop.f32.mrf.mxu0 }
 0x1e4   : > { %8163 = vst [vmem:[#allocation25_spill] sm:$0xff] %v5719_v43  ;;  %8164 = vst [vmem:[#allocation26_spill] sm:$0xff] %v5721_v4 }
 0x1e5   : > { %v5723_v48 = vpop.f32.mrf.mxu1  ;;  %v5726_v50 = vpop.f32.mrf.mxu0 }
 0x1e6   : > { %8165 = vst [vmem:[#allocation27_spill] sm:$0xff] %v5723_v48  ;;  %8166 = vst [vmem:[#allocation28_spill] sm:$0xff] %v5726_v50 }
 0x1e7   : > { %v5728_v19 = vpop.f32.mrf.mxu1 }
 0x1e8   : > { %8167 = vst [vmem:[#allocation29_spill] sm:$0xff] %v5728_v19 }
 0x1ef   : > { %v5730_v13 = vpop.f32.mrf.mxu0 }
 0x1f0   : > { %8168 = vst [vmem:[#allocation30_spill] sm:$0xff] %v5730_v13 }
 0x1f1   : > { %v5739_v53 = vpop.f32.mrf.mxu0  ;;  %v5741_v58 = vpop.f32.mrf.mxu1 }
 0x1f2   : > { %8169 = vst [vmem:[#allocation31_spill] sm:$0xff] %v5739_v53  ;;  %8170 = vst [vmem:[#allocation32_spill] sm:$0xff] %v5741_v58 }
 0x1f3   : > { %v5746_v60 = vpop.f32.mrf.mxu0  ;;  %v5748_v3 = vpop.f32.mrf.mxu1 }
 0x1f4   : > { %8171 = vst [vmem:[#allocation33_spill] sm:$0xff] %v5746_v60  ;;  %8172 = vst [vmem:[#allocation34_spill] sm:$0xff] %v5748_v3 }
 0x1f5   : > { %v5762_v15 = vpop.f32.mrf.mxu0  ;;  %v5764_v12 = vpop.f32.mrf.mxu1 }
 0x1f6   : > { %8174 = vst [vmem:[#allocation36_spill] sm:$0xff] %v5762_v15  ;;  %8175 = vst [vmem:[#allocation37_spill] sm:$0xff] %v5764_v12 }
 0x1f7   : > { %v5780_v35 = vpop.f32.mrf.mxu1  ;;  %v5782_v2 = vpop.f32.mrf.mxu0 }
 0x1f8   : > { %8176 = vst [vmem:[#allocation38_spill] sm:$0xff] %v5780_v35  ;;  %8177 = vst [vmem:[#allocation39_spill] sm:$0xff] %v5782_v2 }
 0x1f9   : > { %v5796_v16 = vpop.f32.mrf.mxu0  ;;  %v5798_v1 = vpop.f32.mrf.mxu1 }
 0x1fa   : > { %8178 = vst [vmem:[#allocation40_spill] sm:$0xff] %v5796_v16  ;;  %8179 = vst [vmem:[#allocation41_spill] sm:$0xff] %v5798_v1 }
 0x1fb   : > { %v5819_v41 = vpop.f32.mrf.mxu0  ;;  %v5821_v46 = vpop.f32.mrf.mxu1 }
 0x1fc   : > { %8180 = vst [vmem:[#allocation42_spill] sm:$0xff] %v5819_v41  ;;  %8181 = vst [vmem:[#allocation43_spill] sm:$0xff] %v5821_v46 }
 0x1fd   : > { %v5855_v37 = vpop.f32.mrf.mxu0  ;;  %v5857_v42 = vpop.f32.mrf.mxu1 }
 0x1fe   : > { %8182 = vst [vmem:[#allocation44_spill] sm:$0xff] %v5855_v37  ;;  %8183 = vst [vmem:[#allocation45_spill] sm:$0xff] %v5857_v42  ;;  %v1658_v42 = vsel %vm1642_vm11, %v5699_v0, 0.0  ;;  %vm1672_vm11 = vcmp.gt.f32.partialorder %v5703_v28, %v5701_v23 }
 0x1ff   : > { %v5888_v54 = vpop.f32.mrf.mxu0  ;;  %v5890_v52 = vpop.f32.mrf.mxu1 }
 0x200   : > { %8184 = vst [vmem:[#allocation46_spill] sm:$0xff] %v5888_v54  ;;  %8185 = vst [vmem:[#allocation47_spill] sm:$0xff] %v5890_v52  ;;  %v5909_v52 = vld [vmem:[%s5737_s8 + $0x70] sm:$0xff]  ;;  %v5912_v54 = vld [vmem:[%s5737_s8 + $0x60] sm:$0xff] }
 0x201   : > { %v5931_v51 = vpop.f32.mrf.mxu0  ;;  %v5933_v56 = vpop.f32.mrf.mxu1  ;;  %vm1648_vm8 = vcmp.eq.s32.totalorder %v5912_v54, 1  ;;  %vm1511_vm1 = vcmp.eq.s32.totalorder %v5909_v52, 0 }
 0x202   : > { %8190 = vst [vmem:[#allocation51_spill] sm:$0xff] %v5931_v51  ;;  %8191 = vst [vmem:[#allocation52_spill] sm:$0xff] %v5933_v56  ;;  %v5953_v56 = vld [vmem:[%s5737_s8 + $0x68] sm:$0xff]  ;;  %v5955_v51 = vadd.f32 %v1658_v42, %v1519_v57  ;;  %v5975_v57 = vsel %vm1672_vm11, 1, %v8186_v63  ;;  %v5979_v42 = vmax.f32 %v5701_v23, %v5703_v28  ;;  %v5995_v28 = vmax.f32 %v5705_v26, %v5707_v30 }
 0x203   : > { %v5967_v0 = vpop.f32.mrf.mxu0  ;;  %v5969_v62 = vpop.f32.mrf.mxu1  ;;  %8198 = vst [vmem:[#allocation57_spill] sm:$0xff] %v5975_v57  ;;  %vm1651_vm11 = vcmp.eq.s32.totalorder %v5929_v55, 1  ;;  %vm1649_vm13 = vcmp.eq.s32.totalorder %v5953_v56, 1  ;;  %v6025_v30 = vsel %vm1673_vm15, 1, %v8186_v63  ;;  %vm1680_vm15 = vcmp.gt.f32.partialorder %v5748_v3, %v5739_v53 }
 0x204   : > { %8194 = vst [vmem:[#allocation54_spill] sm:$0xff] %v5955_v51  ;;  %8196 = vst [vmem:[#allocation55_spill] sm:$0xff] %v5967_v0  ;;  %v1657_v51 = vsel %vm1641_vm10, %v5711_v10, 0.0  ;;  %v1518_v0 = vsel %vm1502_vm14, %v5709_v5, 0.0  ;;  %vm1678_vm10 = vcmp.gt.f32.partialorder %v5715_v38, %v5713_v11  ;;  %vm8203_vm14 = vcmp.eq.s32.totalorder %v5794_v39, 1 }
 0x205   : > { %8197 = vst [vmem:[#allocation56_spill] sm:$0xff] %v5969_v62  ;;  %v5988_v62 = vadd.f32 %v1656_v59, %v1517_v47  ;;  %8200 = vst [vmem:[#allocation59_spill] sm:$0xff] %v5995_v28  ;;  %v6000_v23 = vpop.f32.mrf.mxu0  ;;  %v6002_v57 = vpop.f32.mrf.mxu1  ;;  %v6008_v59 = vsel %vm1675_vm7, 1, %v8186_v63  ;;  %v6010_v47 = vadd.f32 %v1659_v17, %v1520_v32  ;;  %v6014_v28 = vmax.f32 %v5709_v5, %v5711_v10 }
 0x206   : > { %8201 = vst [vmem:[#allocation60_spill] sm:$0xff] %v6000_v23  ;;  %8202 = vst [vmem:[#allocation61_spill] sm:$0xff] %v6002_v57  ;;  %v6027_v32 = vadd.f32 %v1657_v51, %v1518_v0  ;;  %v1523_v17 = vsel %vm1507_vm0, %v5713_v11, 0.0  ;;  %vm1676_vm7 = vcmp.gt.f32.partialorder %v5719_v43, %v5717_v40  ;;  %v1521_v10 = vsel %vm1505_vm9, %v5717_v40, 0.0 }
 0x207   : > { %8199 = vst [vmem:[#allocation58_spill] sm:$0xff] %v5988_v62  ;;  %v1662_v62 = vsel %vm8203_vm14, %v5715_v38, 0.0  ;;  %vm1839_vm14 = vcmp.eq.s32.totalorder %v5751_v22, 2  ;;  %v6035_v26 = vpop.f32.mrf.mxu0  ;;  %v6037_v57 = vpop.f32.mrf.mxu1  ;;  %v6046_v51 = vsel %vm1678_vm10, 1, %v8186_v63  ;;  %v6050_v0 = vmax.f32 %v5713_v11, %v5715_v38 }
 0x208   : > { %8204 = vst [vmem:[#allocation62_spill] sm:$0xff] %v6035_v26  ;;  %8205 = vst [vmem:[#allocation63_spill] sm:$0xff] %v6037_v57  ;;  %v1660_v5 = vsel %vm1644_vm2, %v5719_v43, 0.0  ;;  %vm2044_vm0 = vcmp.eq.s32.totalorder %v5744_v7, 3  ;;  %v6056_v57 = vadd.f32 %v1662_v62, %v1523_v17  ;;  %v1524_v26 = vsel %vm1508_vm4, %v5721_v4, 0.0 }
 0x209   : > { %8206 = vst [vmem:[#allocation64_spill] sm:$0xff] %v6046_v51  ;;  %8207 = vst [vmem:[#allocation65_spill] sm:$0xff] %v6050_v0  ;;  %v1663_v51 = vsel %vm1647_vm6, %v5723_v48, 0.0  ;;  %vm1679_vm9 = vcmp.gt.f32.partialorder %v5723_v48, %v5721_v4  ;;  %v6066_v38 = vpop.f32.mrf.mxu0  ;;  %v6068_v11 = vpop.f32.mrf.mxu1  ;;  %v6071_v0 = vsel %vm1676_vm7, 1, %v8186_v63  ;;  %v6075_v62 = vmax.f32 %v5717_v40, %v5719_v43 }
 0x20a   : > { %8208 = vst [vmem:[#allocation66_spill] sm:$0xff] %v6056_v57  ;;  %8209 = vst [vmem:[#allocation67_spill] sm:$0xff] %v6066_v38  ;;  %v1661_v17 = vsel %vm1645_vm12, %v5728_v19, 0.0  ;;  %vm1677_vm2 = vcmp.gt.f32.partialorder %v5728_v19, %v5726_v50  ;;  %v6082_v57 = vadd.f32 %v1660_v5, %v1521_v10  ;;  %vm1682_vm4 = vcmp.gt.f32.partialorder %v5741_v58, %v5730_v13 }
 0x20b   : > { %8210 = vst [vmem:[#allocation68_spill] sm:$0xff] %v6068_v11  ;;  %8211 = vst [vmem:[#allocation69_spill] sm:$0xff] %v6071_v0  ;;  %v1522_v11 = vsel %vm1506_vm5, %v5726_v50, 0.0  ;;  %v6089_v0 = vmax.f32 %v5721_v4, %v5723_v48  ;;  %vm1842_vm6 = vcmp.eq.s32.totalorder %v5754_v14, 2  ;;  %v6094_v43 = vpop.f32.mrf.mxu0  ;;  %v6096_v40 = vpop.f32.mrf.mxu1  ;;  %v6099_v5 = vsel %vm1679_vm9, 1, %v8186_v63 }
 0x20c   : > { %8212 = vst [vmem:[#allocation70_spill] sm:$0xff] %v6082_v57  ;;  %8214 = vst [vmem:[#allocation72_spill] sm:$0xff] %v6094_v43  ;;  %v6101_v10 = vadd.f32 %v1663_v51, %v1524_v26  ;;  %v6105_v57 = vmax.f32 %v5726_v50, %v5728_v19  ;;  %vm8217_vm12 = vcmp.eq.s32.totalorder %v5909_v52, 1  ;;  %vm2042_vm5 = vcmp.eq.s32.totalorder %v5751_v22, 3 }
 0x20d   : > { %8213 = vst [vmem:[#allocation71_spill] sm:$0xff] %v6089_v0  ;;  %8215 = vst [vmem:[#allocation73_spill] sm:$0xff] %v6096_v40  ;;  %v1666_v48 = vsel %vm8217_vm12, %v5741_v58, 0.0  ;;  %v6112_v4 = vsel %vm1677_vm2, 1, %v8186_v63  ;;  %v6114_v0 = vadd.f32 %v1661_v17, %v1522_v11  ;;  %v1664_v26 = vsel %vm1648_vm8, %v5748_v3, 0.0  ;;  %v6123_v51 = vpop.f32.mrf.mxu0  ;;  %v6125_v19 = vpop.f32.mrf.mxu1 }
 0x20e   : > { %8216 = vst [vmem:[#allocation74_spill] sm:$0xff] %v6101_v10  ;;  %8218 = vst [vmem:[#allocation75_spill] sm:$0xff] %v6112_v4  ;;  %vm1840_vm10 = vcmp.eq.s32.totalorder %v5757_v25, 2  ;;  %vm1845_vm7 = vcmp.eq.s32.totalorder %v5760_v29, 2  ;;  %v1527_v11 = vsel %vm1511_vm1, %v5730_v13, 0.0  ;;  %vm8222_vm9 = vcmp.eq.s32.totalorder %v5912_v54, 0 }
 0x20f   : > { %8219 = vst [vmem:[#allocation76_spill] sm:$0xff] %v6114_v0  ;;  %8220 = vst [vmem:[#allocation77_spill] sm:$0xff] %v6123_v51  ;;  %v1525_v17 = vsel %vm8222_vm9, %v5739_v53, 0.0  ;;  %v6137_v50 = vsel %vm1682_vm4, 1, %v8186_v63  ;;  %v6141_v0 = vmax.f32 %v5730_v13, %v5741_v58  ;;  %v6143_v4 = vadd.f32 %v1666_v48, %v1527_v11  ;;  %v6155_v10 = vpop.f32.mrf.mxu0 }
 0x210   : > { %8221 = vst [vmem:[#allocation78_spill] sm:$0xff] %v6125_v19  ;;  %8223 = vst [vmem:[#allocation79_spill] sm:$0xff] %v6137_v50  ;;  %v1528_v52 = vsel %vm1512_vm3, %v5746_v60, 0.0  ;;  %v6150_v54 = vmax.f32 %v5739_v53, %v5748_v3  ;;  %vm8225_vm1 = vcmp.eq.s32.totalorder %v5744_v7, 2  ;;  %v6157_v50 = vpop.f32.mrf.mxu1  ;;  %v6160_v58 = vsel %vm1680_vm15, 1, %v8186_v63 }
 0x211   : > { %8224 = vst [vmem:[#allocation80_spill] sm:$0xff] %v6143_v4  ;;  %v1857_v19 = vsel %vm8225_vm1, %v5782_v2, 0.0  ;;  %8226 = vst [vmem:[#allocation81_spill] sm:$0xff] %v6155_v10  ;;  %v6162_v48 = vadd.f32 %v1664_v26, %v1525_v17  ;;  %vm8230_vm8 = vcmp.eq.s32.totalorder %v5953_v56, 0  ;;  %vm1683_vm3 = vcmp.gt.f32.partialorder %v5764_v12, %v5746_v60  ;;  %v6182_v17 = vpop.f32.mrf.mxu0 }
 0x212   : > { %8227 = vst [vmem:[#allocation82_spill] sm:$0xff] %v6157_v50  ;;  %8228 = vst [vmem:[#allocation83_spill] sm:$0xff] %v6160_v58  ;;  %v1526_v11 = vsel %vm8230_vm8, %v5762_v15, 0.0  ;;  %vm2045_vm2 = vcmp.eq.s32.totalorder %v5754_v14, 3  ;;  %v1667_v4 = vsel %vm1651_vm11, %v5764_v12, 0.0  ;;  %v1665_v13 = vsel %vm1649_vm13, %v5780_v35, 0.0 }
 0x213   : > { %8229 = vst [vmem:[#allocation84_spill] sm:$0xff] %v6162_v48  ;;  %vm1681_vm4 = vcmp.gt.f32.partialorder %v5780_v35, %v5762_v15  ;;  %v1905_v26 = vmax.f32 %v5834_v20, %v5782_v2  ;;  %vm2043_vm12 = vcmp.eq.s32.totalorder %v5757_v25, 3  ;;  %vm1843_vm15 = vcmp.eq.s32.totalorder %v5768_v24, 2  ;;  %8231 = vst [vmem:[#allocation85_spill] sm:$0xff] %v6182_v17  ;;  %v6184_v48 = vpop.f32.mrf.mxu1 }
 0x214   : > { %8232 = vst [vmem:[#allocation86_spill] sm:$0xff] %v6184_v48  ;;  %vm1873_vm11 = vcmp.gt.f32.partialorder %v5782_v2, %v5834_v20  ;;  %v1921_v55 = vadd.f32 %v1857_v19, %v5840_v9  ;;  %v1855_v56 = vsel %vm1839_vm14, %v5796_v16, 0.0  ;;  %vm1871_vm13 = vcmp.gt.f32.partialorder %v5796_v16, %v5867_v45  ;;  %v6207_v9 = vpop.f32.mrf.mxu0 }
 0x215   : > { %vm2048_vm9 = vcmp.eq.s32.totalorder %v5760_v29, 3  ;;  %v6196_v3 = vsel %vm1683_vm3, 1, %v8186_v63  ;;  %v6200_v53 = vmax.f32 %v5746_v60, %v5764_v12  ;;  %v1903_v20 = vmax.f32 %v5867_v45, %v5796_v16  ;;  %8235 = vst [vmem:[#allocation89_spill] sm:$0xff] %v6207_v9  ;;  %v6209_v2 = vpop.f32.mrf.mxu1  ;;  %v8263_v9 = vld [vmem:[#allocation58_spill] sm:$0xff] }
 0x216   : > { %8233 = vst [vmem:[#allocation87_spill] sm:$0xff] %v6196_v3  ;;  %v2060_v19 = vsel %vm2044_vm0, %v5798_v1, 0.0  ;;  %8236 = vst [vmem:[#allocation90_spill] sm:$0xff] %v6209_v2  ;;  %v6211_v58 = vadd.f32 %v1667_v4, %v1528_v52  ;;  %v6217_v3 = vsel %vm1681_vm4, 1, %v8186_v63  ;;  %v6221_v12 = vmax.f32 %v5762_v15, %v5780_v35  ;;  %v6230_v4 = vpop.f32.mrf.mxu0  ;;  %v8247_v35 = vld [vmem:[#allocation48_spill] sm:$0xff] }
 0x217   : > { %8234 = vst [vmem:[#allocation88_spill] sm:$0xff] %v6200_v53  ;;  %8238 = vst [vmem:[#allocation92_spill] sm:$0xff] %v6217_v3  ;;  %v6223_v45 = vadd.f32 %v1665_v13, %v1526_v11  ;;  %v1889_v60 = vsel %vm1873_vm11, 2, %v5830_v18  ;;  %v1887_v16 = vsel %vm1871_vm13, 2, %v5863_v44  ;;  %v1919_v2 = vadd.f32 %v1855_v56, %v5876_v8  ;;  %v6232_v63 = vpop.f32.mrf.mxu1 }
 0x218   : > { %8237 = vst [vmem:[#allocation91_spill] sm:$0xff] %v6211_v58  ;;  %8239 = vst [vmem:[#allocation93_spill] sm:$0xff] %v6221_v12  ;;  %vm2076_vm14 = vcmp.gt.f32.partialorder %v5798_v1, %v1905_v26  ;;  %vm1846_vm0 = vcmp.eq.s32.totalorder %v5771_v34, 2  ;;  %v6235_v52 = vmax.f32 %v1905_v26, %v5798_v1  ;;  %v6237_v58 = vadd.f32 %v2060_v19, %v1921_v55  ;;  %v6256_v11 = vpop.f32.mrf.mxu0  ;;  %v8246_v19 = vld [vmem:[#allocation46_spill] sm:$0xff] }
 0x219   : > { %8240 = vst [vmem:[#allocation94_spill] sm:$0xff] %v6223_v45  ;;  %8241 = vst [vmem:[#allocation95_spill] sm:$0xff] %v6230_v4  ;;  %v1858_v13 = vsel %vm1842_vm6, %v5819_v41, 0.0  ;;  %vm1874_vm1 = vcmp.gt.f32.partialorder %v5819_v41, %v5883_v6  ;;  %vm2247_vm8 = vcmp.eq.s32.totalorder %v5744_v7, 4  ;;  %v1906_v18 = vmax.f32 %v5883_v6, %v5819_v41  ;;  %v6254_v8 = vpop.f32.mrf.mxu1  ;;  %v8248_v41 = vld [vmem:[#allocation49_spill] sm:$0xff] }
 0x21a   : > { %8242 = vst [vmem:[#allocation96_spill] sm:$0xff] %v6232_v63  ;;  %8243 = vst [vmem:[#allocation97_spill] sm:$0xff] %v6235_v52  ;;  %v2058_v44 = vsel %vm2042_vm5, %v5821_v46, 0.0  ;;  %vm2074_vm3 = vcmp.gt.f32.partialorder %v5821_v46, %v1903_v20  ;;  %vm1872_vm4 = vcmp.gt.f32.partialorder %v5855_v37, %v5902_v49  ;;  %vm1844_vm11 = vcmp.eq.s32.totalorder %v5778_v27, 2  ;;  %v6280_v1 = vpop.f32.mrf.mxu0  ;;  %v8262_v4 = vld [vmem:[#allocation57_spill] sm:$0xff] }
 0x21b   : > { %8244 = vst [vmem:[#allocation98_spill] sm:$0xff] %v6254_v8  ;;  %vm2245_vm6 = vcmp.eq.s32.totalorder %v5751_v22, 4  ;;  %v6261_v6 = vsel %vm2076_vm14, 3, %v1889_v60  ;;  %v1856_v55 = vsel %vm1840_vm10, %v5855_v37, 0.0  ;;  %v1904_v56 = vmax.f32 %v5902_v49, %v5855_v37 }
 0x21c   : > { %8245 = vst [vmem:[#allocation99_spill] sm:$0xff] %v6261_v6  ;;  %v1861_v45 = vsel %vm1845_vm7, %v8246_v19, 0.0  ;;  %vm2450_vm5 = vcmp.eq.s32.totalorder %v5744_v7, 5  ;;  %v1890_v15 = vsel %vm1874_vm1, 2, %v8247_v35  ;;  %v1922_v8 = vadd.f32 %v1858_v13, %v8248_v41  ;;  %v6282_v6 = vpop.f32.mrf.mxu1  ;;  %v8251_v41 = vld [vmem:[#allocation50_spill] sm:$0xff] }
 0x21d   : > { %v6275_v60 = vmax.f32 %v1903_v20, %v5821_v46  ;;  %v1909_v26 = vmax.f32 %v5946_v61, %v8246_v19  ;;  %vm2046_vm10 = vcmp.eq.s32.totalorder %v5768_v24, 3  ;;  %v6286_v63 = vsel %vm2074_vm3, 3, %v1887_v16  ;;  %v8253_v16 = vld [vmem:[#allocation54_spill] sm:$0xff]  ;;  %v6302_v20 = vpop.f32.mrf.mxu0 }
 0x21e   : > { %8250 = vst [vmem:[#allocation49_spill] sm:$0xff] %v6286_v63  ;;  %v2122_v3 = vadd.f32 %v2058_v44, %v1919_v2  ;;  %v1888_v35 = vsel %vm1872_vm4, 2, %v5918_v31  ;;  %vm1877_vm7 = vcmp.gt.f32.partialorder %v8246_v19, %v5946_v61  ;;  %vm2049_vm13 = vcmp.eq.s32.totalorder %v5771_v34, 3  ;;  %8254 = vst [vmem:[#allocation50_spill] sm:$0xff] %v6302_v20  ;;  %v6304_v49 = vpop.f32.mrf.mxu1  ;;  %v8255_v61 = vld [vmem:[#allocation47_spill] sm:$0xff]  ;;  %v8258_v19 = vld [vmem:[#allocation52_spill] sm:$0xff] }
 0x21f   : > { %8249 = vst [vmem:[#allocation48_spill] sm:$0xff] %v6275_v60  ;;  %v1920_v13 = vadd.f32 %v1856_v55, %v8251_v41  ;;  %v8252_v60 = vld [vmem:[#allocation45_spill] sm:$0xff]  ;;  %v1925_v2 = vadd.f32 %v1861_v45, %v8253_v16  ;;  %v2059_v31 = vsel %vm2043_vm12, %v8255_v61, 0.0  ;;  %vm2075_vm4 = vcmp.gt.f32.partialorder %v8255_v61, %v1904_v56  ;;  %v8256_v44 = vld [vmem:[#allocation51_spill] sm:$0xff]  ;;  %v6325_v46 = vpop.f32.mrf.mxu0 }
 0x220   : > { %v2061_v52 = vsel %vm2045_vm2, %v8252_v60, 0.0  ;;  %vm2077_vm14 = vcmp.gt.f32.partialorder %v8252_v60, %v1906_v18  ;;  %v1859_v55 = vsel %vm1843_vm15, %v8256_v44, 0.0  ;;  %vm1875_vm2 = vcmp.gt.f32.partialorder %v8256_v44, %v5979_v42  ;;  %v8257_v45 = vld [vmem:[#allocation53_spill] sm:$0xff]  ;;  %8259 = vst [vmem:[#allocation54_spill] sm:$0xff] %v6325_v46  ;;  %v6327_v63 = vpop.f32.mrf.mxu1 }
 0x221   : > { %vm2047_vm1 = vcmp.eq.s32.totalorder %v5778_v27, 3  ;;  %v1893_v41 = vsel %vm1877_vm7, 2, %v8257_v45  ;;  %v1907_v16 = vmax.f32 %v5979_v42, %v8256_v44  ;;  %v2064_v37 = vsel %vm2048_vm9, %v8258_v19, 0.0  ;;  %8260 = vst [vmem:[#allocation53_spill] sm:$0xff] %v6327_v63  ;;  %v6347_v53 = vpop.f32.mrf.mxu0 }
 0x222   : > { %vm2080_vm12 = vcmp.gt.f32.partialorder %v8258_v19, %v1909_v26  ;;  %vm1847_vm3 = vcmp.eq.s32.totalorder %v5807_v33, 2  ;;  %v6331_v20 = vsel %vm2077_vm14, 3, %v1890_v15  ;;  %v6334_v45 = vmax.f32 %v1906_v18, %v8252_v60  ;;  %v6349_v15 = vpop.f32.mrf.mxu1 }
 0x223   : > { %8261 = vst [vmem:[#allocation100_spill] sm:$0xff] %v6331_v20  ;;  %v6336_v42 = vadd.f32 %v2061_v52, %v1922_v8  ;;  %v6339_v44 = vmax.f32 %v1904_v56, %v8255_v61  ;;  %v6341_v29 = vsel %vm2075_vm4, 3, %v1888_v35  ;;  %v6343_v12 = vadd.f32 %v2059_v31, %v1920_v13  ;;  %8264 = vst [vmem:[#allocation57_spill] sm:$0xff] %v6349_v15  ;;  %v8265_v8 = vld [vmem:[#allocation55_spill] sm:$0xff]  ;;  %v8267_v35 = vld [vmem:[#allocation56_spill] sm:$0xff] }
 0x224   : > { %v1891_v46 = vsel %vm1875_vm2, 2, %v8262_v4  ;;  %v1923_v63 = vadd.f32 %v1859_v55, %v8263_v9  ;;  %v6351_v20 = vsel %vm2080_vm12, 3, %v1893_v41  ;;  %v6354_v52 = vmax.f32 %v1909_v26, %v8258_v19  ;;  %v8266_v4 = vld [vmem:[#allocation59_spill] sm:$0xff]  ;;  %v6371_v26 = vpop.f32.mrf.mxu0  ;;  %v6373_v13 = vpop.f32.mrf.mxu1 }
 0x225   : > { %v6356_v18 = vadd.f32 %v2064_v37, %v1925_v2  ;;  %v1862_v56 = vsel %vm1846_vm0, %v8265_v8, 0.0  ;;  %vm2052_vm15 = vcmp.eq.s32.totalorder %v5794_v39, 3  ;;  %vm1878_vm9 = vcmp.gt.f32.partialorder %v8265_v8, %v8266_v4  ;;  %8268 = vst [vmem:[#allocation58_spill] sm:$0xff] %v6371_v26  ;;  %8269 = vst [vmem:[#allocation59_spill] sm:$0xff] %v6373_v13 }
 0x226   : > { %v1910_v9 = vmax.f32 %v8266_v4, %v8265_v8  ;;  %vm2078_vm7 = vcmp.gt.f32.partialorder %v8267_v35, %v1907_v16  ;;  %vm1850_vm14 = vcmp.eq.s32.totalorder %v5817_v36, 2  ;;  %v2263_v37 = vsel %vm2247_vm8, %v6256_v11, 0.0  ;;  %v6392_v13 = vpop.f32.mrf.mxu0  ;;  %v6394_v15 = vpop.f32.mrf.mxu1  ;;  %v8273_v4 = vld [vmem:[#allocation61_spill] sm:$0xff] }
 0x227   : > { %v1860_v2 = vsel %vm1844_vm11, %v6000_v23, 0.0  ;;  %vm1876_vm0 = vcmp.gt.f32.partialorder %v6000_v23, %v6014_v28  ;;  %vm2050_vm4 = vcmp.eq.s32.totalorder %v5807_v33, 3  ;;  %vm1848_vm2 = vcmp.eq.s32.totalorder %v5853_v21, 2  ;;  %8270 = vst [vmem:[#allocation101_spill] sm:$0xff] %v6392_v13  ;;  %8271 = vst [vmem:[#allocation102_spill] sm:$0xff] %v6394_v15 }
 0x228   : > { %v2327_v31 = vadd.f32 %v2263_v37, %v6237_v58  ;;  %v2261_v55 = vsel %vm2245_vm6, %v6280_v1, 0.0  ;;  %v1926_v41 = vadd.f32 %v1862_v56, %v6010_v47  ;;  %v1908_v19 = vmax.f32 %v6014_v28, %v6000_v23  ;;  %v6420_v15 = vpop.f32.mrf.mxu0  ;;  %v6422_v13 = vpop.f32.mrf.mxu1 }
 0x229   : > { %v2325_v61 = vadd.f32 %v2261_v55, %v2122_v3  ;;  %v2466_v60 = vsel %vm2450_vm5, %v6282_v6, 0.0  ;;  %v1894_v58 = vsel %vm1878_vm9, 2, %v6008_v59  ;;  %v2062_v47 = vsel %vm2046_vm10, %v8267_v35, 0.0  ;;  %8274 = vst [vmem:[#allocation104_spill] sm:$0xff] %v6420_v15  ;;  %8275 = vst [vmem:[#allocation105_spill] sm:$0xff] %v6422_v13 }
 0x22a   : > { %v6404_v56 = vmax.f32 %v1907_v16, %v8267_v35  ;;  %v6406_v3 = vadd.f32 %v2466_v60, %v2327_v31  ;;  %v6410_v37 = vsel %vm2078_vm7, 3, %v1891_v46  ;;  %v1892_v55 = vsel %vm1876_vm0, 2, %v6025_v30  ;;  %v8276_v60 = vld [vmem:[#allocation62_spill] sm:$0xff]  ;;  %v8278_v16 = vld [vmem:[#allocation65_spill] sm:$0xff]  ;;  %v6443_v23 = vpop.f32.mrf.mxu0  ;;  %v6445_v35 = vpop.f32.mrf.mxu1 }
 0x22b   : > { %v1924_v59 = vadd.f32 %v1860_v2, %v6027_v32  ;;  %v2065_v8 = vsel %vm2049_vm13, %v8273_v4, 0.0  ;;  %vm2081_vm8 = vcmp.gt.f32.partialorder %v8273_v4, %v1910_v9  ;;  %vm8277_vm11 = vcmp.eq.s32.totalorder %v5794_v39, 2  ;;  %v8280_v32 = vld [vmem:[#allocation63_spill] sm:$0xff]  ;;  %8282 = vst [vmem:[#allocation106_spill] sm:$0xff] %v6443_v23  ;;  %8283 = vst [vmem:[#allocation107_spill] sm:$0xff] %v6445_v35 }
 0x22c   : > { %8272 = vst [vmem:[#allocation103_spill] sm:$0xff] %v6406_v3  ;;  %v1865_v46 = vsel %vm8277_vm11, %v8276_v60, 0.0  ;;  %vm1881_vm6 = vcmp.gt.f32.partialorder %v8276_v60, %v8278_v16  ;;  %vm2053_vm5 = vcmp.eq.s32.totalorder %v5817_v36, 3  ;;  %vm8279_vm10 = vcmp.eq.s32.totalorder %v5751_v22, 5  ;;  %v6468_v23 = vpop.f32.mrf.mxu1 }
 0x22d   : > { %v2464_v28 = vsel %vm8279_vm10, %v6304_v49, 0.0  ;;  %v1913_v30 = vmax.f32 %v8278_v16, %v8276_v60  ;;  %v2063_v2 = vsel %vm2047_vm1, %v8280_v32, 0.0  ;;  %vm2079_vm13 = vcmp.gt.f32.partialorder %v8280_v32, %v1908_v19  ;;  %v8296_v60 = vld [vmem:[#allocation74_spill] sm:$0xff] }
 0x22e   : > { %vm2051_vm12 = vcmp.eq.s32.totalorder %v5853_v21, 3  ;;  %v6441_v31 = vadd.f32 %v2464_v28, %v2325_v61  ;;  %v6447_v3 = vadd.f32 %v2062_v47, %v1923_v63  ;;  %v6450_v13 = vmax.f32 %v1910_v9, %v8273_v4  ;;  %v6466_v47 = vpop.f32.mrf.mxu0  ;;  %v6491_v16 = vpop.f32.mrf.mxu1 }
 0x22f   : > { %v1863_v15 = vsel %vm1847_vm3, %v6066_v38, 0.0  ;;  %vm1879_vm1 = vcmp.gt.f32.partialorder %v6066_v38, %v6075_v62  ;;  %v6459_v61 = vsel %vm2081_vm8, 3, %v1894_v58  ;;  %v6461_v28 = vadd.f32 %v2065_v8, %v1926_v41  ;;  %v8289_v58 = vld [vmem:[#allocation69_spill] sm:$0xff] }
 0x230   : > { %8281 = vst [vmem:[#allocation65_spill] sm:$0xff] %v6441_v31  ;;  %8284 = vst [vmem:[#allocation108_spill] sm:$0xff] %v6447_v3  ;;  %v8286_v31 = vld [vmem:[#allocation66_spill] sm:$0xff]  ;;  %v1911_v63 = vmax.f32 %v6075_v62, %v6066_v38  ;;  %v6476_v9 = vsel %vm2079_vm13, 3, %v1892_v55  ;;  %v6479_v8 = vmax.f32 %v1908_v19, %v8280_v32  ;;  %v6481_v41 = vadd.f32 %v2063_v2, %v1924_v59  ;;  %v8291_v38 = vld [vmem:[#allocation68_spill] sm:$0xff] }
 0x231   : > { %8285 = vst [vmem:[#allocation109_spill] sm:$0xff] %v6450_v13  ;;  %v1929_v35 = vadd.f32 %v1865_v46, %v8286_v31  ;;  %8287 = vst [vmem:[#allocation66_spill] sm:$0xff] %v6468_v23  ;;  %v8288_v13 = vld [vmem:[#allocation64_spill] sm:$0xff]  ;;  %v1895_v62 = vsel %vm1879_vm1, 2, %v8289_v58  ;;  %v8290_v46 = vld [vmem:[#allocation70_spill] sm:$0xff]  ;;  %v2068_v4 = vsel %vm2052_vm15, %v8291_v38, 0.0  ;;  %vm2084_vm3 = vcmp.gt.f32.partialorder %v8291_v38, %v1913_v30 }
 0x232   : > { %v1897_v3 = vsel %vm1881_vm6, 2, %v8288_v13  ;;  %v1927_v31 = vadd.f32 %v1863_v15, %v8290_v46  ;;  %v6489_v13 = vpop.f32.mrf.mxu0  ;;  %8293 = vst [vmem:[#allocation69_spill] sm:$0xff] %v6491_v16  ;;  %v6494_v55 = vmax.f32 %v1913_v30, %v8291_v38  ;;  %v1866_v19 = vsel %vm1850_vm14, %v6094_v43, 0.0  ;;  %v8294_v59 = vld [vmem:[#allocation71_spill] sm:$0xff] }
 0x233   : > { %8292 = vst [vmem:[#allocation64_spill] sm:$0xff] %v6489_v13  ;;  %vm1882_vm9 = vcmp.gt.f32.partialorder %v6094_v43, %v8294_v59  ;;  %v1914_v15 = vmax.f32 %v8294_v59, %v6094_v43  ;;  %v2066_v2 = vsel %vm2050_vm4, %v6096_v40, 0.0  ;;  %vm2082_vm15 = vcmp.gt.f32.partialorder %v6096_v40, %v1911_v63  ;;  %v8301_v16 = vld [vmem:[#allocation75_spill] sm:$0xff] }
 0x234   : > { %v1864_v30 = vsel %vm1848_vm2, %v6123_v51, 0.0  ;;  %vm1880_vm7 = vcmp.gt.f32.partialorder %v6123_v51, %v6105_v57  ;;  %v6512_v58 = vsel %vm2084_vm3, 3, %v1897_v3  ;;  %v6514_v46 = vadd.f32 %v2068_v4, %v1929_v35  ;;  %v6521_v43 = vpop.f32.mrf.mxu0  ;;  %v6532_v4 = vpop.f32.mrf.mxu1 }
 0x235   : > { %v1912_v59 = vmax.f32 %v6105_v57, %v6123_v51  ;;  %vm1885_vm14 = vcmp.gt.f32.partialorder %v6155_v10, %v6141_v0  ;;  %vm2248_vm0 = vcmp.eq.s32.totalorder %v5754_v14, 4  ;;  %8295 = vst [vmem:[#allocation70_spill] sm:$0xff] %v6521_v43  ;;  %v1898_v38 = vsel %vm1882_vm9, 2, %v6099_v5  ;;  %8298 = vst [vmem:[#allocation74_spill] sm:$0xff] %v6532_v4  ;;  %v8302_v43 = vld [vmem:[#allocation76_spill] sm:$0xff]  ;;  %v8303_v5 = vld [vmem:[#allocation78_spill] sm:$0xff] }
 0x236   : > { %v6525_v32 = vadd.f32 %v1866_v19, %v8296_v60  ;;  %v6528_v3 = vmax.f32 %v1911_v63, %v6096_v40  ;;  %v1917_v35 = vmax.f32 %v6141_v0, %v6155_v10  ;;  %v6534_v57 = vsel %vm2082_vm15, 3, %v1895_v62  ;;  %v8306_v0 = vld [vmem:[#allocation79_spill] sm:$0xff]  ;;  %v6560_v36 = vpop.f32.mrf.mxu0 }
 0x237   : > { %8299 = vst [vmem:[#allocation110_spill] sm:$0xff] %v6534_v57  ;;  %v6536_v51 = vadd.f32 %v2066_v2, %v1927_v31  ;;  %v1896_v13 = vsel %vm1880_vm7, 2, %v8301_v16  ;;  %v1928_v23 = vadd.f32 %v1864_v30, %v8302_v43  ;;  %v6543_v60 = vsel %vm2053_vm5, %v8303_v5, 0.0  ;;  %8307 = vst [vmem:[#allocation79_spill] sm:$0xff] %v6560_v36  ;;  %v8308_v31 = vld [vmem:[#allocation88_spill] sm:$0xff]  ;;  %v8309_v16 = vld [vmem:[#allocation89_spill] sm:$0xff] }
 0x238   : > { %8297 = vst [vmem:[#allocation71_spill] sm:$0xff] %v6525_v32  ;;  %8304 = vst [vmem:[#allocation75_spill] sm:$0xff] %v6543_v60  ;;  %vm2085_vm4 = vcmp.gt.f32.partialorder %v8303_v5, %v1914_v15  ;;  %v6547_v63 = vmax.f32 %v1914_v15, %v8303_v5  ;;  %v1901_v19 = vsel %vm1885_vm14, 2, %v8306_v0  ;;  %vm2246_vm2 = vcmp.eq.s32.totalorder %v5757_v25, 4  ;;  %v8310_v2 = vld [vmem:[#allocation95_spill] sm:$0xff]  ;;  %v8311_v30 = vld [vmem:[#allocation93_spill] sm:$0xff]  ;;  %v6570_v32 = vpop.f32.mrf.mxu1 }
 0x239   : > { %8300 = vst [vmem:[#allocation111_spill] sm:$0xff] %v6536_v51  ;;  %v2067_v62 = vsel %vm2051_vm12, %v6157_v50, 0.0  ;;  %vm2083_vm8 = vcmp.gt.f32.partialorder %v6157_v50, %v1912_v59  ;;  %vm1883_vm11 = vcmp.gt.f32.partialorder %v6182_v17, %v6150_v54  ;;  %v1915_v43 = vmax.f32 %v6150_v54, %v6182_v17  ;;  %v8312_v60 = vld [vmem:[#allocation35_spill] sm:$0xff]  ;;  %8313 = vst [vmem:[#allocation88_spill] sm:$0xff] %v6570_v32  ;;  %v8314_v36 = vld [vmem:[#allocation97_spill] sm:$0xff]  ;;  %v6605_v54 = vpop.f32.mrf.mxu0 }
 0x23a   : > { %8305 = vst [vmem:[#allocation76_spill] sm:$0xff] %v6547_v63  ;;  %vm2451_vm6 = vcmp.eq.s32.totalorder %v5754_v14, 5  ;;  %vm2088_vm5 = vcmp.gt.f32.partialorder %v6184_v48, %v1917_v35  ;;  %vm1886_vm10 = vcmp.gt.f32.partialorder %v8309_v16, %v8308_v31  ;;  %v1918_v21 = vmax.f32 %v8308_v31, %v8309_v16  ;;  %v8315_v57 = vld [vmem:[#allocation83_spill] sm:$0xff]  ;;  %8320 = vst [vmem:[#allocation97_spill] sm:$0xff] %v6605_v54  ;;  %v8329_v17 = vld [vmem:[#allocation50_spill] sm:$0xff] }
 0x23b   : > { %v1916_v0 = vmax.f32 %v8311_v30, %v8310_v2  ;;  %vm2251_vm13 = vcmp.eq.s32.totalorder %v8312_v60, 4  ;;  %v6574_v10 = vsel %vm2085_vm4, 3, %v1898_v38  ;;  %v6577_v40 = vmax.f32 %v1912_v59, %v6157_v50  ;;  %v6645_v5 = vpop.f32.mrf.mxu0 }
 0x23c   : > { %vm1884_vm12 = vcmp.gt.f32.partialorder %v8310_v2, %v8311_v30  ;;  %v2311_v4 = vmax.f32 %v8314_v36, %v6256_v11  ;;  %v6583_v63 = vsel %vm2083_vm8, 3, %v1896_v13  ;;  %v6585_v51 = vadd.f32 %v2067_v62, %v1928_v23  ;;  %v8318_v30 = vld [vmem:[#allocation87_spill] sm:$0xff]  ;;  %v8319_v13 = vld [vmem:[#allocation90_spill] sm:$0xff]  ;;  %v6613_v2 = vpop.f32.mrf.mxu1  ;;  %8334 = vst [vmem:[#allocation113_spill] sm:$0xff] %v6645_v5  ;;  %v8345_v5 = vld [vmem:[#allocation101_spill] sm:$0xff] }
 0x23d   : > { %v1899_v15 = vsel %vm1883_vm11, 2, %v8315_v57  ;;  %vm2279_vm1 = vcmp.gt.f32.partialorder %v6256_v11, %v8314_v36  ;;  %vm2249_vm3 = vcmp.eq.s32.totalorder %v5768_v24, 4  ;;  %v6594_v38 = vsel %vm2088_vm5, 3, %v1901_v19  ;;  %v8321_v57 = vld [vmem:[#allocation92_spill] sm:$0xff]  ;;  %v8323_v19 = vld [vmem:[#allocation98_spill] sm:$0xff]  ;;  %8325 = vst [vmem:[#allocation83_spill] sm:$0xff] %v6613_v2 }
 0x23e   : > { %8316 = vst [vmem:[#allocation93_spill] sm:$0xff] %v6594_v38  ;;  %v6597_v59 = vmax.f32 %v1917_v35, %v6184_v48  ;;  %v1902_v23 = vsel %vm1886_vm10, 2, %v8318_v30  ;;  %vm2086_vm9 = vcmp.gt.f32.partialorder %v8319_v13, %v1915_v43  ;;  %vm2449_vm15 = vcmp.eq.s32.totalorder %v5757_v25, 5  ;;  %v8322_v36 = vld [vmem:[#allocation96_spill] sm:$0xff]  ;;  %v8327_v30 = vld [vmem:[#allocation99_spill] sm:$0xff]  ;;  %v8335_v2 = vld [vmem:[#allocation49_spill] sm:$0xff] }
 0x23f   : > { %v1900_v62 = vsel %vm1884_vm12, 2, %v8321_v57  ;;  %vm2089_vm7 = vcmp.gt.f32.partialorder %v8322_v36, %v1918_v21  ;;  %vm2087_vm14 = vcmp.gt.f32.partialorder %v8323_v19, %v1916_v0  ;;  %v8324_v35 = vld [vmem:[#allocation48_spill] sm:$0xff]  ;;  %vm2454_vm4 = vcmp.eq.s32.totalorder %v8312_v60, 5 }
 0x240   : > { %8317 = vst [vmem:[#allocation35_spill] sm:$0xff] %v6597_v59  ;;  %v2309_v48 = vmax.f32 %v8324_v35, %v6280_v1  ;;  %v6616_v31 = vmax.f32 %v1915_v43, %v8319_v13  ;;  %v2295_v16 = vsel %vm2279_vm1, 4, %v8327_v30  ;;  %vm2277_vm8 = vcmp.gt.f32.partialorder %v6280_v1, %v8324_v35 }
 0x241   : > { %vm2482_vm11 = vcmp.gt.f32.partialorder %v6282_v6, %v2311_v4  ;;  %vm2252_vm5 = vcmp.eq.s32.totalorder %v5771_v34, 4  ;;  %v6623_v57 = vsel %vm2086_vm9, 3, %v1899_v15  ;;  %v2264_v50 = vsel %vm2248_vm0, %v8329_v17, 0.0 }
 0x242   : > { %8326 = vst [vmem:[#allocation87_spill] sm:$0xff] %v6616_v31  ;;  %8328 = vst [vmem:[#allocation92_spill] sm:$0xff] %v6623_v57  ;;  %vm2280_vm10 = vcmp.gt.f32.partialorder %v8329_v17, %v6334_v45  ;;  %v2312_v43 = vmax.f32 %v6334_v45, %v8329_v17  ;;  %vm2452_vm12 = vcmp.eq.s32.totalorder %v5768_v24, 5  ;;  %v6633_v30 = vsel %vm2089_vm7, 3, %v1902_v23  ;;  %v8337_v23 = vld [vmem:[#allocation100_spill] sm:$0xff] }
 0x243   : > { %8330 = vst [vmem:[#allocation48_spill] sm:$0xff] %v6633_v30  ;;  %v6636_v35 = vmax.f32 %v1918_v21, %v8322_v36  ;;  %v6640_v15 = vsel %vm2087_vm14, 3, %v1900_v62  ;;  %v6643_v13 = vmax.f32 %v1916_v0, %v8323_v19  ;;  %v2293_v57 = vsel %vm2277_vm8, 4, %v8335_v2  ;;  %v6654_v21 = vpop.f32.mrf.mxu1  ;;  %v8339_v2 = vld [vmem:[#allocation53_spill] sm:$0xff] }
 0x244   : > { %8332 = vst [vmem:[#allocation50_spill] sm:$0xff] %v6640_v15  ;;  %v6648_v54 = vsel %vm2482_vm11, 5, %v2295_v16  ;;  %v6651_v45 = vmax.f32 %v2311_v4, %v6282_v6  ;;  %vm2480_vm0 = vcmp.gt.f32.partialorder %v6304_v49, %v2309_v48  ;;  %8336 = vst [vmem:[#allocation49_spill] sm:$0xff] %v6654_v21  ;;  %v2296_v36 = vsel %vm2280_vm10, 4, %v8337_v23  ;;  %v8338_v15 = vld [vmem:[#allocation54_spill] sm:$0xff] }
 0x245   : > { %8331 = vst [vmem:[#allocation99_spill] sm:$0xff] %v6636_v35  ;;  %8333 = vst [vmem:[#allocation112_spill] sm:$0xff] %v6643_v13  ;;  %v2328_v62 = vadd.f32 %v2264_v50, %v6336_v42  ;;  %v2262_v0 = vsel %vm2246_vm2, %v8338_v15, 0.0  ;;  %vm2278_vm1 = vcmp.gt.f32.partialorder %v8338_v15, %v6339_v44  ;;  %vm2250_vm9 = vcmp.eq.s32.totalorder %v5778_v27, 4  ;;  %v6684_v42 = vpop.f32.mrf.mxu0  ;;  %v6694_v21 = vpop.f32.mrf.mxu1  ;;  %v8346_v35 = vld [vmem:[#allocation109_spill] sm:$0xff] }
 0x246   : > { %v6665_v4 = vmax.f32 %v2309_v48, %v6304_v49  ;;  %v2310_v16 = vmax.f32 %v6339_v44, %v8338_v15  ;;  %v2467_v23 = vsel %vm2451_vm6, %v8339_v2, 0.0  ;;  %vm2483_vm7 = vcmp.gt.f32.partialorder %v8339_v2, %v2312_v43  ;;  %8340 = vst [vmem:[#allocation100_spill] sm:$0xff] %v6684_v42  ;;  %8341 = vst [vmem:[#allocation54_spill] sm:$0xff] %v6694_v21  ;;  %v8342_v21 = vld [vmem:[#allocation57_spill] sm:$0xff] }
 0x247   : > { %vm2455_vm14 = vcmp.eq.s32.totalorder %v5771_v34, 5  ;;  %vm2653_vm2 = vcmp.eq.s32.totalorder %v5744_v7, 6  ;;  %v6675_v50 = vsel %vm2480_vm0, 5, %v2293_v57  ;;  %v2267_v48 = vsel %vm2251_vm13, %v6347_v53, 0.0 }
 0x248   : > { %vm2283_vm8 = vcmp.gt.f32.partialorder %v6347_v53, %v6354_v52  ;;  %v2315_v44 = vmax.f32 %v6354_v52, %v6347_v53  ;;  %vm2651_vm6 = vcmp.eq.s32.totalorder %v5751_v22, 6  ;;  %v2294_v19 = vsel %vm2278_vm1, 4, %v6341_v29 }
 0x249   : > { %v2326_v13 = vadd.f32 %v2262_v0, %v6343_v12  ;;  %vm2281_vm11 = vcmp.gt.f32.partialorder %v6371_v26, %v6404_v56  ;;  %v2313_v57 = vmax.f32 %v6404_v56, %v6371_v26  ;;  %vm2255_vm13 = vcmp.eq.s32.totalorder %v5794_v39, 4 }
 0x24a   : > { %vm2856_vm10 = vcmp.eq.s32.totalorder %v5744_v7, 7  ;;  %v6699_v52 = vsel %vm2483_vm7, 5, %v2296_v36  ;;  %v6702_v29 = vmax.f32 %v2312_v43, %v8339_v2  ;;  %v6704_v12 = vadd.f32 %v2467_v23, %v2328_v62  ;;  %v8343_v62 = vld [vmem:[#allocation59_spill] sm:$0xff] }
 0x24b   : > { %v2265_v0 = vsel %vm2249_vm3, %v6371_v26, 0.0  ;;  %v2299_v56 = vsel %vm2283_vm8, 4, %v6351_v20  ;;  %v2331_v42 = vadd.f32 %v2267_v48, %v6356_v18  ;;  %v2465_v30 = vsel %vm2449_vm15, %v8342_v21, 0.0  ;;  %v6723_v20 = vpop.f32.mrf.mxu0  ;;  %v8344_v18 = vld [vmem:[#allocation108_spill] sm:$0xff] }
 0x24c   : > { %vm2481_vm0 = vcmp.gt.f32.partialorder %v8342_v21, %v2310_v16  ;;  %v6716_v36 = vmax.f32 %v2310_v16, %v8342_v21  ;;  %v2297_v43 = vsel %vm2281_vm11, 4, %v6410_v37  ;;  %v2470_v23 = vsel %vm2454_vm4, %v8343_v62, 0.0  ;;  %v8347_v16 = vld [vmem:[#allocation102_spill] sm:$0xff]  ;;  %v6732_v37 = vpop.f32.mrf.mxu1 }
 0x24d   : > { %vm2486_vm3 = vcmp.gt.f32.partialorder %v8343_v62, %v2315_v44  ;;  %v2329_v48 = vadd.f32 %v2265_v0, %v8344_v18  ;;  %v2268_v25 = vsel %vm2252_vm5, %v8345_v5, 0.0  ;;  %vm2284_vm15 = vcmp.gt.f32.partialorder %v8345_v5, %v8346_v35  ;;  %8348 = vst [vmem:[#allocation53_spill] sm:$0xff] %v6732_v37  ;;  %v8349_v0 = vld [vmem:[#allocation104_spill] sm:$0xff]  ;;  %v6760_v26 = vpop.f32.mrf.mxu0 }
 0x24e   : > { %vm2484_vm1 = vcmp.gt.f32.partialorder %v8347_v16, %v2313_v57  ;;  %v6734_v31 = vsel %vm2481_vm0, 5, %v2294_v19  ;;  %v6736_v60 = vadd.f32 %v2465_v30, %v2326_v13  ;;  %v2468_v38 = vsel %vm2452_vm12, %v8347_v16, 0.0 }
 0x24f   : > { %vm2282_vm4 = vcmp.gt.f32.partialorder %v8349_v0, %v6479_v8  ;;  %vm2854_vm5 = vcmp.eq.s32.totalorder %v5751_v22, 7  ;;  %v6744_v18 = vsel %vm2486_vm3, 5, %v2299_v56  ;;  %v6747_v32 = vmax.f32 %v2315_v44, %v8343_v62  ;;  %v8362_v22 = vld [vmem:[#allocation41_spill] sm:$0xff] }
 0x250   : > { %v6749_v59 = vadd.f32 %v2470_v23, %v2331_v42  ;;  %v2316_v13 = vmax.f32 %v8346_v35, %v8345_v5  ;;  %v2300_v19 = vsel %vm2284_vm15, 4, %v6459_v61  ;;  %v2332_v24 = vadd.f32 %v2268_v25, %v6461_v28  ;;  %v6771_v28 = vpop.f32.mrf.mxu1  ;;  %v8352_v35 = vld [vmem:[#allocation105_spill] sm:$0xff]  ;;  %v8354_v25 = vld [vmem:[#allocation106_spill] sm:$0xff] }
 0x251   : > { %v6755_v30 = vsel %vm2484_vm1, 5, %v2297_v43  ;;  %v6758_v37 = vmax.f32 %v2313_v57, %v8347_v16  ;;  %v6762_v56 = vadd.f32 %v2468_v38, %v2329_v48  ;;  %v2266_v44 = vsel %vm2250_vm9, %v8349_v0, 0.0  ;;  %v8353_v43 = vld [vmem:[#allocation103_spill] sm:$0xff] }
 0x252   : > { %8350 = vst [vmem:[#allocation57_spill] sm:$0xff] %v6749_v59  ;;  %v2298_v42 = vsel %vm2282_vm4, 4, %v6476_v9  ;;  %v2314_v61 = vmax.f32 %v6479_v8, %v8349_v0  ;;  %vm2453_vm12 = vcmp.eq.s32.totalorder %v5778_v27, 5  ;;  %v2471_v57 = vsel %vm2455_vm14, %v8352_v35, 0.0  ;;  %v8355_v0 = vld [vmem:[#allocation65_spill] sm:$0xff] }
 0x253   : > { %8351 = vst [vmem:[#allocation59_spill] sm:$0xff] %v6762_v56  ;;  %v2669_v38 = vsel %vm2653_vm2, %v6723_v20, 0.0  ;;  %vm2685_vm9 = vcmp.gt.f32.partialorder %v6723_v20, %v6651_v45  ;;  %v2717_v9 = vmax.f32 %v6651_v45, %v6723_v20  ;;  %vm2487_vm7 = vcmp.gt.f32.partialorder %v8352_v35, %v2316_v13 }
 0x254   : > { %v2701_v8 = vsel %vm2685_vm9, 6, %v6648_v54  ;;  %v2733_v23 = vadd.f32 %v2669_v38, %v8353_v43  ;;  %v2667_v34 = vsel %vm2651_vm6, %v6760_v26, 0.0  ;;  %v2330_v48 = vadd.f32 %v2266_v44, %v6481_v41 }
 0x255   : > { %v2271_v56 = vsel %vm2255_vm13, %v8354_v25, 0.0  ;;  %v2731_v59 = vadd.f32 %v2667_v34, %v8355_v0  ;;  %v2872_v45 = vsel %vm2856_vm10, %v6771_v28, 0.0  ;;  %vm2654_vm14 = vcmp.eq.s32.totalorder %v5754_v14, 6  ;;  %v6818_v0 = vpop.f32.mrf.mxu1 }
 0x256   : > { %v6799_v54 = vmax.f32 %v2316_v13, %v8352_v35  ;;  %vm2888_vm2 = vcmp.gt.f32.partialorder %v6771_v28, %v2717_v9  ;;  %v2920_v38 = vmax.f32 %v2717_v9, %v6771_v28  ;;  %v6803_v41 = vadd.f32 %v2872_v45, %v2733_v23  ;;  %v8359_v23 = vld [vmem:[#allocation6_spill] sm:$0xff] }
 0x257   : > { %v6805_v44 = vsel %vm2487_vm7, 5, %v2300_v19  ;;  %v6807_v39 = vadd.f32 %v2471_v57, %v2332_v24  ;;  %vm2287_vm8 = vcmp.gt.f32.partialorder %v8354_v25, %v6494_v55  ;;  %v2904_v7 = vsel %vm2888_vm2, 7, %v2701_v8  ;;  %v8358_v57 = vld [vmem:[#allocation107_spill] sm:$0xff] }
 0x258   : > { %8356 = vst [vmem:[#allocation108_spill] sm:$0xff] %v6805_v44  ;;  %v6822_v13 = vmax.f32 %v6494_v55, %v8354_v25  ;;  %v6825_v19 = vadd.f32 %v2271_v56, %v6514_v46  ;;  %v6827_v24 = vmax.f32 %v2920_v38, -1e+30  ;;  %vm3608_vm6 = vcmp.gt.f32.partialorder %v2920_v38, -1e+30  ;;  %v8360_v46 = vld [vmem:[#allocation7_spill] sm:$0xff] }
 0x259   : > { %8357 = vst [vmem:[#allocation109_spill] sm:$0xff] %v6807_v39  ;;  %vm2485_vm11 = vcmp.gt.f32.partialorder %v8358_v57, %v2314_v61  ;;  %vm2683_vm13 = vcmp.gt.f32.partialorder %v6760_v26, %v6665_v4  ;;  %v2715_v9 = vmax.f32 %v6665_v4, %v6760_v26  ;;  %v3624_v8 = vsel %vm3608_vm6, %v2904_v7, 0  ;;  %v8361_v38 = vld [vmem:[#allocation39_spill] sm:$0xff] }
 0x25a   : > { %v3032_v43 = vsub.f32 -1e+30, %v6827_v24  ;;  %v3096_v34 = vsub.f32 %v8359_v23, %v6827_v24  ;;  %v3160_v56 = vsub.f32 %v8360_v46, %v6827_v24  ;;  %3723 = vst [vmem:[%s6816_s11 + $0x10] sm:$0xff] %v3624_v8  ;;  %v2870_v45 = vsel %vm2854_vm5, %v6818_v0, 0.0 }
 0x25b   : > { %v3224_v39 = vsub.f32 %v8361_v38, %v6827_v24  ;;  %v3352_v7 = vsub.f32 %v6256_v11, %v6827_v24  ;;  %v3416_v35 = vsub.f32 %v6282_v6, %v6827_v24  ;;  %v3480_v23 = vsub.f32 %v6723_v20, %v6827_v24 }
 0x25c   : > { %vm2253_vm10 = vcmp.eq.s32.totalorder %v5807_v33, 4  ;;  %v3050_v8 = vmul.f32 1.442695, %v3032_v43  ;;  %v3114_v46 = vmul.f32 1.442695, %v3096_v34  ;;  %v3288_v5 = vsub.f32 %v8362_v22, %v6827_v24  ;;  %v6868_v43 = vpop.f32.mrf.mxu0  ;;  %v6872_v22 = vld [vmem:[%s5737_s8 + $0x8] sm:$0xff] }
 0x25d   : > { %v3544_v38 = vsub.f32 %v6771_v28, %v6827_v24  ;;  %v6860_v11 = vsel %vm2287_vm8, 4, %v6512_v58  ;;  %v2469_v6 = vsel %vm2453_vm12, %v8358_v57, 0.0  ;;  %v6866_v20 = vmax.f32 %v2314_v61, %v8358_v57  ;;  %v6884_v28 = vld [vmem:[%s5737_s8 + $0x18] sm:$0xff] }
 0x25e   : > { %v2918_v34 = vmax.f32 %v2715_v9, %v6818_v0  ;;  %vm2652_vm0 = vcmp.eq.s32.totalorder %v6872_v22, 6  ;;  %v6877_v55 = vsel %vm2485_vm11, 5, %v2298_v42  ;;  %v2699_v27 = vsel %vm2683_vm13, 6, %v6675_v50  ;;  %8364 = vst [vmem:[#allocation103_spill] sm:$0xff] %v6884_v28 }
 0x25f   : > { %8363 = vst [vmem:[#allocation102_spill] sm:$0xff] %v6866_v20  ;;  %4616 = vpow2.f32 %v3050_v8  ;;  %v3178_v58 = vmul.f32 1.442695, %v3160_v56  ;;  %vm2857_vm3 = vcmp.eq.s32.totalorder %v6884_v28, 7  ;;  %v3242_v25 = vmul.f32 1.442695, %v3224_v39 }
 0x260   : > { %vm2886_vm15 = vcmp.gt.f32.partialorder %v6818_v0, %v2715_v9  ;;  %v6888_v20 = vadd.f32 %v2870_v45, %v2731_v59  ;;  %v6890_v44 = vmax.f32 %v2918_v34, -1e+30  ;;  %v6892_v42 = vadd.f32 %v2469_v6, %v2330_v48  ;;  %v8366_v59 = vld [vmem:[#allocation8_spill] sm:$0xff]  ;;  %v8367_v45 = vld [vmem:[#allocation9_spill] sm:$0xff] }
 0x261   : > { %4618 = vpow2.f32 %v3114_v46  ;;  %v3306_v61 = vmul.f32 1.442695, %v3288_v5  ;;  %v2670_v4 = vsel %vm2654_vm14, %v6868_v43, 0.0  ;;  %vm2686_vm1 = vcmp.gt.f32.partialorder %v6868_v43, %v6702_v29 }
 0x262   : > { %8365 = vst [vmem:[#allocation65_spill] sm:$0xff] %v6892_v42  ;;  %v2718_v50 = vmax.f32 %v6702_v29, %v6868_v43  ;;  %v3030_v39 = vsub.f32 -1e+30, %v6890_v44  ;;  %v3094_v9 = vsub.f32 %v8366_v59, %v6890_v44  ;;  %4620 = vpow2.f32 %v3178_v58  ;;  %v8368_v42 = vld [vmem:[#allocation40_spill] sm:$0xff] }
 0x263   : > { %v3370_v48 = vmul.f32 1.442695, %v3352_v7  ;;  %v2902_v56 = vsel %vm2886_vm15, 7, %v2699_v27  ;;  %v3350_v5 = vsub.f32 %v6280_v1, %v6890_v44  ;;  %4622 = vpow2.f32 %v3242_v25  ;;  %v6917_v27 = vpop.f32.mrf.mxu0 }
 0x264   : > { %v3046_v14 = vmul.f32 1.442695, %v3030_v39  ;;  %v3158_v8 = vsub.f32 %v8367_v45, %v6890_v44  ;;  %vm3606_vm4 = vcmp.gt.f32.partialorder %v2918_v34, -1e+30  ;;  %4624 = vpow2.f32 %v3306_v61 }
 0x265   : > { %v3434_v46 = vmul.f32 1.442695, %v3416_v35  ;;  %v2734_v6 = vadd.f32 %v2670_v4, %v6704_v12  ;;  %v3222_v59 = vsub.f32 %v8368_v42, %v6890_v44  ;;  %v3110_v58 = vmul.f32 1.442695, %v3094_v9  ;;  %v8369_v12 = vld [vmem:[#allocation43_spill] sm:$0xff]  ;;  %v6921_v4 = vpop.f32.mrf.mxu1 }
 0x266   : > { %v3414_v7 = vsub.f32 %v6304_v49, %v6890_v44  ;;  %v3478_v1 = vsub.f32 %v6760_v26, %v6890_v44  ;;  %v3542_v25 = vsub.f32 %v6818_v0, %v6890_v44  ;;  %4626 = vpow2.f32 %v3370_v48 }
 0x267   : > { %v3498_v35 = vmul.f32 1.442695, %v3480_v23  ;;  %v3286_v34 = vsub.f32 %v8369_v12, %v6890_v44  ;;  %v3622_v61 = vsel %vm3606_vm4, %v2902_v56, 0  ;;  %v6926_v49 = vsel %vm2253_vm10, %v6466_v47, 0.0 }
 0x268   : > { %v2702_v26 = vsel %vm2686_vm1, 6, %v6699_v52  ;;  %4628 = vpow2.f32 %v3046_v14  ;;  %v3174_v0 = vmul.f32 1.442695, %v3158_v8  ;;  %3721 = vst [vmem:[%s6816_s11] sm:$0xff] %v3622_v61  ;;  %v3562_v23 = vmul.f32 1.442695, %v3544_v38 }
 0x269   : > { %4630 = vpow2.f32 %v3434_v46  ;;  %v3238_v42 = vmul.f32 1.442695, %v3222_v59  ;;  %v2668_v39 = vsel %vm2652_vm0, %v6917_v27, 0.0  ;;  %v2873_v33 = vsel %vm2857_vm3, %v6921_v4, 0.0 }
 0x26a   : > { %4632 = vpow2.f32 %v3110_v58  ;;  %vm2889_vm5 = vcmp.gt.f32.partialorder %v6921_v4, %v2718_v50  ;;  %v2921_v29 = vmax.f32 %v2718_v50, %v6921_v4  ;;  %v3302_v52 = vmul.f32 1.442695, %v3286_v34 }
 0x26b   : > { %4634 = vpow2.f32 %v3498_v35  ;;  %v2905_v9 = vsel %vm2889_vm5, 7, %v2702_v26  ;;  %v6941_v48 = vadd.f32 %v2873_v33, %v2734_v6  ;;  %vm2855_vm12 = vcmp.eq.s32.totalorder %v6872_v22, 7  ;;  %v8370_v6 = vld [vmem:[#allocation10_spill] sm:$0xff]  ;;  %v8371_v35 = vld [vmem:[#allocation11_spill] sm:$0xff] }
 0x26c   : > { %v4617_v38 = vpop.eup %4616  ;;  %4636 = vpow2.f32 %v3174_v0  ;;  %v3366_v56 = vmul.f32 1.442695, %v3350_v5  ;;  %v6944_v14 = vmax.f32 %v2921_v29, -1e+30  ;;  %vm3609_vm9 = vcmp.gt.f32.partialorder %v2921_v29, -1e+30 }
 0x26d   : > { %v3080_v45 = vmul.f32 0.0, %v4617_v38  ;;  %4638 = vpow2.f32 %v3562_v23  ;;  %v3430_v8 = vmul.f32 1.442695, %v3414_v7  ;;  %v3625_v46 = vsel %vm3609_vm9, %v2905_v9, 0  ;;  %v8372_v0 = vld [vmem:[#allocation42_spill] sm:$0xff]  ;;  %v8373_v9 = vld [vmem:[#allocation45_spill] sm:$0xff] }
 0x26e   : > { %v4619_v59 = vpop.eup %4618  ;;  %4640 = vpow2.f32 %v3238_v42  ;;  %v3033_v50 = vsub.f32 -1e+30, %v6944_v14  ;;  %v3097_v58 = vsub.f32 %v8370_v6, %v6944_v14  ;;  %v3161_v12 = vsub.f32 %v8371_v35, %v6944_v14  ;;  %3724 = vst [vmem:[%s6816_s11 + $0x18] sm:$0xff] %v3625_v46 }
 0x26f   : > { %v3144_v34 = vadd.f32 %v4619_v59, %v3080_v45  ;;  %4642 = vpow2.f32 %v3302_v52  ;;  %v3494_v5 = vmul.f32 1.442695, %v3478_v1  ;;  %vm2684_vm7 = vcmp.gt.f32.partialorder %v6917_v27, %v6716_v36  ;;  %v4621_v61 = vpop.eup %4620 }
 0x270   : > { %4644 = vpow2.f32 %v3366_v56  ;;  %v3052_v7 = vmul.f32 1.442695, %v3033_v50  ;;  %v3116_v26 = vmul.f32 1.442695, %v3097_v58  ;;  %v3225_v23 = vsub.f32 %v8372_v0, %v6944_v14  ;;  %v4623_v42 = vpop.eup %4622 }
 0x271   : > { %v3208_v33 = vadd.f32 %v4621_v61, %v3144_v34  ;;  %4646 = vpow2.f32 %v3430_v8  ;;  %v3558_v29 = vmul.f32 1.442695, %v3542_v25  ;;  %v3289_v38 = vsub.f32 %v8373_v9, %v6944_v14  ;;  %v4625_v45 = vpop.eup %4624  ;;  %v6966_v8 = vpop.f32.mrf.mxu1  ;;  %v4938_v34 = vld [vmem:[%s5737_s8 + $0x50] sm:$0xff] }
 0x272   : > { %4648 = vpow2.f32 %v3052_v7  ;;  %v3180_v1 = vmul.f32 1.442695, %v3161_v12  ;;  %v3481_v52 = vsub.f32 %v6868_v43, %v6944_v14  ;;  %v3545_v56 = vsub.f32 %v6921_v4, %v6944_v14  ;;  %v6985_v9 = vpop.f32.mrf.mxu0 }
 0x273   : > { %v3272_v46 = vadd.f32 %v4623_v42, %v3208_v33  ;;  %4650 = vpow2.f32 %v3494_v5  ;;  %v2716_v59 = vmax.f32 %v6716_v36, %v6917_v27  ;;  %v3353_v25 = vsub.f32 %v8329_v17, %v6944_v14  ;;  %v4627_v50 = vpop.eup %4626 }
 0x274   : > { %vm2285_vm14 = vcmp.gt.f32.partialorder %v6466_v47, %v6528_v3  ;;  %v2732_v43 = vadd.f32 %v2668_v39, %v6736_v60  ;;  %4652 = vpow2.f32 %v3116_v26  ;;  %v3244_v6 = vmul.f32 1.442695, %v3225_v23 }
 0x275   : > { %v4629_v4 = vpop.eup %4628  ;;  %v3336_v58 = vadd.f32 %v4625_v45, %v3272_v46  ;;  %4654 = vpow2.f32 %v3558_v29  ;;  %v2700_v35 = vsel %vm2684_vm7, 6, %v6734_v31  ;;  %v3417_v17 = vsub.f32 %v8339_v2, %v6944_v14 }
 0x276   : > { %v4631_v12 = vpop.eup %4630  ;;  %vm2458_vm2 = vcmp.eq.s32.totalorder %v4938_v34, 5  ;;  %v3078_v5 = vmul.f32 0.0, %v4629_v4  ;;  %4656 = vpow2.f32 %v3180_v1  ;;  %v3308_v61 = vmul.f32 1.442695, %v3289_v38 }
 0x277   : > { %v2871_v60 = vsel %vm2855_vm12, %v6966_v8, 0.0  ;;  %v4633_v39 = vpop.eup %4632  ;;  %v3400_v7 = vadd.f32 %v4627_v50, %v3336_v58  ;;  %v3372_v26 = vmul.f32 1.442695, %v3353_v25  ;;  %vm2887_vm8 = vcmp.gt.f32.partialorder %v6966_v8, %v2716_v59  ;;  %v8374_v50 = vld [vmem:[#allocation110_spill] sm:$0xff]  ;;  %v8375_v58 = vld [vmem:[#allocation12_spill] sm:$0xff] }
 0x278   : > { %v2919_v31 = vmax.f32 %v2716_v59, %v6966_v8  ;;  %v4635_v36 = vpop.eup %4634  ;;  %v3142_v0 = vadd.f32 %v4633_v39, %v3078_v5  ;;  %4658 = vpow2.f32 %v3244_v6  ;;  %v2903_v2 = vsel %vm2887_vm8, 7, %v2700_v35 }
 0x279   : > { %v6983_v23 = vadd.f32 %v2871_v60, %v2732_v43  ;;  %v4637_v42 = vpop.eup %4636  ;;  %v3464_v33 = vadd.f32 %v4631_v12, %v3400_v7  ;;  %v3436_v29 = vmul.f32 1.442695, %v3417_v17  ;;  %4660 = vpow2.f32 %v3308_v61 }
 0x27a   : > { %v6987_v38 = vmax.f32 %v2919_v31, -1e+30  ;;  %vm3607_vm6 = vcmp.gt.f32.partialorder %v2919_v31, -1e+30  ;;  %v4639_v45 = vpop.eup %4638  ;;  %v3206_v1 = vadd.f32 %v4637_v42, %v3142_v0  ;;  %v3500_v46 = vmul.f32 1.442695, %v3481_v52 }
 0x27b   : > { %v3623_v59 = vsel %vm3607_vm6, %v2903_v2, 0  ;;  %v4641_v25 = vpop.eup %4640  ;;  %v6993_v43 = vsel %vm2285_vm14, 4, %v8374_v50  ;;  %v3528_v6 = vadd.f32 %v4635_v36, %v3464_v33  ;;  %4662 = vpow2.f32 %v3372_v26  ;;  %v8376_v52 = vld [vmem:[#allocation13_spill] sm:$0xff]  ;;  %v4939_v36 = vld [vmem:[%s5737_s8 + $0x40] sm:$0xff]  ;;  %v8377_v42 = vld [vmem:[#allocation44_spill] sm:$0xff] }
 0x27c   : > { %v3031_v4 = vsub.f32 -1e+30, %v6987_v38  ;;  %v3095_v35 = vsub.f32 %v8375_v58, %v6987_v38  ;;  %3722 = vst [vmem:[%s6816_s11 + $0x8] sm:$0xff] %v3623_v59  ;;  %v4643_v17 = vpop.eup %4642  ;;  %v3270_v12 = vadd.f32 %v4641_v25, %v3206_v1  ;;  %vm2689_vm11 = vcmp.gt.f32.partialorder %v6985_v9, %v6747_v32  ;;  %v8378_v1 = vld [vmem:[#allocation47_spill] sm:$0xff] }
 0x27d   : > { %v3159_v5 = vsub.f32 %v8376_v52, %v6987_v38  ;;  %v4645_v61 = vpop.eup %4644  ;;  %v3592_v60 = vadd.f32 %v4639_v45, %v3528_v6  ;;  %4664 = vpow2.f32 %v3436_v29  ;;  %v3564_v39 = vmul.f32 1.442695, %v3545_v56 }
 0x27e   : > { %v3048_v7 = vmul.f32 1.442695, %v3031_v4  ;;  %v4647_v31 = vpop.eup %4646  ;;  %vm2456_vm13 = vcmp.eq.s32.totalorder %v4939_v36, 5  ;;  %v3334_v0 = vadd.f32 %v4643_v17, %v3270_v12  ;;  %4666 = vpow2.f32 %v3500_v46  ;;  %v8379_v4 = vld [vmem:[#allocation66_spill] sm:$0xff] }
 0x27f   : > { %v3112_v2 = vmul.f32 1.442695, %v3095_v35  ;;  %v3223_v26 = vsub.f32 %v8377_v42, %v6987_v38  ;;  %v4649_v33 = vpop.eup %4648  ;;  %4668 = vlog2.f32 %v3592_v60  ;;  %v3287_v59 = vsub.f32 %v8378_v1, %v6987_v38 }
 0x280   : > { %v3479_v45 = vsub.f32 %v6917_v27, %v6987_v38  ;;  %v3543_v56 = vsub.f32 %v6966_v8, %v6987_v38  ;;  %v4651_v29 = vpop.eup %4650  ;;  %v3398_v25 = vadd.f32 %v4645_v61, %v3334_v0  ;;  %v3081_v50 = vmul.f32 0.0, %v4649_v33  ;;  %v7081_v8 = vld [vmem:[%s5737_s8 + $0x48] sm:$0xff] }
 0x281   : > { %4670 = vpow2.f32 %v3048_v7  ;;  %v3176_v46 = vmul.f32 1.442695, %v3159_v5  ;;  %v4653_v6 = vpop.eup %4652  ;;  %v2474_v58 = vsel %vm2458_vm2, %v8379_v4, 0.0  ;;  %v2721_v35 = vmax.f32 %v6747_v32, %v6985_v9 }
 0x282   : > { %4672 = vpow2.f32 %v3564_v39  ;;  %v3351_v17 = vsub.f32 %v8338_v15, %v6987_v38  ;;  %v4655_v27 = vpop.eup %4654  ;;  %v3462_v12 = vadd.f32 %v4647_v31, %v3398_v25  ;;  %v3145_v52 = vadd.f32 %v4653_v6, %v3081_v50  ;;  %v7028_v15 = vpop.f32.mrf.mxu1  ;;  %v8382_v25 = vld [vmem:[#allocation76_spill] sm:$0xff] }
 0x283   : > { %4674 = vpow2.f32 %v3112_v2  ;;  %v3240_v60 = vmul.f32 1.442695, %v3223_v26  ;;  %v4657_v61 = vpop.eup %4656  ;;  %v7020_v5 = vmax.f32 %v6528_v3, %v6466_v47  ;;  %vm2490_vm10 = vcmp.gt.f32.partialorder %v8379_v4, %v6822_v13  ;;  %v8380_v3 = vld [vmem:[#allocation111_spill] sm:$0xff] }
 0x284   : > { %v2705_v34 = vsel %vm2689_vm11, 6, %v6744_v18  ;;  %v3304_v39 = vmul.f32 1.442695, %v3287_v59  ;;  %v3526_v7 = vadd.f32 %v4651_v29, %v3462_v12  ;;  %v3209_v31 = vadd.f32 %v4657_v61, %v3145_v52  ;;  %v7063_v61 = vpop.f32.mrf.mxu0 }
 0x285   : > { %4676 = vpow2.f32 %v3176_v46  ;;  %v3415_v0 = vsub.f32 %v8342_v21, %v6987_v38  ;;  %v4659_v2 = vpop.eup %4658  ;;  %v7034_v42 = vadd.f32 %v6926_v49, %v8380_v3  ;;  %v7038_v26 = vmax.f32 %v6822_v13, %v8379_v4  ;;  %v8387_v3 = vld [vmem:[#allocation46_spill] sm:$0xff] }
 0x286   : > { %v7041_v32 = vadd.f32 %v2474_v58, %v6825_v19  ;;  %v3368_v18 = vmul.f32 1.442695, %v3351_v17  ;;  %v3590_v33 = vadd.f32 %v4655_v27, %v3526_v7  ;;  %v3273_v1 = vadd.f32 %v4659_v2, %v3209_v31  ;;  %v4661_v59 = vpop.eup %4660  ;;  %v8383_v19 = vld [vmem:[#allocation64_spill] sm:$0xff]  ;;  %v8384_v17 = vld [vmem:[#allocation69_spill] sm:$0xff]  ;;  %v8386_v7 = vld [vmem:[#allocation15_spill] sm:$0xff] }
 0x287   : > { %4678 = vpow2.f32 %v3240_v60  ;;  %vm2892_vm0 = vcmp.gt.f32.partialorder %v7028_v15, %v2721_v35  ;;  %v7048_v21 = vsel %vm2490_vm10, 5, %v6860_v11  ;;  %v2924_v29 = vmax.f32 %v2721_v35, %v7028_v15 }
 0x288   : > { %8381 = vst [vmem:[#allocation107_spill] sm:$0xff] %v7041_v32  ;;  %4680 = vpow2.f32 %v3304_v39  ;;  %v2908_v49 = vsel %vm2892_vm0, 7, %v2705_v34  ;;  %vm2288_vm3 = vcmp.gt.f32.partialorder %v8383_v19, %v8382_v25  ;;  %v3337_v50 = vadd.f32 %v4661_v59, %v3273_v1  ;;  %v4663_v6 = vpop.eup %4662  ;;  %v8385_v39 = vld [vmem:[#allocation14_spill] sm:$0xff] }
 0x289   : > { %4682 = vlog2.f32 %v3590_v33  ;;  %v3432_v46 = vmul.f32 1.442695, %v3415_v0  ;;  %v7055_v58 = vmax.f32 %v8382_v25, %v8383_v19  ;;  %v2472_v13 = vsel %vm2456_vm13, %v8384_v17, 0.0 }
 0x28a   : > { %v7059_v11 = vmax.f32 %v2924_v29, -1e+30  ;;  %vm3612_vm15 = vcmp.gt.f32.partialorder %v2924_v29, -1e+30  ;;  %v4665_v27 = vpop.eup %4664  ;;  %v3401_v35 = vadd.f32 %v4663_v6, %v3337_v50  ;;  %4684 = vpow2.f32 %v3368_v18 }
 0x28b   : > { %v3496_v12 = vmul.f32 1.442695, %v3479_v45  ;;  %v3628_v52 = vsel %vm3612_vm15, %v2908_v49, 0  ;;  %v4667_v60 = vpop.eup %4666  ;;  %vm2488_vm1 = vcmp.gt.f32.partialorder %v8384_v17, %v7020_v5  ;;  %4686 = vpow2.f32 %v3432_v46 }
 0x28c   : > { %v3036_v34 = vsub.f32 -1e+30, %v7059_v11  ;;  %v3100_v36 = vsub.f32 %v8385_v39, %v7059_v11  ;;  %v3164_v31 = vsub.f32 %v8386_v7, %v7059_v11  ;;  %3727 = vst [vmem:[%s6816_s11 + $0x30] sm:$0xff] %v3628_v52  ;;  %v4669_v0 = vpop.eup %4668  ;;  %v3465_v2 = vadd.f32 %v4665_v27, %v3401_v35  ;;  %v8388_v35 = vld [vmem:[#allocation52_spill] sm:$0xff] }
 0x28d   : > { %v3560_v45 = vmul.f32 1.442695, %v3543_v56  ;;  %v3228_v18 = vsub.f32 %v8387_v3, %v7059_v11  ;;  %v3758_v1 = vmul.f32 0.6931472, %v4669_v0  ;;  %v3484_v29 = vsub.f32 %v6985_v9, %v7059_v11 }
 0x28e   : > { %v4671_v33 = vpop.eup %4670  ;;  %v3058_v59 = vmul.f32 1.442695, %v3036_v34  ;;  %v3122_v49 = vmul.f32 1.442695, %v3100_v36  ;;  %v3529_v6 = vadd.f32 %v4667_v60, %v3465_v2  ;;  %4688 = vpow2.f32 %v3496_v12  ;;  %v7095_v2 = vpop.f32.mrf.mxu1 }
 0x28f   : > { %v4673_v50 = vpop.eup %4672  ;;  %v3079_v52 = vmul.f32 0.0, %v4671_v33  ;;  %vm2687_vm4 = vcmp.gt.f32.partialorder %v7063_v61, %v6758_v37  ;;  %vm2254_vm5 = vcmp.eq.s32.totalorder %v7081_v8, 4  ;;  %v7085_v56 = vadd.f32 %v3758_v1, %v6827_v24 }
 0x290   : > { %v4675_v46 = vpop.eup %4674  ;;  %4690 = vpow2.f32 %v3058_v59  ;;  %v3186_v27 = vmul.f32 1.442695, %v3164_v31  ;;  %v3292_v34 = vsub.f32 %v8388_v35, %v7059_v11  ;;  %v3593_v39 = vadd.f32 %v4673_v50, %v3529_v6 }
 0x291   : > { %v3143_v60 = vadd.f32 %v4675_v46, %v3079_v52  ;;  %4692 = vpow2.f32 %v3560_v45  ;;  %v2719_v12 = vmax.f32 %v6758_v37, %v7063_v61  ;;  %v3250_v0 = vmul.f32 1.442695, %v3228_v18 }
 0x292   : > { %v4677_v36 = vpop.eup %4676  ;;  %4694 = vpow2.f32 %v3122_v49  ;;  %v3356_v24 = vsub.f32 %v6347_v53, %v7059_v11  ;;  %v7101_v31 = vsel %vm2288_vm3, 4, %v6574_v10  ;;  %v2703_v3 = vsel %vm2687_vm4, 6, %v6755_v30 }
 0x293   : > { %4696 = vlog2.f32 %v3593_v39  ;;  %v3207_v45 = vadd.f32 %v4677_v36, %v3143_v60  ;;  %v7109_v18 = vmax.f32 %v7020_v5, %v8384_v17  ;;  %v3314_v53 = vmul.f32 1.442695, %v3292_v34  ;;  %v8391_v36 = vld [vmem:[#allocation16_spill] sm:$0xff] }
 0x294   : > { %v4679_v33 = vpop.eup %4678  ;;  %4698 = vpow2.f32 %v3186_v27  ;;  %v3420_v1 = vsub.f32 %v8343_v62, %v7059_v11  ;;  %v7117_v10 = vsel %vm2488_vm1, 5, %v6993_v43  ;;  %v7120_v37 = vadd.f32 %v2472_v13, %v7034_v42  ;;  %v8390_v62 = vld [vmem:[#allocation70_spill] sm:$0xff] }
 0x295   : > { %v4681_v25 = vpop.eup %4680  ;;  %v3271_v30 = vadd.f32 %v4679_v33, %v3207_v45  ;;  %vm2890_vm12 = vcmp.gt.f32.partialorder %v7095_v2, %v2719_v12  ;;  %4700 = vpow2.f32 %v3250_v0  ;;  %v3378_v49 = vmul.f32 1.442695, %v3356_v24  ;;  %v8392_v24 = vld [vmem:[#allocation17_spill] sm:$0xff] }
 0x296   : > { %8389 = vst [vmem:[#allocation6_spill] sm:$0xff] %v7120_v37  ;;  %v4683_v59 = vpop.eup %4682  ;;  %v2906_v50 = vsel %vm2890_vm12, 7, %v2703_v3  ;;  %v2922_v6 = vmax.f32 %v2719_v12, %v7095_v2  ;;  %vm2286_vm9 = vcmp.gt.f32.partialorder %v8390_v62, %v6577_v40  ;;  %v3548_v43 = vsub.f32 %v7028_v15, %v7059_v11 }
 0x297   : > { %v3754_v52 = vmul.f32 0.6931472, %v4683_v59  ;;  %v3335_v46 = vadd.f32 %v4681_v25, %v3271_v30  ;;  %v4685_v5 = vpop.eup %4684  ;;  %4702 = vpow2.f32 %v3314_v53  ;;  %v3442_v42 = vmul.f32 1.442695, %v3420_v1  ;;  %v7144_v1 = vpop.f32.mrf.mxu0  ;;  %v8393_v59 = vld [vmem:[#allocation51_spill] sm:$0xff] }
 0x298   : > { %v7128_v13 = vmax.f32 %v2922_v6, -1e+30  ;;  %vm3610_vm7 = vcmp.gt.f32.partialorder %v2922_v6, -1e+30  ;;  %v3506_v34 = vmul.f32 1.442695, %v3484_v29  ;;  %v4687_v60 = vpop.eup %4686  ;;  %4704 = vpow2.f32 %v3378_v49 }
 0x299   : > { %v7131_v27 = vadd.f32 %v3754_v52, %v6890_v44  ;;  %v3399_v35 = vadd.f32 %v4685_v5, %v3335_v46  ;;  %v3626_v39 = vsel %vm3610_vm7, %v2906_v50, 0  ;;  %v2270_v3 = vsel %vm2254_vm5, %v8390_v62, 0.0 }
 0x29a   : > { %v3034_v12 = vsub.f32 -1e+30, %v7128_v13  ;;  %v3098_v0 = vsub.f32 %v8391_v36, %v7128_v13  ;;  %v3162_v45 = vsub.f32 %v8392_v24, %v7128_v13  ;;  %3725 = vst [vmem:[%s6816_s11 + $0x20] sm:$0xff] %v3626_v39  ;;  %v3570_v33 = vmul.f32 1.442695, %v3548_v43 }
 0x29b   : > { %v3463_v29 = vadd.f32 %v4687_v60, %v3399_v35  ;;  %v4689_v53 = vpop.eup %4688  ;;  %4706 = vpow2.f32 %v3442_v42  ;;  %v3226_v49 = vsub.f32 %v8393_v59, %v7128_v13  ;;  %v2302_v6 = vsel %vm2286_vm9, 4, %v6583_v63  ;;  %v8394_v35 = vld [vmem:[#allocation56_spill] sm:$0xff] }
 0x29c   : > { %v3054_v25 = vmul.f32 1.442695, %v3034_v12  ;;  %v3118_v30 = vmul.f32 1.442695, %v3098_v0  ;;  %v2318_v52 = vmax.f32 %v6577_v40, %v8390_v62  ;;  %vm2457_vm14 = vcmp.eq.s32.totalorder %v7081_v8, 5 }
 0x29d   : > { %v4691_v50 = vpop.eup %4690  ;;  %v3527_v46 = vadd.f32 %v4689_v53, %v3463_v29  ;;  %4708 = vpow2.f32 %v3506_v34  ;;  %v3182_v42 = vmul.f32 1.442695, %v3162_v45  ;;  %v3290_v39 = vsub.f32 %v8394_v35, %v7128_v13  ;;  %v8395_v34 = vld [vmem:[#allocation58_spill] sm:$0xff] }
 0x29e   : > { %v4693_v43 = vpop.eup %4692  ;;  %v3084_v5 = vmul.f32 0.0, %v4691_v50  ;;  %4710 = vpow2.f32 %v3054_v25  ;;  %v2334_v12 = vadd.f32 %v2270_v3, %v6585_v51  ;;  %vm2690_vm2 = vcmp.gt.f32.partialorder %v7144_v1, %v6799_v54  ;;  %v8396_v45 = vld [vmem:[#allocation74_spill] sm:$0xff]  ;;  %v8398_v50 = vld [vmem:[#allocation79_spill] sm:$0xff] }
 0x29f   : > { %v4695_v60 = vpop.eup %4694  ;;  %v3591_v36 = vadd.f32 %v4693_v43, %v3527_v46  ;;  %4712 = vpow2.f32 %v3570_v33  ;;  %v3246_v0 = vmul.f32 1.442695, %v3226_v49  ;;  %v3354_v24 = vsub.f32 %v8395_v34, %v7128_v13  ;;  %v8397_v49 = vld [vmem:[#allocation35_spill] sm:$0xff]  ;;  %v8399_v43 = vld [vmem:[#allocation108_spill] sm:$0xff] }
 0x2a0   : > { %v4697_v40 = vpop.eup %4696  ;;  %v3148_v63 = vadd.f32 %v4695_v60, %v3084_v5  ;;  %4714 = vpow2.f32 %v3118_v30  ;;  %vm2491_vm8 = vcmp.gt.f32.partialorder %v8396_v45, %v7055_v58  ;;  %v3418_v51 = vsub.f32 %v8347_v16, %v7128_v13  ;;  %v7181_v5 = vpop.f32.mrf.mxu1 }
 0x2a1   : > { %v4699_v29 = vpop.eup %4698  ;;  %v3760_v53 = vmul.f32 0.6931472, %v4697_v40  ;;  %4716 = vlog2.f32 %v3591_v36  ;;  %v2722_v33 = vmax.f32 %v6799_v54, %v7144_v1  ;;  %v3310_v25 = vmul.f32 1.442695, %v3290_v39  ;;  %v8400_v36 = vld [vmem:[#allocation88_spill] sm:$0xff]  ;;  %v8404_v54 = vld [vmem:[#allocation19_spill] sm:$0xff] }
 0x2a2   : > { %v3212_v3 = vadd.f32 %v4699_v29, %v3148_v63  ;;  %4718 = vpow2.f32 %v3182_v42  ;;  %v4701_v30 = vpop.eup %4700  ;;  %v7170_v59 = vmax.f32 %v7055_v58, %v8396_v45  ;;  %vm2291_vm6 = vcmp.gt.f32.partialorder %v8398_v50, %v8397_v49  ;;  %v7195_v63 = vld [vmem:[%s5737_s8 + $0x30] sm:$0xff] }
 0x2a3   : > { %v7175_v46 = vadd.f32 %v3760_v53, %v6944_v14  ;;  %v2706_v16 = vsel %vm2690_vm2, 6, %v8399_v43  ;;  %4720 = vpow2.f32 %v3246_v0  ;;  %v3374_v35 = vmul.f32 1.442695, %v3354_v24 }
 0x2a4   : > { %v3276_v42 = vadd.f32 %v4701_v30, %v3212_v3  ;;  %v3482_v39 = vsub.f32 %v7063_v61, %v7128_v13  ;;  %v4703_v60 = vpop.eup %4702  ;;  %v7189_v14 = vsel %vm2491_vm8, 5, %v7101_v31  ;;  %vm2489_vm11 = vcmp.gt.f32.partialorder %v8400_v36, %v2318_v52  ;;  %v8401_v31 = vld [vmem:[#allocation93_spill] sm:$0xff] }
 0x2a5   : > { %v3438_v40 = vmul.f32 1.442695, %v3418_v51  ;;  %vm2657_vm13 = vcmp.eq.s32.totalorder %v7195_v63, 6  ;;  %4722 = vpow2.f32 %v3310_v25  ;;  %v3546_v34 = vsub.f32 %v7095_v2, %v7128_v13  ;;  %v4705_v58 = vpop.eup %4704 }
 0x2a6   : > { %v3340_v0 = vadd.f32 %v4703_v60, %v3276_v42  ;;  %vm2893_vm10 = vcmp.gt.f32.partialorder %v7181_v5, %v2722_v33  ;;  %v7205_v24 = vsel %vm2291_vm6, 4, %v8401_v31  ;;  %v7209_v29 = vmax.f32 %v8397_v49, %v8398_v50  ;;  %v8403_v31 = vld [vmem:[#allocation18_spill] sm:$0xff] }
 0x2a7   : > { %v2909_v53 = vsel %vm2893_vm10, 7, %v2706_v16  ;;  %v2925_v51 = vmax.f32 %v2722_v33, %v7181_v5  ;;  %v2473_v3 = vsel %vm2457_vm14, %v8400_v36, 0.0  ;;  %4724 = vpow2.f32 %v3374_v35 }
 0x2a8   : > { %v3404_v25 = vadd.f32 %v4705_v58, %v3340_v0  ;;  %v3502_v30 = vmul.f32 1.442695, %v3482_v39  ;;  %v4707_v43 = vpop.eup %4706  ;;  %v7217_v42 = vsel %vm2489_vm11, 5, %v2302_v6  ;;  %v7220_v60 = vmax.f32 %v2318_v52, %v8400_v36  ;;  %v7224_v0 = vpop.f32.mrf.mxu0  ;;  %v7229_v6 = vld [vmem:[%s5737_s8 + $0x10] sm:$0xff] }
 0x2a9   : > { %v7222_v49 = vmax.f32 %v2925_v51, -1e+30  ;;  %vm3613_vm0 = vcmp.gt.f32.partialorder %v2925_v51, -1e+30  ;;  %4726 = vpow2.f32 %v3438_v40  ;;  %v3566_v16 = vmul.f32 1.442695, %v3546_v34 }
 0x2aa   : > { %v4709_v33 = vpop.eup %4708  ;;  %v3468_v8 = vadd.f32 %v4707_v43, %v3404_v25  ;;  %v3629_v35 = vsel %vm3613_vm0, %v2909_v53, 0  ;;  %v7226_v58 = vadd.f32 %v2473_v3, %v2334_v12  ;;  %vm3739_vm3 = vcmp.ge.s32.totalorder %v7229_v6, 0  ;;  %v7239_v34 = vld [vmem:[%s5737_s8] sm:$0xff] }
 0x2ab   : > { %v4711_v39 = vpop.eup %4710  ;;  %v3037_v52 = vsub.f32 -1e+30, %v7222_v49  ;;  %v3101_v51 = vsub.f32 %v8403_v31, %v7222_v49  ;;  %v3165_v25 = vsub.f32 %v8404_v54, %v7222_v49  ;;  %3728 = vst [vmem:[%s6816_s11 + $0x38] sm:$0xff] %v3629_v35  ;;  %vm3737_vm15 = vcmp.ge.s32.totalorder %v7239_v34, 0  ;;  %v8405_v43 = vld [vmem:[#allocation102_spill] sm:$0xff]  ;;  %v8406_v31 = vld [vmem:[#allocation55_spill] sm:$0xff] }
 0x2ac   : > { %8402 = vst [vmem:[#allocation7_spill] sm:$0xff] %v7226_v58  ;;  %v4713_v40 = vpop.eup %4712  ;;  %v3532_v12 = vadd.f32 %v4709_v33, %v3468_v8  ;;  %v3082_v53 = vmul.f32 0.0, %v4711_v39  ;;  %4728 = vpow2.f32 %v3502_v30  ;;  %vm2688_vm1 = vcmp.gt.f32.partialorder %v7224_v0, %v8405_v43  ;;  %v8407_v33 = vld [vmem:[#allocation87_spill] sm:$0xff]  ;;  %v8408_v8 = vld [vmem:[#allocation97_spill] sm:$0xff] }
 0x2ad   : > { %v4715_v3 = vpop.eup %4714  ;;  %v3060_v7 = vmul.f32 1.442695, %v3037_v52  ;;  %v3124_v44 = vmul.f32 1.442695, %v3101_v51  ;;  %v3229_v50 = vsub.f32 %v8406_v31, %v7222_v49  ;;  %4730 = vpow2.f32 %v3566_v16  ;;  %v8409_v52 = vld [vmem:[#allocation61_spill] sm:$0xff] }
 0x2ae   : > { %v4717_v58 = vpop.eup %4716  ;;  %v3596_v54 = vadd.f32 %v4713_v40, %v3532_v12  ;;  %v3146_v35 = vadd.f32 %v4715_v3, %v3082_v53  ;;  %v2720_v37 = vmax.f32 %v8405_v43, %v7224_v0  ;;  %vm2289_vm4 = vcmp.gt.f32.partialorder %v8408_v8, %v8407_v33  ;;  %v8410_v40 = vld [vmem:[#allocation101_spill] sm:$0xff]  ;;  %v7255_v12 = vpop.f32.mrf.mxu1 }
 0x2af   : > { %v4719_v32 = vpop.eup %4718  ;;  %v3756_v30 = vmul.f32 0.6931472, %v4717_v58  ;;  %4732 = vpow2.f32 %v3060_v7  ;;  %v3188_v39 = vmul.f32 1.442695, %v3165_v25  ;;  %v3293_v51 = vsub.f32 %v8409_v52, %v7222_v49 }
 0x2b0   : > { %vm3740_vm5 = vcmp.ge.s32.totalorder %v6884_v28, 0  ;;  %4734 = vlog2.f32 %v3596_v54  ;;  %v3210_v31 = vadd.f32 %v4719_v32, %v3146_v35  ;;  %v3357_v16 = vsub.f32 %v8410_v40, %v7222_v49  ;;  %v4721_v53 = vpop.eup %4720  ;;  %v8411_v54 = vld [vmem:[#allocation105_spill] sm:$0xff] }
 0x2b1   : > { %v2673_v3 = vsel %vm2657_vm13, %v6985_v9, 0.0  ;;  %v3786_v7 = vadd.f32 %v3756_v30, %v6987_v38  ;;  %vm2860_vm12 = vcmp.eq.s32.totalorder %v7195_v63, 7  ;;  %4736 = vpow2.f32 %v3124_v44 }
 0x2b2   : > { %v3252_v58 = vmul.f32 1.442695, %v3229_v50  ;;  %vm3738_vm9 = vcmp.ge.s32.totalorder %v6872_v22, 0  ;;  %v3274_v25 = vadd.f32 %v4721_v53, %v3210_v31  ;;  %v2704_v32 = vsel %vm2688_vm1, 6, %v6877_v55  ;;  %v4723_v52 = vpop.eup %4722  ;;  %v8436_v22 = vld [vmem:[#allocation24_spill] sm:$0xff] }
 0x2b3   : > { %v3421_v35 = vsub.f32 %v8411_v54, %v7222_v49  ;;  %v3802_v9 = vsub.f32 %v3786_v7, %v6983_v23  ;;  %4738 = vpow2.f32 %v3188_v39  ;;  %v3316_v38 = vmul.f32 1.442695, %v3293_v51 }
 0x2b4   : > { %vm2891_vm7 = vcmp.gt.f32.partialorder %v7255_v12, %v2720_v37  ;;  %v8412_v44 = vsub.f32 %v7131_v27, %v6888_v20  ;;  %v3338_v30 = vadd.f32 %v4723_v52, %v3274_v25  ;;  %v3380_v31 = vmul.f32 1.442695, %v3357_v16  ;;  %v4725_v43 = vpop.eup %4724 }
 0x2b5   : > { %v3485_v55 = vsub.f32 %v7144_v1, %v7222_v49  ;;  %v3818_v40 = vsel %vm3738_vm9, %v3802_v9, 0.0  ;;  %4740 = vpow2.f32 %v3252_v58  ;;  %v2907_v23 = vsel %vm2891_vm7, 7, %v2704_v32 }
 0x2b6   : > { %v3817_v50 = vsel %vm3737_vm15, %v8412_v44, 0.0  ;;  %v2923_v39 = vmax.f32 %v2720_v37, %v7255_v12  ;;  %v8413_v51 = vsub.f32 %v7085_v56, %v6803_v41  ;;  %v8414_v27 = vsub.f32 %v7175_v46, %v6941_v48  ;;  %v4727_v25 = vpop.eup %4726  ;;  %v8415_v46 = vld [vmem:[#allocation20_spill] sm:$0xff]  ;;  %v8416_v44 = vld [vmem:[#allocation21_spill] sm:$0xff] }
 0x2b7   : > { %v3833_v53 = vadd.f32 %v3818_v40, %v3817_v50  ;;  %v3402_v7 = vadd.f32 %v4725_v43, %v3338_v30  ;;  %4742 = vpow2.f32 %v3316_v38  ;;  %v3444_v58 = vmul.f32 1.442695, %v3421_v35  ;;  %v8417_v35 = vld [vmem:[#allocation92_spill] sm:$0xff]  ;;  %v7310_v40 = vld [vmem:[%s5737_s8 + $0x20] sm:$0xff] }
 0x2b8   : > { %v3819_v20 = vsel %vm3739_vm3, %v8413_v51, 0.0  ;;  %v3820_v16 = vsel %vm3740_vm5, %v8414_v27, 0.0  ;;  %v7291_v32 = vmax.f32 %v2923_v39, -1e+30  ;;  %vm3611_vm14 = vcmp.gt.f32.partialorder %v2923_v39, -1e+30 }
 0x2b9   : > { %v3834_v41 = vadd.f32 %v3833_v53, %v3819_v20  ;;  %v3466_v56 = vadd.f32 %v4727_v25, %v3402_v7  ;;  %v3508_v37 = vmul.f32 1.442695, %v3485_v55  ;;  %v3627_v54 = vsel %vm3611_vm14, %v2907_v23, 0  ;;  %v4729_v52 = vpop.eup %4728  ;;  %8418 = vst [vmem:[#allocation39_spill] sm:$0xff] %v7310_v40  ;;  %v7313_v23 = vpop.f32.mrf.mxu0  ;;  %v8419_v20 = vld [vmem:[#allocation60_spill] sm:$0xff]  ;;  %v8420_v7 = vld [vmem:[#allocation57_spill] sm:$0xff] }
 0x2ba   : > { %4744 = vpow2.f32 %v3380_v31  ;;  %v3035_v48 = vsub.f32 -1e+30, %v7291_v32  ;;  %v3099_v9 = vsub.f32 %v8415_v46, %v7291_v32  ;;  %v3163_v50 = vsub.f32 %v8416_v44, %v7291_v32  ;;  %3726 = vst [vmem:[%s6816_s11 + $0x28] sm:$0xff] %v3627_v54  ;;  %v4731_v43 = vpop.eup %4730 }
 0x2bb   : > { %v7303_v38 = vsel %vm2289_vm4, 4, %v8417_v35  ;;  %v3530_v30 = vadd.f32 %v4729_v52, %v3466_v56  ;;  %v7305_v55 = vadd.f32 %v3834_v41, %v3820_v16  ;;  %v3549_v31 = vsub.f32 %v7181_v5, %v7222_v49  ;;  %v8421_v52 = vld [vmem:[#allocation63_spill] sm:$0xff] }
 0x2bc   : > { %vm2655_vm2 = vcmp.eq.s32.totalorder %v7310_v40, 6  ;;  %4746 = vpow2.f32 %v3444_v58  ;;  %v3056_v39 = vmul.f32 1.442695, %v3035_v48  ;;  %v3120_v51 = vmul.f32 1.442695, %v3099_v9  ;;  %v4733_v53 = vpop.eup %4732 }
 0x2bd   : > { %v3227_v27 = vsub.f32 %v8419_v20, %v7291_v32  ;;  %v2737_v16 = vadd.f32 %v2673_v3, %v8420_v7  ;;  %v2876_v25 = vsel %vm2860_vm12, %v7028_v15, 0.0  ;;  %v3594_v41 = vadd.f32 %v4731_v43, %v3530_v30  ;;  %v4735_v56 = vpop.eup %4734  ;;  %v8422_v15 = vld [vmem:[#allocation104_spill] sm:$0xff] }
 0x2be   : > { %4748 = vpow2.f32 %v3508_v37  ;;  %v3085_v54 = vmul.f32 0.0, %v4733_v53  ;;  %v3184_v58 = vmul.f32 1.442695, %v3163_v50  ;;  %v3291_v48 = vsub.f32 %v8421_v52, %v7291_v32  ;;  %v4737_v46 = vpop.eup %4736  ;;  %v7338_v53 = vpop.f32.mrf.mxu1 }
 0x2bf   : > { %4750 = vpow2.f32 %v3056_v39  ;;  %v3766_v9 = vmul.f32 0.6931472, %v4735_v56  ;;  %v3572_v44 = vmul.f32 1.442695, %v3549_v31  ;;  %vm2693_vm8 = vcmp.gt.f32.partialorder %v7313_v23, %v7038_v26 }
 0x2c0   : > { %4752 = vlog2.f32 %v3594_v41  ;;  %v3149_v3 = vadd.f32 %v4737_v46, %v3085_v54  ;;  %v3248_v35 = vmul.f32 1.442695, %v3227_v27  ;;  %v3355_v37 = vsub.f32 %v8422_v15, %v7291_v32  ;;  %v4739_v30 = vpop.eup %4738 }
 0x2c1   : > { %4754 = vpow2.f32 %v3120_v51  ;;  %v7327_v43 = vadd.f32 %v2876_v25, %v2737_v16  ;;  %v7330_v50 = vadd.f32 %v3766_v9, %v7059_v11  ;;  %v2725_v39 = vmax.f32 %v7038_v26, %v7313_v23  ;;  %v8423_v25 = vld [vmem:[#allocation99_spill] sm:$0xff] }
 0x2c2   : > { %v3419_v31 = vsub.f32 %v8358_v57, %v7291_v32  ;;  %v2321_v20 = vmax.f32 %v8407_v33, %v8408_v8  ;;  %v3213_v51 = vadd.f32 %v4739_v30, %v3149_v3  ;;  %4756 = vpow2.f32 %v3184_v58  ;;  %v4741_v7 = vpop.eup %4740  ;;  %v8424_v33 = vld [vmem:[#allocation113_spill] sm:$0xff]  ;;  %v8426_v3 = vld [vmem:[#allocation48_spill] sm:$0xff] }
 0x2c3   : > { %v3312_v27 = vmul.f32 1.442695, %v3291_v48  ;;  %4758 = vpow2.f32 %v3572_v44  ;;  %v2709_v11 = vsel %vm2693_vm8, 6, %v7048_v21  ;;  %v3483_v57 = vsub.f32 %v7224_v0, %v7291_v32  ;;  %v8425_v44 = vld [vmem:[#allocation83_spill] sm:$0xff] }
 0x2c4   : > { %vm2292_vm6 = vcmp.gt.f32.partialorder %v8424_v33, %v8423_v25  ;;  %v3277_v41 = vadd.f32 %v4741_v7, %v3213_v51  ;;  %4760 = vpow2.f32 %v3248_v35  ;;  %v3376_v56 = vmul.f32 1.442695, %v3355_v37  ;;  %v4743_v54 = vpop.eup %4742 }
 0x2c5   : > { %v2324_v58 = vmax.f32 %v8423_v25, %v8424_v33  ;;  %v3440_v52 = vmul.f32 1.442695, %v3419_v31  ;;  %v3547_v48 = vsub.f32 %v7255_v12, %v7291_v32  ;;  %vm2896_vm11 = vcmp.gt.f32.partialorder %v7338_v53, %v2725_v39 }
 0x2c6   : > { %v3341_v26 = vadd.f32 %v4743_v54, %v3277_v41  ;;  %4762 = vpow2.f32 %v3312_v27  ;;  %v2912_v21 = vsel %vm2896_vm11, 7, %v2709_v11  ;;  %v2928_v46 = vmax.f32 %v2725_v39, %v7338_v53  ;;  %v8427_v27 = vld [vmem:[#allocation49_spill] sm:$0xff]  ;;  %v8428_v39 = vld [vmem:[#allocation54_spill] sm:$0xff] }
 0x2c7   : > { %v4745_v9 = vpop.eup %4744  ;;  %vm2494_vm13 = vcmp.gt.f32.partialorder %v8425_v44, %v7209_v29  ;;  %v2308_v35 = vsel %vm2292_vm6, 4, %v8426_v3  ;;  %v2671_v15 = vsel %vm2655_vm2, %v7063_v61, 0.0  ;;  %v3504_v37 = vmul.f32 1.442695, %v3483_v57  ;;  %v7367_v61 = vpop.f32.mrf.mxu0 }
 0x2c8   : > { %v3405_v30 = vadd.f32 %v4745_v9, %v3341_v26  ;;  %4764 = vpow2.f32 %v3376_v56  ;;  %v7362_v31 = vmax.f32 %v2928_v46, -1e+30  ;;  %vm3616_vm10 = vcmp.gt.f32.partialorder %v2928_v46, -1e+30 }
 0x2c9   : > { %v4747_v51 = vpop.eup %4746  ;;  %vm2492_vm0 = vcmp.gt.f32.partialorder %v8427_v27, %v2321_v20  ;;  %vm2495_vm1 = vcmp.gt.f32.partialorder %v8428_v39, %v2324_v58  ;;  %vm2858_vm4 = vcmp.eq.s32.totalorder %v7310_v40, 7  ;;  %v3632_v7 = vsel %vm3616_vm10, %v2912_v21, 0 }
 0x2ca   : > { %v3469_v25 = vadd.f32 %v4747_v51, %v3405_v30  ;;  %4766 = vpow2.f32 %v3440_v52  ;;  %v3568_v41 = vmul.f32 1.442695, %v3547_v48  ;;  %v3040_v57 = vsub.f32 -1e+30, %v7362_v31  ;;  %3731 = vst [vmem:[%s6816_s11 + $0x50] sm:$0xff] %v3632_v7  ;;  %v8429_v52 = vld [vmem:[#allocation59_spill] sm:$0xff] }
 0x2cb   : > { %v4749_v11 = vpop.eup %4748  ;;  %v7375_v54 = vsel %vm2494_vm13, 5, %v7205_v24  ;;  %v7379_v26 = vmax.f32 %v7209_v29, %v8425_v44  ;;  %v7382_v21 = vmax.f32 %v2321_v20, %v8427_v27  ;;  %v2735_v48 = vadd.f32 %v2671_v15, %v8429_v52  ;;  %v8430_v29 = vld [vmem:[#allocation100_spill] sm:$0xff] }
 0x2cc   : > { %v4751_v56 = vpop.eup %4750  ;;  %v7388_v9 = vsel %vm2492_vm0, 5, %v7303_v38  ;;  %v2874_v24 = vsel %vm2858_vm4, %v7095_v2, 0.0  ;;  %4768 = vpow2.f32 %v3504_v37  ;;  %v8431_v51 = vld [vmem:[#allocation112_spill] sm:$0xff]  ;;  %v7399_v15 = vsel %vm2495_vm1, 5, %v2308_v35 }
 0x2cd   : > { %v4753_v46 = vpop.eup %4752  ;;  %v3083_v3 = vmul.f32 0.0, %v4751_v56  ;;  %v7395_v7 = vmax.f32 %v8431_v51, %v8430_v29  ;;  %vm2691_vm12 = vcmp.gt.f32.partialorder %v7367_v61, %v7109_v18  ;;  %v3533_v38 = vadd.f32 %v4749_v11, %v3469_v25  ;;  %v8432_v11 = vld [vmem:[#allocation22_spill] sm:$0xff] }
 0x2ce   : > { %v4755_v30 = vpop.eup %4754  ;;  %v3762_v52 = vmul.f32 0.6931472, %v4753_v46  ;;  %4770 = vpow2.f32 %v3568_v41  ;;  %v3066_v2 = vmul.f32 1.442695, %v3040_v57  ;;  %v7404_v37 = vmax.f32 %v2324_v58, %v8428_v39  ;;  %v7412_v41 = vpop.f32.mrf.mxu1 }
 0x2cf   : > { %v3147_v20 = vadd.f32 %v4755_v30, %v3083_v3  ;;  %v4757_v56 = vpop.eup %4756  ;;  %v2938_v16 = vadd.f32 %v2874_v24, %v2735_v48  ;;  %v2723_v35 = vmax.f32 %v7109_v18, %v7367_v61  ;;  %vm3741_vm7 = vcmp.ge.s32.totalorder %v7310_v40, 0  ;;  %v7428_v30 = vld [vmem:[%s5737_s8 + $0x28] sm:$0xff] }
 0x2d0   : > { %v3789_v44 = vadd.f32 %v3762_v52, %v7128_v13  ;;  %v4759_v46 = vpop.eup %4758  ;;  %v3104_v25 = vsub.f32 %v8432_v11, %v7362_v31  ;;  %v8126_v3 = vmov 0.0   ;;  %v7420_v13 = vld [vmem:[%s5737_s8 + $0x38] sm:$0xff]  ;;  %v2707_v24 = vsel %vm2691_vm12, 6, %v7117_v10  ;;  %v8434_v11 = vld [vmem:[#allocation23_spill] sm:$0xff] }
 0x2d1   : > { %v3211_v33 = vadd.f32 %v4757_v56, %v3147_v20  ;;  %v4761_v57 = vpop.eup %4760  ;;  %v7417_v58 = vsel %vm3739_vm3, 1.0, %v8126_v3  ;;  %vm2658_vm14 = vcmp.eq.s32.totalorder %v7420_v13, 6  ;;  %vm2656_vm2 = vcmp.eq.s32.totalorder %v7428_v30, 6 }
 0x2d2   : > { %8433 = vst [vmem:[#allocation41_spill] sm:$0xff] %v7417_v58  ;;  %v3805_v48 = vsub.f32 %v3789_v44, %v2938_v16  ;;  %v3597_v52 = vadd.f32 %v4759_v46, %v3533_v38  ;;  %4772 = vpow2.f32 %v3066_v2  ;;  %v3168_v3 = vsub.f32 %v8434_v11, %v7362_v31  ;;  %v8440_v58 = vld [vmem:[#allocation67_spill] sm:$0xff] }
 0x2d3   : > { %v3275_v20 = vadd.f32 %v4761_v57, %v3211_v33  ;;  %v4763_v6 = vpop.eup %4762  ;;  %vm2894_vm3 = vcmp.gt.f32.partialorder %v7412_v41, %v2723_v35  ;;  %v2926_v16 = vmax.f32 %v2723_v35, %v7412_v41  ;;  %v3130_v44 = vmul.f32 1.442695, %v3104_v25 }
 0x2d4   : > { %v3821_v56 = vsel %vm3741_vm7, %v3805_v48, 0.0  ;;  %v2910_v38 = vsel %vm2894_vm3, 7, %v2707_v24  ;;  %v8435_v2 = vmov 0.0   ;;  %4774 = vlog2.f32 %v3597_v52  ;;  %v8438_v52 = vld [vmem:[#allocation62_spill] sm:$0xff] }
 0x2d5   : > { %v7438_v18 = vadd.f32 %v7305_v55, %v3821_v56  ;;  %v3339_v10 = vadd.f32 %v4763_v6, %v3275_v20  ;;  %v4765_v33 = vpop.eup %4764  ;;  %v7443_v46 = vsel %vm3737_vm15, 1.0, %v8435_v2  ;;  %v7448_v57 = vsel %vm3738_vm9, 1.0, %v8435_v2  ;;  %v8437_v56 = vld [vmem:[#allocation25_spill] sm:$0xff] }
 0x2d6   : > { %v7450_v48 = vmax.f32 %v2926_v16, -1e+30  ;;  %vm3614_vm8 = vcmp.gt.f32.partialorder %v2926_v16, -1e+30  ;;  %v2674_v55 = vsel %vm2658_vm14, %v7144_v1, 0.0  ;;  %v2672_v34 = vsel %vm2656_vm2, %v7224_v0, 0.0 }
 0x2d7   : > { %v3403_v35 = vadd.f32 %v4765_v33, %v3339_v10  ;;  %v3630_v25 = vsel %vm3614_vm8, %v2910_v38, 0  ;;  %v4767_v24 = vpop.eup %4766  ;;  %4776 = vpow2.f32 %v3130_v44  ;;  %v3194_v1 = vmul.f32 1.442695, %v3168_v3  ;;  %v8439_v33 = vld [vmem:[#allocation109_spill] sm:$0xff]  ;;  %v8442_v3 = vld [vmem:[#allocation68_spill] sm:$0xff] }
 0x2d8   : > { %v3038_v20 = vsub.f32 -1e+30, %v7450_v48  ;;  %v3102_v6 = vsub.f32 %v8436_v22, %v7450_v48  ;;  %v3166_v11 = vsub.f32 %v8437_v56, %v7450_v48  ;;  %3729 = vst [vmem:[%s6816_s11 + $0x40] sm:$0xff] %v3630_v25  ;;  %v3232_v10 = vsub.f32 %v8438_v52, %v7362_v31  ;;  %v8441_v22 = vld [vmem:[#allocation65_spill] sm:$0xff] }
 0x2d9   : > { %v3467_v16 = vadd.f32 %v4767_v24, %v3403_v35  ;;  %v4769_v38 = vpop.eup %4768  ;;  %v2738_v40 = vadd.f32 %v2674_v55, %v8439_v33  ;;  %v3230_v28 = vsub.f32 %v8440_v58, %v7450_v48  ;;  %vm3743_vm15 = vcmp.ge.s32.totalorder %v7195_v63, 0  ;;  %v7475_v24 = vpop.f32.mrf.mxu0 }
 0x2da   : > { %v3062_v39 = vmul.f32 1.442695, %v3038_v20  ;;  %v3126_v0 = vmul.f32 1.442695, %v3102_v6  ;;  %v2736_v2 = vadd.f32 %v2672_v34, %v8441_v22  ;;  %vm2861_vm9 = vcmp.eq.s32.totalorder %v7420_v13, 7  ;;  %v8443_v20 = vld [vmem:[#allocation73_spill] sm:$0xff] }
 0x2db   : > { %v3531_v35 = vadd.f32 %v4769_v38, %v3467_v16  ;;  %v3296_v44 = vsub.f32 %v8442_v3, %v7362_v31  ;;  %v4771_v25 = vpop.eup %4770  ;;  %vm2859_vm6 = vcmp.eq.s32.totalorder %v7428_v30, 7  ;;  %v3190_v55 = vmul.f32 1.442695, %v3166_v11  ;;  %v8444_v34 = vld [vmem:[#allocation106_spill] sm:$0xff] }
 0x2dc   : > { %4778 = vpow2.f32 %v3062_v39  ;;  %v3294_v58 = vsub.f32 %v8443_v20, %v7450_v48  ;;  %v3258_v56 = vmul.f32 1.442695, %v3232_v10  ;;  %v3360_v52 = vsub.f32 %v8444_v34, %v7362_v31 }
 0x2dd   : > { %v3595_v6 = vadd.f32 %v4771_v25, %v3531_v35  ;;  %4780 = vpow2.f32 %v3194_v1  ;;  %v2877_v16 = vsel %vm2861_vm9, %v7181_v5, 0.0  ;;  %v3254_v38 = vmul.f32 1.442695, %v3230_v28 }
 0x2de   : > { %4782 = vpow2.f32 %v3126_v0  ;;  %v3358_v33 = vsub.f32 %v6466_v47, %v7450_v48  ;;  %v2875_v22 = vsel %vm2859_vm6, %v7255_v12, 0.0  ;;  %v3322_v39 = vmul.f32 1.442695, %v3296_v44  ;;  %v7495_v0 = vpop.f32.mrf.mxu1 }
 0x2df   : > { %4784 = vlog2.f32 %v3595_v6  ;;  %vm2694_vm11 = vcmp.gt.f32.partialorder %v7475_v24, %v7170_v59  ;;  %v4773_v11 = vpop.eup %4772  ;;  %v2726_v1 = vmax.f32 %v7170_v59, %v7475_v24  ;;  %v3318_v10 = vmul.f32 1.442695, %v3294_v58 }
 0x2e0   : > { %4786 = vpow2.f32 %v3190_v55  ;;  %v3422_v5 = vsub.f32 %v8384_v17, %v7450_v48  ;;  %v7491_v28 = vadd.f32 %v2877_v16, %v2738_v40  ;;  %v3386_v47 = vmul.f32 1.442695, %v3360_v52 }
 0x2e1   : > { %4788 = vpow2.f32 %v3258_v56  ;;  %v3486_v12 = vsub.f32 %v7367_v61, %v7450_v48  ;;  %v7497_v35 = vadd.f32 %v2875_v22, %v2736_v2  ;;  %v2710_v3 = vsel %vm2694_vm11, 6, %v7189_v14  ;;  %v4775_v25 = vpop.eup %4774  ;;  %v7518_v22 = vpop.f32.mrf.mxu0 }
 0x2e2   : > { %4790 = vpow2.f32 %v3254_v38  ;;  %v3382_v59 = vmul.f32 1.442695, %v3358_v33  ;;  %v3088_v44 = vmul.f32 0.0, %v4773_v11  ;;  %v3424_v17 = vsub.f32 %v8379_v4, %v7362_v31  ;;  %v8448_v11 = vld [vmem:[#allocation27_spill] sm:$0xff] }
 0x2e3   : > { %4792 = vpow2.f32 %v3322_v39  ;;  %v3550_v40 = vsub.f32 %v7412_v41, %v7450_v48  ;;  %v3446_v55 = vmul.f32 1.442695, %v3422_v5  ;;  %vm2897_vm13 = vcmp.gt.f32.partialorder %v7495_v0, %v2726_v1 }
 0x2e4   : > { %4794 = vpow2.f32 %v3318_v10  ;;  %v2929_v2 = vmax.f32 %v2726_v1, %v7495_v0  ;;  %v3488_v14 = vsub.f32 %v7313_v23, %v7362_v31  ;;  %v3510_v20 = vmul.f32 1.442695, %v3486_v12  ;;  %v4777_v6 = vpop.eup %4776 }
 0x2e5   : > { %4796 = vpow2.f32 %v3386_v47  ;;  %v2913_v58 = vsel %vm2897_vm13, 7, %v2710_v3  ;;  %v8445_v4 = vsub.f32 %v7330_v50, %v7327_v43  ;;  %v3768_v52 = vmul.f32 0.6931472, %v4775_v25  ;;  %v8447_v43 = vld [vmem:[#allocation26_spill] sm:$0xff]  ;;  %v8449_v25 = vld [vmem:[#allocation72_spill] sm:$0xff] }
 0x2e6   : > { %4798 = vpow2.f32 %v3382_v59  ;;  %v7515_v34 = vmax.f32 %v2929_v2, -1e+30  ;;  %vm3617_vm10 = vcmp.gt.f32.partialorder %v2929_v2, -1e+30  ;;  %v3152_v16 = vadd.f32 %v4777_v6, %v3088_v44 }
 0x2e7   : > { %v7513_v56 = vsel %vm3743_vm15, %v8445_v4, 0.0  ;;  %v3574_v38 = vmul.f32 1.442695, %v3550_v40  ;;  %v3633_v33 = vsel %vm3617_vm10, %v2913_v58, 0  ;;  %vm3742_vm0 = vcmp.ge.s32.totalorder %v7428_v30, 0  ;;  %v8450_v4 = vld [vmem:[#allocation78_spill] sm:$0xff] }
 0x2e8   : > { %8446 = vst [vmem:[#allocation8_spill] sm:$0xff] %v7515_v34  ;;  %4800 = vpow2.f32 %v3446_v55  ;;  %v3041_v39 = vsub.f32 -1e+30, %v7515_v34  ;;  %v3105_v50 = vsub.f32 %v8447_v43, %v7515_v34  ;;  %v3169_v1 = vsub.f32 %v8448_v11, %v7515_v34  ;;  %3732 = vst [vmem:[%s6816_s11 + $0x58] sm:$0xff] %v3633_v33  ;;  %v7537_v43 = vld [vmem:[%s5737_s8 + $0x50] sm:$0xff] }
 0x2e9   : > { %v4779_v10 = vpop.eup %4778  ;;  %v3450_v5 = vmul.f32 1.442695, %v3424_v17  ;;  %v3514_v47 = vmul.f32 1.442695, %v3488_v14  ;;  %v3552_v12 = vsub.f32 %v7338_v53, %v7362_v31  ;;  %4802 = vpow2.f32 %v3510_v20 }
 0x2ea   : > { %v4781_v3 = vpop.eup %4780  ;;  %vm3744_vm1 = vcmp.ge.s32.totalorder %v7420_v13, 0  ;;  %v3086_v59 = vmul.f32 0.0, %v4779_v10  ;;  %v3068_v44 = vmul.f32 1.442695, %v3041_v39  ;;  %v3132_v40 = vmul.f32 1.442695, %v3105_v50  ;;  %v7544_v10 = vpop.f32.mrf.mxu1 }
 0x2eb   : > { %v3233_v55 = vsub.f32 %v8449_v25, %v7515_v34  ;;  %v4783_v2 = vpop.eup %4782  ;;  %v3792_v58 = vadd.f32 %v3768_v52, %v7222_v49  ;;  %v3216_v6 = vadd.f32 %v4781_v3, %v3152_v16  ;;  %4804 = vpow2.f32 %v3574_v38 }
 0x2ec   : > { %vm2692_vm4 = vcmp.gt.f32.partialorder %v7518_v22, %v7220_v60  ;;  %v4785_v17 = vpop.eup %4784  ;;  %v3150_v14 = vadd.f32 %v4783_v2, %v3086_v59  ;;  %4806 = vpow2.f32 %v3068_v44  ;;  %v3196_v20 = vmul.f32 1.442695, %v3169_v1 }
 0x2ed   : > { %v3297_v33 = vsub.f32 %v8450_v4, %v7515_v34  ;;  %v4787_v39 = vpop.eup %4786  ;;  %vm2661_vm12 = vcmp.eq.s32.totalorder %v7537_v43, 6  ;;  %v3764_v50 = vmul.f32 0.6931472, %v4785_v17  ;;  %4808 = vpow2.f32 %v3450_v5 }
 0x2ee   : > { %v3578_v49 = vmul.f32 1.442695, %v3552_v12  ;;  %v2724_v52 = vmax.f32 %v7220_v60, %v7518_v22  ;;  %v4789_v16 = vpop.eup %4788  ;;  %v3214_v38 = vadd.f32 %v4787_v39, %v3150_v14  ;;  %4810 = vpow2.f32 %v3132_v40 }
 0x2ef   : > { %v3260_v11 = vmul.f32 1.442695, %v3233_v55  ;;  %v3361_v1 = vsub.f32 %v8383_v19, %v7515_v34  ;;  %v4791_v3 = vpop.eup %4790  ;;  %v3808_v59 = vsub.f32 %v3792_v58, %v7491_v28  ;;  %v3790_v44 = vadd.f32 %v3764_v50, %v7291_v32 }
 0x2f0   : > { %4812 = vpow2.f32 %v3514_v47  ;;  %v2708_v5 = vsel %vm2692_vm4, 6, %v7217_v42  ;;  %v4793_v12 = vpop.eup %4792  ;;  %v3280_v25 = vadd.f32 %v4789_v16, %v3216_v6  ;;  %v3278_v40 = vadd.f32 %v4791_v3, %v3214_v38  ;;  %v8451_v16 = vld [vmem:[#allocation28_spill] sm:$0xff] }
 0x2f1   : > { %4814 = vpow2.f32 %v3196_v20  ;;  %v3324_v55 = vmul.f32 1.442695, %v3297_v33  ;;  %v4795_v2 = vpop.eup %4794  ;;  %v3806_v17 = vsub.f32 %v3790_v44, %v7497_v35  ;;  %v3425_v14 = vsub.f32 %v8396_v45, %v7515_v34 }
 0x2f2   : > { %vm2895_vm14 = vcmp.gt.f32.partialorder %v7544_v10, %v2724_v52  ;;  %v2927_v32 = vmax.f32 %v2724_v52, %v7544_v10  ;;  %v4797_v28 = vpop.eup %4796  ;;  %v3342_v47 = vadd.f32 %v4795_v2, %v3278_v40  ;;  %4816 = vpow2.f32 %v3260_v11  ;;  %v8452_v11 = vld [vmem:[#allocation29_spill] sm:$0xff]  ;;  %v7571_v40 = vpop.f32.mrf.mxu0 }
 0x2f3   : > { %v3388_v60 = vmul.f32 1.442695, %v3361_v1  ;;  %v2911_v42 = vsel %vm2895_vm14, 7, %v2708_v5  ;;  %v4799_v58 = vpop.eup %4798  ;;  %v3822_v6 = vsel %vm3742_vm0, %v3806_v17, 0.0  ;;  %4818 = vpow2.f32 %v3578_v49  ;;  %v8453_v17 = vld [vmem:[#allocation77_spill] sm:$0xff] }
 0x2f4   : > { %v7559_v20 = vmax.f32 %v2927_v32, -1e+30  ;;  %vm3615_vm2 = vcmp.gt.f32.partialorder %v2927_v32, -1e+30  ;;  %v3837_v35 = vadd.f32 %v7438_v18, %v3822_v6  ;;  %v3406_v4 = vadd.f32 %v4799_v58, %v3342_v47 }
 0x2f5   : > { %4820 = vpow2.f32 %v3324_v55  ;;  %v3631_v33 = vsel %vm3615_vm2, %v2911_v42, 0  ;;  %v4801_v39 = vpop.eup %4800  ;;  %v3824_v50 = vsel %vm3744_vm1, %v3808_v59, 0.0  ;;  %v3344_v18 = vadd.f32 %v4793_v12, %v3280_v25 }
 0x2f6   : > { %v3039_v52 = vsub.f32 -1e+30, %v7559_v20  ;;  %v3103_v38 = vsub.f32 %v8451_v16, %v7559_v20  ;;  %v3167_v49 = vsub.f32 %v8452_v11, %v7559_v20  ;;  %3730 = vst [vmem:[%s6816_s11 + $0x48] sm:$0xff] %v3631_v33  ;;  %v4803_v1 = vpop.eup %4802  ;;  %v3838_v3 = vadd.f32 %v3837_v35, %v7513_v56 }
 0x2f7   : > { %v3470_v44 = vadd.f32 %v4801_v39, %v3406_v4  ;;  %v3452_v5 = vmul.f32 1.442695, %v3425_v14  ;;  %v3489_v59 = vsub.f32 %v7475_v24, %v7515_v34  ;;  %v3231_v32 = vsub.f32 %v8453_v17, %v7559_v20  ;;  %v8454_v14 = vld [vmem:[#allocation82_spill] sm:$0xff] }
 0x2f8   : > { %v3064_v55 = vmul.f32 1.442695, %v3039_v52  ;;  %v3128_v2 = vmul.f32 1.442695, %v3103_v38  ;;  %v4805_v47 = vpop.eup %4804  ;;  %v2677_v42 = vsel %vm2661_vm12, %v7313_v23, 0.0  ;;  %v7580_v56 = vadd.f32 %v3838_v3, %v3824_v50 }
 0x2f9   : > { %v3534_v58 = vadd.f32 %v4803_v1, %v3470_v44  ;;  %4822 = vpow2.f32 %v3388_v60  ;;  %v4807_v12 = vpop.eup %4806  ;;  %vm2697_vm3 = vcmp.gt.f32.partialorder %v7571_v40, %v7379_v26  ;;  %v3192_v25 = vmul.f32 1.442695, %v3167_v49  ;;  %v8456_v44 = vld [vmem:[#allocation107_spill] sm:$0xff] }
 0x2fa   : > { %4824 = vpow2.f32 %v3064_v55  ;;  %v3295_v6 = vsub.f32 %v8454_v14, %v7559_v20  ;;  %v4809_v35 = vpop.eup %4808  ;;  %v3408_v4 = vadd.f32 %v4797_v28, %v3344_v18  ;;  %v3089_v39 = vmul.f32 0.0, %v4807_v12 }
 0x2fb   : > { %v3598_v33 = vadd.f32 %v4805_v47, %v3534_v58  ;;  %4826 = vpow2.f32 %v3452_v5  ;;  %v4811_v52 = vpop.eup %4810  ;;  %v3516_v23 = vmul.f32 1.442695, %v3489_v59  ;;  %v3256_v50 = vmul.f32 1.442695, %v3231_v32  ;;  %v7604_v59 = vld [vmem:[%s5737_s8 + $0x40] sm:$0xff] }
 0x2fc   : > { %4828 = vpow2.f32 %v3128_v2  ;;  %v3359_v60 = vsub.f32 %v8390_v62, %v7559_v20  ;;  %v3153_v38 = vadd.f32 %v4811_v52, %v3089_v39  ;;  %v3553_v11 = vsub.f32 %v7495_v0, %v7515_v34  ;;  %v7598_v62 = vpop.f32.mrf.mxu1 }
 0x2fd   : > { %v4813_v16 = vpop.eup %4812  ;;  %4830 = vlog2.f32 %v3598_v33  ;;  %v2729_v28 = vmax.f32 %v7379_v26, %v7571_v40  ;;  %v7594_v1 = vadd.f32 %v7448_v57, %v7443_v46  ;;  %v3320_v3 = vmul.f32 1.442695, %v3295_v6  ;;  %8455 = vst [vmem:[#allocation9_spill] sm:$0xff] %v7598_v62  ;;  %v7611_v57 = vpop.f32.mrf.mxu0 }
 0x2fe   : > { %v4815_v49 = vpop.eup %4814  ;;  %4832 = vpow2.f32 %v3192_v25  ;;  %v3423_v18 = vsub.f32 %v8400_v36, %v7559_v20  ;;  %v7601_v5 = vadd.f32 %v2677_v42, %v8456_v44  ;;  %vm2659_vm8 = vcmp.eq.s32.totalorder %v7604_v59, 6  ;;  %8457 = vst [vmem:[#allocation40_spill] sm:$0xff] %v7611_v57  ;;  %v7627_v39 = vpop.f32.mrf.mxu1 }
 0x2ff   : > { %v3217_v55 = vadd.f32 %v4815_v49, %v3153_v38  ;;  %v2713_v46 = vsel %vm2697_vm3, 6, %v7375_v54  ;;  %v4817_v2 = vpop.eup %4816  ;;  %v3472_v17 = vadd.f32 %v4809_v35, %v3408_v4  ;;  %4834 = vpow2.f32 %v3256_v50  ;;  %8458 = vst [vmem:[#allocation43_spill] sm:$0xff] %v7627_v39 }
 0x300   : > { %v3384_v36 = vmul.f32 1.442695, %v3359_v60  ;;  %v3487_v32 = vsub.f32 %v7518_v22, %v7559_v20  ;;  %v4819_v47 = vpop.eup %4818  ;;  %4836 = vpow2.f32 %v3516_v23  ;;  %v3580_v58 = vmul.f32 1.442695, %v3553_v11 }
 0x301   : > { %v3281_v42 = vadd.f32 %v4817_v2, %v3217_v55  ;;  %vm2900_vm9 = vcmp.gt.f32.partialorder %v7598_v62, %v2729_v28  ;;  %4838 = vpow2.f32 %v3320_v3  ;;  %v3448_v25 = vmul.f32 1.442695, %v3423_v18 }
 0x302   : > { %v4821_v12 = vpop.eup %4820  ;;  %v3551_v54 = vsub.f32 %v7544_v10, %v7559_v20  ;;  %vm2695_vm6 = vcmp.gt.f32.partialorder %v7611_v57, %v7382_v21  ;;  %v2727_v14 = vmax.f32 %v7382_v21, %v7611_v57  ;;  %v2916_v6 = vsel %vm2900_vm9, 7, %v2713_v46 }
 0x303   : > { %v3345_v26 = vadd.f32 %v4821_v12, %v3281_v42  ;;  %v2932_v35 = vmax.f32 %v2729_v28, %v7598_v62  ;;  %v2675_v4 = vsel %vm2659_vm8, %v7367_v61, 0.0  ;;  %vm2864_vm11 = vcmp.eq.s32.totalorder %v7537_v43, 7  ;;  %v8459_v61 = vld [vmem:[#allocation6_spill] sm:$0xff] }
 0x304   : > { %4840 = vpow2.f32 %v3384_v36  ;;  %v3512_v33 = vmul.f32 1.442695, %v3487_v32  ;;  %v3536_v52 = vadd.f32 %v4813_v16, %v3472_v17  ;;  %v2711_v23 = vsel %vm2695_vm6, 6, %v7388_v9  ;;  %v7648_v17 = vld [vmem:[%s5737_s8 + $0x48] sm:$0xff] }
 0x305   : > { %4842 = vpow2.f32 %v3580_v58  ;;  %vm3620_vm13 = vcmp.gt.f32.partialorder %v2932_v35, -1e+30  ;;  %vm2862_vm10 = vcmp.eq.s32.totalorder %v7604_v59, 7  ;;  %v3576_v50 = vmul.f32 1.442695, %v3551_v54 }
 0x306   : > { %v4823_v21 = vpop.eup %4822  ;;  %4844 = vpow2.f32 %v3448_v25  ;;  %v3636_v60 = vsel %vm3620_vm13, %v2916_v6, 0  ;;  %v2739_v11 = vadd.f32 %v2675_v4, %v8459_v61  ;;  %v7632_v49 = vmax.f32 %v2932_v35, -1e+30  ;;  %v8463_v6 = vld [vmem:[#allocation31_spill] sm:$0xff]  ;;  %v8464_v4 = vld [vmem:[#allocation34_spill] sm:$0xff] }
 0x307   : > { %v4825_v38 = vpop.eup %4824  ;;  %v3409_v28 = vadd.f32 %v4823_v21, %v3345_v26  ;;  %3735 = vst [vmem:[%s6816_s11 + $0x70] sm:$0xff] %v3636_v60  ;;  %vm2898_vm4 = vcmp.gt.f32.partialorder %v7627_v39, %v2727_v14  ;;  %vm2290_vm12 = vcmp.gt.f32.partialorder %v8430_v29, %v8431_v51  ;;  %4846 = vpow2.f32 %v3512_v33  ;;  %v7657_v26 = vpop.f32.mrf.mxu0 }
 0x308   : > { %8460 = vst [vmem:[#allocation10_spill] sm:$0xff] %v7632_v49  ;;  %v4827_v16 = vpop.eup %4826  ;;  %v3087_v9 = vmul.f32 0.0, %v4825_v38  ;;  %v2914_v3 = vsel %vm2898_vm4, 7, %v2711_v23  ;;  %v2930_v18 = vmax.f32 %v2727_v14, %v7627_v39  ;;  %v7642_v55 = vsel %vm2864_vm11, %v7338_v53, 0.0  ;;  %v8462_v53 = vld [vmem:[#allocation53_spill] sm:$0xff] }
 0x309   : > { %v4829_v44 = vpop.eup %4828  ;;  %v3600_v46 = vadd.f32 %v4819_v47, %v3536_v52  ;;  %v2878_v2 = vsel %vm2862_vm10, %v7412_v41, 0.0  ;;  %vm2660_vm14 = vcmp.eq.s32.totalorder %v7648_v17, 6  ;;  %4848 = vpow2.f32 %v3576_v50  ;;  %v8465_v50 = vld [vmem:[#allocation85_spill] sm:$0xff] }
 0x30a   : > { %v4831_v36 = vpop.eup %4830  ;;  %v3151_v32 = vadd.f32 %v4829_v44, %v3087_v9  ;;  %v7651_v42 = vmax.f32 %v2930_v18, -1e+30  ;;  %vm3618_vm2 = vcmp.gt.f32.partialorder %v2930_v18, -1e+30  ;;  %vm2493_vm3 = vcmp.gt.f32.partialorder %v8462_v53, %v7395_v7 }
 0x30b   : > { %v4833_v58 = vpop.eup %4832  ;;  %v3770_v47 = vmul.f32 0.6931472, %v4831_v36  ;;  %v3473_v12 = vadd.f32 %v4827_v16, %v3409_v28  ;;  %v3556_v41 = vsub.f32 %v7598_v62, %v7632_v49  ;;  %v3634_v25 = vsel %vm3618_vm2, %v2914_v3, 0 }
 0x30c   : > { %8461 = vst [vmem:[#allocation11_spill] sm:$0xff] %v7651_v42  ;;  %v3215_v54 = vadd.f32 %v4833_v58, %v3151_v32  ;;  %v3042_v14 = vsub.f32 -1e+30, %v7651_v42  ;;  %v3106_v35 = vsub.f32 %v8463_v6, %v7651_v42  ;;  %v3170_v33 = vsub.f32 %v8464_v4, %v7651_v42  ;;  %3733 = vst [vmem:[%s6816_s11 + $0x60] sm:$0xff] %v3634_v25  ;;  %v4835_v52 = vpop.eup %4834  ;;  %v8466_v58 = vld [vmem:[#allocation90_spill] sm:$0xff]  ;;  %v7682_v25 = vpop.f32.mrf.mxu0 }
 0x30d   : > { %v2942_v23 = vadd.f32 %v2878_v2, %v2739_v11  ;;  %vm3745_vm8 = vcmp.ge.s32.totalorder %v7604_v59, 0  ;;  %v3793_v21 = vadd.f32 %v3770_v47, %v7450_v48  ;;  %v3234_v60 = vsub.f32 %v8465_v50, %v7651_v42  ;;  %v4837_v38 = vpop.eup %4836  ;;  %8467 = vst [vmem:[#allocation42_spill] sm:$0xff] %v7682_v25  ;;  %v7689_v6 = vpop.f32.mrf.mxu1 }
 0x30e   : > { %v7672_v61 = vsel %vm2660_vm14, %v7518_v22, 0.0  ;;  %v3279_v28 = vadd.f32 %v4835_v52, %v3215_v54  ;;  %v3070_v16 = vmul.f32 1.442695, %v3042_v14  ;;  %v3134_v9 = vmul.f32 1.442695, %v3106_v35  ;;  %v4839_v3 = vpop.eup %4838 }
 0x30f   : > { %4850 = vlog2.f32 %v3600_v46  ;;  %v3809_v18 = vsub.f32 %v3793_v21, %v2942_v23  ;;  %v3537_v11 = vadd.f32 %v4837_v38, %v3473_v12  ;;  %vm2698_vm9 = vcmp.gt.f32.partialorder %v7657_v26, %v7404_v37  ;;  %v8468_v23 = vld [vmem:[#allocation50_spill] sm:$0xff] }
 0x310   : > { %v3343_v48 = vadd.f32 %v4839_v3, %v3279_v28  ;;  %v3586_v44 = vmul.f32 1.442695, %v3556_v41  ;;  %4852 = vpow2.f32 %v3070_v16  ;;  %v3198_v2 = vmul.f32 1.442695, %v3170_v33  ;;  %v7710_v3 = vpop.f32.mrf.mxu1 }
 0x311   : > { %v4841_v36 = vpop.eup %4840  ;;  %v3825_v32 = vsel %vm3745_vm8, %v3809_v18, 0.0  ;;  %v3262_v22 = vmul.f32 1.442695, %v3234_v60  ;;  %v3298_v47 = vsub.f32 %v8466_v58, %v7651_v42  ;;  %v2525_v46 = vmax.f32 %v7395_v7, %v8462_v53  ;;  %8469 = vst [vmem:[#allocation45_spill] sm:$0xff] %v7710_v3 }
 0x312   : > { %v4843_v12 = vpop.eup %4842  ;;  %v7685_v54 = vadd.f32 %v7580_v56, %v3825_v32  ;;  %v3407_v41 = vadd.f32 %v4841_v36, %v3343_v48  ;;  %4854 = vpow2.f32 %v3134_v9  ;;  %v3362_v14 = vsub.f32 %v8408_v8, %v7651_v42 }
 0x313   : > { %v4845_v35 = vpop.eup %4844  ;;  %v3601_v4 = vadd.f32 %v4843_v12, %v3537_v11  ;;  %v2714_v33 = vsel %vm2698_vm9, 6, %v7399_v15  ;;  %v2730_v52 = vmax.f32 %v7404_v37, %v7657_v26  ;;  %v2306_v56 = vsel %vm2290_vm12, 4, %v8468_v23 }
 0x314   : > { %v3471_v21 = vadd.f32 %v4845_v35, %v3407_v41  ;;  %4856 = vpow2.f32 %v3198_v2  ;;  %v3426_v60 = vsub.f32 %v8427_v27, %v7651_v42  ;;  %vm2696_vm6 = vcmp.gt.f32.partialorder %v7682_v25, %v2525_v46  ;;  %v4847_v38 = vpop.eup %4846  ;;  %v8472_v35 = vld [vmem:[#allocation41_spill] sm:$0xff] }
 0x315   : > { %4858 = vpow2.f32 %v3586_v44  ;;  %v3326_v28 = vmul.f32 1.442695, %v3298_v47  ;;  %v3490_v15 = vsub.f32 %v7611_v57, %v7651_v42  ;;  %v2728_v37 = vmax.f32 %v2525_v46, %v7682_v25  ;;  %v7822_v57 = vld [vmem:[%s5737_s8 + $0x58] sm:$0xff] }
 0x316   : > { %v3535_v16 = vadd.f32 %v4847_v38, %v3471_v21  ;;  %4860 = vpow2.f32 %v3262_v22  ;;  %v3390_v9 = vmul.f32 1.442695, %v3362_v14  ;;  %v2509_v51 = vsel %vm2493_vm3, 5, %v2306_v56  ;;  %v4849_v18 = vpop.eup %4848 }
 0x317   : > { %v3554_v11 = vsub.f32 %v7627_v39, %v7651_v42  ;;  %v2712_v48 = vsel %vm2696_vm6, 6, %v2509_v51  ;;  %vm2901_vm11 = vcmp.gt.f32.partialorder %v7689_v6, %v2730_v52  ;;  %v2933_v44 = vmax.f32 %v2730_v52, %v7689_v6 }
 0x318   : > { %4862 = vlog2.f32 %v3601_v4  ;;  %v3599_v2 = vadd.f32 %v4849_v18, %v3535_v16  ;;  %v3454_v36 = vmul.f32 1.442695, %v3426_v60  ;;  %v2917_v32 = vsel %vm2901_vm11, 7, %v2714_v33  ;;  %v8474_v60 = vld [vmem:[#allocation7_spill] sm:$0xff] }
 0x319   : > { %4864 = vpow2.f32 %v3326_v28  ;;  %v3518_v22 = vmul.f32 1.442695, %v3490_v15  ;;  %vm3621_vm13 = vcmp.gt.f32.partialorder %v2933_v44, -1e+30  ;;  %vm2899_vm10 = vcmp.gt.f32.partialorder %v7710_v3, %v2728_v37 }
 0x31a   : > { %4866 = vlog2.f32 %v3599_v2  ;;  %v3637_v7 = vsel %vm3621_vm13, %v2917_v32, 0  ;;  %v2915_v47 = vsel %vm2899_vm10, 7, %v2712_v48  ;;  %v2931_v46 = vmax.f32 %v2728_v37, %v7710_v3  ;;  %v8475_v37 = vld [vmem:[#allocation36_spill] sm:$0xff] }
 0x31b   : > { %v8470_v12 = vmov 0.0   ;;  %v7725_v4 = vadd.f32 %v8472_v35, %v7594_v1  ;;  %4868 = vpow2.f32 %v3390_v9  ;;  %v3582_v33 = vmul.f32 1.442695, %v3554_v11  ;;  %3736 = vst [vmem:[%s6816_s11 + $0x78] sm:$0xff] %v3637_v7  ;;  %v8479_v11 = vld [vmem:[#allocation98_spill] sm:$0xff] }
 0x31c   : > { %v7721_v14 = vsel %vm3740_vm5, 1.0, %v8470_v12  ;;  %v4851_v52 = vpop.eup %4850  ;;  %v7730_v23 = vadd.f32 %v7642_v55, %v7601_v5  ;;  %4870 = vpow2.f32 %v3454_v36  ;;  %v7732_v56 = vmax.f32 %v2931_v46, -1e+30  ;;  %v8476_v5 = vld [vmem:[#allocation38_spill] sm:$0xff] }
 0x31d   : > { %vm3619_vm4 = vcmp.gt.f32.partialorder %v2931_v46, -1e+30  ;;  %v4853_v21 = vpop.eup %4852  ;;  %v2740_v38 = vadd.f32 %v7672_v61, %v8474_v60  ;;  %vm2863_vm5 = vcmp.eq.s32.totalorder %v7648_v17, 7  ;;  %4872 = vpow2.f32 %v3518_v22  ;;  %v8478_v61 = vld [vmem:[#allocation95_spill] sm:$0xff] }
 0x31e   : > { %8473 = vst [vmem:[#allocation110_spill] sm:$0xff] %v7732_v56  ;;  %v3635_v1 = vsel %vm3619_vm4, %v2915_v47, 0  ;;  %v3090_v28 = vmul.f32 0.0, %v4853_v21  ;;  %v3043_v15 = vsub.f32 -1e+30, %v7732_v56  ;;  %v3107_v16 = vsub.f32 %v8475_v37, %v7732_v56 }
 0x31f   : > { %v3171_v55 = vsub.f32 %v8476_v5, %v7732_v56  ;;  %3734 = vst [vmem:[%s6816_s11 + $0x68] sm:$0xff] %v3635_v1  ;;  %v4855_v9 = vpop.eup %4854  ;;  %4874 = vpow2.f32 %v3582_v33  ;;  %v7743_v51 = vmax.f32 %v2933_v44, -1e+30  ;;  %v3235_v18 = vsub.f32 %v8478_v61, %v7732_v56 }
 0x320   : > { %v3299_v48 = vsub.f32 %v8479_v11, %v7732_v56  ;;  %v3154_v2 = vadd.f32 %v4855_v9, %v3090_v28  ;;  %v3072_v36 = vmul.f32 1.442695, %v3043_v15  ;;  %v3136_v32 = vmul.f32 1.442695, %v3107_v16 }
 0x321   : > { %8477 = vst [vmem:[#allocation12_spill] sm:$0xff] %v7743_v51  ;;  %v3200_v22 = vmul.f32 1.442695, %v3171_v55  ;;  %v4857_v7 = vpop.eup %4856  ;;  %v3264_v47 = vmul.f32 1.442695, %v3235_v18  ;;  %v3363_v41 = vsub.f32 %v8430_v29, %v7732_v56  ;;  %v3427_v44 = vsub.f32 %v8462_v53, %v7732_v56 }
 0x322   : > { %v3328_v46 = vmul.f32 1.442695, %v3299_v48  ;;  %v7753_v35 = vpop.eup %4858  ;;  %v3218_v33 = vadd.f32 %v4857_v7, %v3154_v2  ;;  %4876 = vpow2.f32 %v3072_v36  ;;  %v3491_v21 = vsub.f32 %v7682_v25, %v7732_v56  ;;  %v8480_v2 = vld [vmem:[#allocation30_spill] sm:$0xff] }
 0x323   : > { %v3555_v60 = vsub.f32 %v7710_v3, %v7732_v56  ;;  %v4861_v1 = vpop.eup %4860  ;;  %v2879_v28 = vsel %vm2863_vm5, %v7544_v10, 0.0  ;;  %4878 = vpow2.f32 %v3136_v32  ;;  %v3392_v15 = vmul.f32 1.442695, %v3363_v41  ;;  %v8481_v32 = vld [vmem:[#allocation33_spill] sm:$0xff] }
 0x324   : > { %v3044_v37 = vsub.f32 -1e+30, %v7632_v49  ;;  %v3282_v16 = vadd.f32 %v4861_v1, %v3218_v33  ;;  %4880 = vpow2.f32 %v3200_v22  ;;  %v3456_v5 = vmul.f32 1.442695, %v3427_v44  ;;  %v8482_v1 = vld [vmem:[#allocation32_spill] sm:$0xff] }
 0x325   : > { %v3045_v55 = vsub.f32 -1e+30, %v7743_v51  ;;  %v7764_v9 = vpop.eup %4862  ;;  %v3774_v18 = vmul.f32 0.6931472, %v4851_v52  ;;  %4882 = vpow2.f32 %v3264_v47  ;;  %v3520_v48 = vmul.f32 1.442695, %v3491_v21 }
 0x326   : > { %v3108_v36 = vsub.f32 %v8480_v2, %v7632_v49  ;;  %v4865_v7 = vpop.eup %4864  ;;  %v2943_v62 = vadd.f32 %v2879_v28, %v2740_v38  ;;  %4884 = vpow2.f32 %v3328_v46  ;;  %v3584_v10 = vmul.f32 1.442695, %v3555_v60  ;;  %v8483_v28 = vld [vmem:[#allocation37_spill] sm:$0xff] }
 0x327   : > { %v3109_v41 = vsub.f32 %v8481_v32, %v7743_v51  ;;  %v4867_v33 = vpop.eup %4866  ;;  %v3346_v22 = vadd.f32 %v4865_v7, %v3282_v16  ;;  %4886 = vpow2.f32 %v3392_v15  ;;  %v3074_v44 = vmul.f32 1.442695, %v3044_v37  ;;  %v8484_v7 = vld [vmem:[#allocation81_spill] sm:$0xff] }
 0x328   : > { %v3172_v56 = vsub.f32 %v8482_v1, %v7632_v49  ;;  %v4869_v52 = vpop.eup %4868  ;;  %vm8142_vm12 = vcmp.ge.s32.totalorder %v7648_v17, 0  ;;  %v3772_v47 = vmul.f32 0.6931472, %v4867_v33  ;;  %4888 = vpow2.f32 %v3456_v5  ;;  %v8485_v33 = vld [vmem:[#allocation89_spill] sm:$0xff] }
 0x329   : > { %v3076_v21 = vmul.f32 1.442695, %v3045_v55  ;;  %v4871_v38 = vpop.eup %4870  ;;  %v3795_v46 = vadd.f32 %v3774_v18, %v7362_v31  ;;  %4890 = vpow2.f32 %v3520_v48  ;;  %v3138_v60 = vmul.f32 1.442695, %v3108_v36  ;;  %v7784_v48 = vld [vmem:[%s5737_s8 + $0x70] sm:$0xff]  ;;  %v8486_v36 = vld [vmem:[#allocation86_spill] sm:$0xff] }
 0x32a   : > { %v3173_v16 = vsub.f32 %v8483_v28, %v7743_v51  ;;  %v4873_v15 = vpop.eup %4872  ;;  %v3794_v37 = vadd.f32 %v3772_v47, %v7559_v20  ;;  %4892 = vpow2.f32 %v3584_v10  ;;  %v3140_v2 = vmul.f32 1.442695, %v3109_v41  ;;  %v7791_v41 = vld [vmem:[%s5737_s8 + $0x60] sm:$0xff]  ;;  %v8488_v47 = vld [vmem:[#allocation79_spill] sm:$0xff] }
 0x32b   : > { %v3236_v32 = vsub.f32 %v8484_v7, %v7632_v49  ;;  %v3410_v5 = vadd.f32 %v4869_v52, %v3346_v22  ;;  %4894 = vpow2.f32 %v3074_v44  ;;  %v3202_v55 = vmul.f32 1.442695, %v3172_v56  ;;  %v8487_v44 = vld [vmem:[#allocation96_spill] sm:$0xff] }
 0x32c   : > { %v3237_v31 = vsub.f32 %v8485_v33, %v7743_v51  ;;  %v7781_v18 = vpop.eup %4874  ;;  %vm1853_vm14 = vcmp.eq.s32.totalorder %v7784_v48, 2  ;;  %vm8140_vm2 = vcmp.ge.s32.totalorder %v7537_v43, 0  ;;  %v3810_v20 = vsub.f32 %v3794_v37, %v2943_v62 }
 0x32d   : > { %4896 = vpow2.f32 %v3076_v21  ;;  %v3300_v10 = vsub.f32 %v8486_v36, %v7632_v49  ;;  %vm1851_vm3 = vcmp.eq.s32.totalorder %v7791_v41, 2  ;;  %v3811_v56 = vsub.f32 %v3795_v46, %v7730_v23  ;;  %v8489_v23 = vld [vmem:[#allocation113_spill] sm:$0xff] }
 0x32e   : > { %4898 = vpow2.f32 %v3138_v60  ;;  %v3204_v22 = vmul.f32 1.442695, %v3173_v16  ;;  %v3301_v1 = vsub.f32 %v8487_v44, %v7743_v51  ;;  %v3826_v52 = vsel %vm8142_vm12, %v3810_v20, 0.0  ;;  %v7804_v16 = vld [vmem:[%s5737_s8 + $0x78] sm:$0xff] }
 0x32f   : > { %4900 = vpow2.f32 %v3140_v2  ;;  %v3266_v62 = vmul.f32 1.442695, %v3236_v32  ;;  %v3364_v21 = vsub.f32 %v8488_v47, %v7632_v49  ;;  %v4877_v28 = vpop.eup %4876  ;;  %v3474_v37 = vadd.f32 %v4871_v38, %v3410_v5  ;;  %v8490_v32 = vld [vmem:[#allocation83_spill] sm:$0xff] }
 0x330   : > { %4902 = vpow2.f32 %v3202_v55  ;;  %v3268_v3 = vmul.f32 1.442695, %v3237_v31  ;;  %v3365_v46 = vsub.f32 %v8489_v23, %v7743_v51  ;;  %v4879_v60 = vpop.eup %4878  ;;  %vm1854_vm9 = vcmp.eq.s32.totalorder %v7804_v16, 2  ;;  %v7811_v38 = vld [vmem:[%s5737_s8 + $0x68] sm:$0xff]  ;;  %v8491_v31 = vld [vmem:[#allocation54_spill] sm:$0xff] }
 0x331   : > { %v3841_v20 = vadd.f32 %v7685_v54, %v3826_v52  ;;  %v3091_v2 = vmul.f32 0.0, %v4877_v28  ;;  %v3330_v42 = vmul.f32 1.442695, %v3300_v10  ;;  %v3428_v39 = vsub.f32 %v8490_v32, %v7632_v49  ;;  %v4881_v25 = vpop.eup %4880 }
 0x332   : > { %vm1852_vm6 = vcmp.eq.s32.totalorder %v7811_v38, 2  ;;  %v3827_v5 = vsel %vm8140_vm2, %v3811_v56, 0.0  ;;  %4904 = vpow2.f32 %v3204_v22  ;;  %v3332_v55 = vmul.f32 1.442695, %v3301_v1  ;;  %v4883_v54 = vpop.eup %4882 }
 0x333   : > { %v3429_v34 = vsub.f32 %v8491_v31, %v7743_v51  ;;  %v3155_v52 = vadd.f32 %v4879_v60, %v3091_v2  ;;  %4906 = vpow2.f32 %v3266_v62  ;;  %v3394_v10 = vmul.f32 1.442695, %v3364_v21  ;;  %v4885_v32 = vpop.eup %4884 }
 0x334   : > { %v3492_v28 = vsub.f32 %v7571_v40, %v7632_v49  ;;  %vm2056_vm11 = vcmp.eq.s32.totalorder %v7784_v48, 3  ;;  %vm2256_vm13 = vcmp.eq.s32.totalorder %v7822_v57, 4  ;;  %v3538_v56 = vadd.f32 %v4873_v15, %v3474_v37  ;;  %v4887_v31 = vpop.eup %4886  ;;  %v8495_v49 = vld [vmem:[#allocation75_spill] sm:$0xff] }
 0x335   : > { %4908 = vpow2.f32 %v3268_v3  ;;  %v3396_v22 = vmul.f32 1.442695, %v3365_v46  ;;  %v3493_v1 = vsub.f32 %v7657_v26, %v7743_v51  ;;  %vm2054_vm10 = vcmp.eq.s32.totalorder %v7791_v41, 3  ;;  %v4889_v2 = vpop.eup %4888 }
 0x336   : > { %v3219_v62 = vadd.f32 %v4881_v25, %v3155_v52  ;;  %4910 = vpow2.f32 %v3330_v42  ;;  %v3458_v21 = vmul.f32 1.442695, %v3428_v39  ;;  %v7828_v60 = vadd.f32 %v3841_v20, %v3827_v5  ;;  %v4891_v46 = vpop.eup %4890  ;;  %v8494_v52 = vld [vmem:[#allocation71_spill] sm:$0xff] }
 0x337   : > { %vm2057_vm4 = vcmp.eq.s32.totalorder %v7804_v16, 3  ;;  %vm2055_vm5 = vcmp.eq.s32.totalorder %v7811_v38, 3  ;;  %v3891_v3 = vadd.f32 %v7721_v14, %v7725_v4  ;;  %v3557_v15 = vsub.f32 %v7689_v6, %v7743_v51  ;;  %v4893_v5 = vpop.eup %4892  ;;  %v8496_v51 = vld [vmem:[#allocation80_spill] sm:$0xff] }
 0x338   : > { %8492 = vst [vmem:[#allocation13_spill] sm:$0xff] %v7828_v60  ;;  %4912 = vpow2.f32 %v3332_v55  ;;  %v3460_v37 = vmul.f32 1.442695, %v3429_v34  ;;  %vm2459_vm2 = vcmp.eq.s32.totalorder %v7822_v57, 5  ;;  %v4168_v42 = vsel %vm3741_vm7, 1.0, %v8470_v12  ;;  %v4895_v4 = vpop.eup %4894 }
 0x339   : > { %v3283_v25 = vadd.f32 %v4883_v54, %v3219_v62  ;;  %4914 = vpow2.f32 %v3394_v10  ;;  %v3522_v20 = vmul.f32 1.442695, %v3492_v28  ;;  %v2133_v60 = vadd.f32 %v8495_v49, %v8494_v52 }
 0x33a   : > { %v1869_v14 = vsel %vm1853_vm14, %v8484_v7, 0.0  ;;  %vm2259_vm12 = vcmp.eq.s32.totalorder %v7784_v48, 4  ;;  %4916 = vpow2.f32 %v3396_v22  ;;  %v3524_v34 = vmul.f32 1.442695, %v3493_v1  ;;  %v4897_v28 = vpop.eup %4896 }
 0x33b   : > { %v1867_v55 = vsel %vm1851_vm3, %v8465_v50, 0.0  ;;  %v3602_v54 = vadd.f32 %v7781_v18, %v3538_v56  ;;  %v3347_v10 = vadd.f32 %v4885_v32, %v3283_v25  ;;  %4918 = vpow2.f32 %v3458_v21  ;;  %v4899_v7 = vpop.eup %4898 }
 0x33c   : > { %vm2257_vm7 = vcmp.eq.s32.totalorder %v7791_v41, 4  ;;  %v3892_v49 = vadd.f32 %v4168_v42, %v3891_v3  ;;  %v3588_v62 = vmul.f32 1.442695, %v3557_v15  ;;  %v3092_v39 = vmul.f32 0.0, %v4895_v4  ;;  %v4901_v50 = vpop.eup %4900  ;;  %v8497_v15 = vld [vmem:[#allocation84_spill] sm:$0xff] }
 0x33d   : > { %4920 = vpow2.f32 %v3460_v37  ;;  %v4169_v22 = vsel %vm3742_vm0, 1.0, %v8470_v12  ;;  %v3411_v1 = vadd.f32 %v4887_v31, %v3347_v10  ;;  %v3093_v52 = vmul.f32 0.0, %v4897_v28  ;;  %v4903_v21 = vpop.eup %4902 }
 0x33e   : > { %4922 = vpow2.f32 %v3522_v20  ;;  %v1933_v18 = vadd.f32 %v1869_v14, %v8496_v51  ;;  %v1870_v32 = vsel %vm1854_vm9, %v8485_v33, 0.0  ;;  %vm2258_vm14 = vcmp.eq.s32.totalorder %v7811_v38, 4 }
 0x33f   : > { %v3156_v56 = vadd.f32 %v4899_v7, %v3092_v39  ;;  %4924 = vpow2.f32 %v3524_v34  ;;  %v1868_v30 = vsel %vm1852_vm6, %v8478_v61, 0.0  ;;  %vm2260_vm0 = vcmp.eq.s32.totalorder %v7804_v16, 4  ;;  %v4905_v42 = vpop.eup %4904  ;;  %v8498_v34 = vld [vmem:[#allocation91_spill] sm:$0xff] }
 0x340   : > { %4926 = vlog2.f32 %v3602_v54  ;;  %v3475_v31 = vadd.f32 %v4889_v2, %v3411_v1  ;;  %v3157_v3 = vadd.f32 %v4901_v50, %v3093_v52  ;;  %v1931_v51 = vadd.f32 %v1867_v55, %v8497_v15  ;;  %v4907_v14 = vpop.eup %4906  ;;  %v8499_v54 = vld [vmem:[#allocation94_spill] sm:$0xff] }
 0x341   : > { %vm2460_vm3 = vcmp.eq.s32.totalorder %v7791_v41, 5  ;;  %v3893_v37 = vadd.f32 %v4169_v22, %v3892_v49  ;;  %4928 = vpow2.f32 %v3588_v62  ;;  %v3220_v33 = vadd.f32 %v4903_v21, %v3156_v56 }
 0x342   : > { %v2072_v25 = vsel %vm2056_vm11, %v8486_v36, 0.0  ;;  %v2272_v61 = vsel %vm2256_vm13, %v8383_v19, 0.0  ;;  %v4170_v2 = vsel %vm3743_vm15, 1.0, %v8470_v12  ;;  %v3539_v20 = vadd.f32 %v4891_v46, %v3475_v31  ;;  %v4909_v36 = vpop.eup %4908 }
 0x343   : > { %v1934_v4 = vadd.f32 %v1870_v32, %v8498_v34  ;;  %v2070_v55 = vsel %vm2054_vm10, %v8466_v58, 0.0  ;;  %v1932_v10 = vadd.f32 %v1868_v30, %v8499_v54  ;;  %v3221_v28 = vadd.f32 %v4905_v42, %v3157_v3  ;;  %v4911_v62 = vpop.eup %4910 }
 0x344   : > { %v2073_v19 = vsel %vm2057_vm4, %v8487_v44, 0.0  ;;  %v2071_v63 = vsel %vm2055_vm5, %v8479_v11, 0.0  ;;  %vm2461_vm15 = vcmp.eq.s32.totalorder %v7811_v38, 5  ;;  %v3603_v46 = vadd.f32 %v4893_v5, %v3539_v20 }
 0x345   : > { %v3284_v49 = vadd.f32 %v4907_v14, %v3220_v33  ;;  %v2336_v39 = vadd.f32 %v2272_v61, %v2133_v60  ;;  %v2475_v58 = vsel %vm2459_vm2, %v8396_v45, 0.0  ;;  %v3894_v7 = vadd.f32 %v4170_v2, %v3893_v37  ;;  %v4913_v1 = vpop.eup %4912 }
 0x346   : > { %v3285_v22 = vadd.f32 %v4909_v36, %v3221_v28  ;;  %v2275_v44 = vsel %vm2259_vm12, %v8488_v47, 0.0  ;;  %v4171_v11 = vsel %vm3744_vm1, 1.0, %v8470_v12  ;;  %4930 = vlog2.f32 %v3603_v46  ;;  %v4915_v52 = vpop.eup %4914 }
 0x347   : > { %v3348_v5 = vadd.f32 %v4911_v62, %v3284_v49  ;;  %v2136_v50 = vadd.f32 %v2072_v25, %v1933_v18  ;;  %v2134_v60 = vadd.f32 %v2070_v55, %v1931_v51  ;;  %vm2662_vm9 = vcmp.eq.s32.totalorder %v7822_v57, 6  ;;  %v4917_v45 = vpop.eup %4916  ;;  %v8502_v62 = vld [vmem:[#allocation8_spill] sm:$0xff] }
 0x348   : > { %v3349_v32 = vadd.f32 %v4913_v1, %v3285_v22  ;;  %v2137_v56 = vadd.f32 %v2073_v19, %v1934_v4  ;;  %v2135_v21 = vadd.f32 %v2071_v63, %v1932_v10  ;;  %v2273_v30 = vsel %vm2257_vm7, %v8408_v8, 0.0  ;;  %v4919_v47 = vpop.eup %4918  ;;  %v8501_v63 = vld [vmem:[#allocation40_spill] sm:$0xff] }
 0x349   : > { %vm2462_vm12 = vcmp.eq.s32.totalorder %v7784_v48, 5  ;;  %vm2463_vm2 = vcmp.eq.s32.totalorder %v7804_v16, 5  ;;  %v3412_v13 = vadd.f32 %v4915_v52, %v3348_v5  ;;  %v2539_v31 = vadd.f32 %v2475_v58, %v2336_v39  ;;  %v8503_v58 = vld [vmem:[#allocation42_spill] sm:$0xff] }
 0x34a   : > { %v2339_v3 = vadd.f32 %v2275_v44, %v2136_v50  ;;  %v3895_v18 = vadd.f32 %v4171_v11, %v3894_v7  ;;  %v3413_v15 = vadd.f32 %v4917_v45, %v3349_v32  ;;  %v4921_v51 = vpop.eup %4920  ;;  %v2274_v37 = vsel %vm2258_vm14, %v8430_v29, 0.0  ;;  %v8505_v11 = vld [vmem:[#allocation83_spill] sm:$0xff]  ;;  %v8506_v50 = vld [vmem:[#allocation54_spill] sm:$0xff] }
 0x34b   : > { %v2678_v33 = vsel %vm2662_vm9, %v7475_v24, 0.0  ;;  %v4172_v8 = vsel %vm3745_vm8, 1.0, %v8470_v12  ;;  %v3476_v42 = vadd.f32 %v4919_v47, %v3412_v13  ;;  %v4923_v25 = vpop.eup %4922  ;;  %v2337_v61 = vadd.f32 %v2273_v30, %v2134_v60  ;;  %v8507_v32 = vld [vmem:[#allocation43_spill] sm:$0xff] }
 0x34c   : > { %v2276_v2 = vsel %vm2260_vm0, %v8489_v23, 0.0  ;;  %vm2865_vm1 = vcmp.eq.s32.totalorder %v7822_v57, 7  ;;  %v3477_v20 = vadd.f32 %v4921_v51, %v3413_v15  ;;  %v4925_v14 = vpop.eup %4924  ;;  %v2476_v29 = vsel %vm2460_vm3, %v8427_v27, 0.0  ;;  %v8508_v30 = vld [vmem:[#allocation11_spill] sm:$0xff]  ;;  %v8510_v51 = vld [vmem:[#allocation110_spill] sm:$0xff] }
 0x34d   : > { %v3776_v24 = vmul.f32 0.6931472, %v7764_v9  ;;  %vm2663_vm6 = vcmp.eq.s32.totalorder %v7791_v41, 6  ;;  %v3540_v59 = vadd.f32 %v4923_v25, %v3476_v42  ;;  %v4927_v34 = vpop.eup %4926  ;;  %v2338_v4 = vadd.f32 %v2274_v37, %v2135_v21 }
 0x34e   : > { %v2742_v55 = vadd.f32 %v2678_v33, %v2539_v31  ;;  %v3896_v54 = vadd.f32 %v4172_v8, %v3895_v18  ;;  %v3541_v10 = vadd.f32 %v4925_v14, %v3477_v20  ;;  %v4929_v28 = vpop.eup %4928  ;;  %v2881_v23 = vsel %vm2865_vm1, %v7495_v0, 0.0 }
 0x34f   : > { %vm8500_vm8 = vcmp.ge.s32.totalorder %v7648_v17, 0  ;;  %vm2664_vm11 = vcmp.eq.s32.totalorder %v7811_v38, 6  ;;  %v3604_v27 = vadd.f32 %v7753_v35, %v3540_v59  ;;  %v2540_v9 = vadd.f32 %v2476_v29, %v2337_v61 }
 0x350   : > { %v4173_v36 = vsel %vm8500_vm8, 1.0, %v8470_v12  ;;  %v2477_v19 = vsel %vm2461_vm15, %v8462_v53, 0.0  ;;  %v2679_v46 = vsel %vm2663_vm6, %v8501_v63, 0.0  ;;  %v3605_v49 = vadd.f32 %v4929_v28, %v3541_v10 }
 0x351   : > { %v3796_v39 = vadd.f32 %v3776_v24, %v8502_v62  ;;  %vm2866_vm13 = vcmp.eq.s32.totalorder %v7791_v41, 7  ;;  %v3778_v0 = vmul.f32 0.6931472, %v4927_v34  ;;  %4932 = vlog2.f32 %v3604_v27  ;;  %v8514_v62 = vld [vmem:[#allocation12_spill] sm:$0xff] }
 0x352   : > { %v2945_v17 = vadd.f32 %v2881_v23, %v2742_v55  ;;  %v2680_v7 = vsel %vm2664_vm11, %v8503_v58, 0.0  ;;  %4934 = vlog2.f32 %v3605_v49  ;;  %v3897_v22 = vadd.f32 %v4173_v36, %v3896_v54  ;;  %v8512_v54 = vld [vmem:[#allocation9_spill] sm:$0xff]  ;;  %v8513_v49 = vld [vmem:[#allocation10_spill] sm:$0xff] }
 0x353   : > { %v2743_v35 = vadd.f32 %v2679_v46, %v2540_v9  ;;  %v2541_v1 = vadd.f32 %v2477_v19, %v2338_v4  ;;  %vm2867_vm10 = vcmp.eq.s32.totalorder %v7811_v38, 7  ;;  %vm8504_vm4 = vcmp.ge.s32.totalorder %v7537_v43, 0  ;;  %v4931_v44 = vpop.eup %4930  ;;  %v8509_v43 = vld [vmem:[#allocation45_spill] sm:$0xff] }
 0x354   : > { %v4174_v53 = vsel %vm8504_vm4, 1.0, %v8470_v12  ;;  %v2478_v5 = vsel %vm2462_vm12, %v8505_v11, 0.0  ;;  %v2340_v52 = vadd.f32 %v2276_v2, %v2137_v56  ;;  %v2479_v60 = vsel %vm2463_vm2, %v8506_v50, 0.0 }
 0x355   : > { %v2882_v45 = vsel %vm2866_vm13, %v8507_v32, 0.0  ;;  %v3812_v21 = vsub.f32 %v3796_v39, %v2945_v17  ;;  %v3797_v13 = vadd.f32 %v3778_v0, %v8508_v30  ;;  %v2744_v47 = vadd.f32 %v2680_v7, %v2541_v1 }
 0x356   : > { %v3780_v31 = vmul.f32 0.6931472, %v4931_v44  ;;  %vm2665_vm5 = vcmp.eq.s32.totalorder %v7784_v48, 6  ;;  %v2883_v18 = vsel %vm2867_vm10, %v8509_v43, 0.0  ;;  %vm3748_vm7 = vcmp.ge.s32.totalorder %v7822_v57, 0  ;;  %v8511_v57 = vld [vmem:[#allocation13_spill] sm:$0xff] }
 0x357   : > { %v3898_v15 = vadd.f32 %v4174_v53, %v3897_v22  ;;  %vm2666_vm14 = vcmp.eq.s32.totalorder %v7804_v16, 6  ;;  %v2946_v56 = vadd.f32 %v2882_v45, %v2743_v35  ;;  %v4175_v33 = vsel %vm3748_vm7, 1.0, %v8470_v12 }
 0x358   : > { %v3798_v37 = vadd.f32 %v3780_v31, %v8510_v51  ;;  %v2542_v8 = vadd.f32 %v2478_v5, %v2339_v3  ;;  %v2543_v42 = vadd.f32 %v2479_v60, %v2340_v52  ;;  %v2681_v25 = vsel %vm2665_vm5, %v7571_v40, 0.0 }
 0x359   : > { %v3813_v61 = vsub.f32 %v3797_v13, %v2946_v56  ;;  %v2947_v2 = vadd.f32 %v2883_v18, %v2744_v47  ;;  %v3828_v20 = vsel %vm3748_vm7, %v3812_v21, 0.0  ;;  %v2682_v14 = vsel %vm2666_vm14, %v7657_v26, 0.0 }
 0x35a   : > { %vm3749_vm0 = vcmp.ge.s32.totalorder %v7791_v41, 0  ;;  %v3843_v29 = vadd.f32 %v8511_v57, %v3828_v20  ;;  %v3899_v24 = vadd.f32 %v4175_v33, %v3898_v15  ;;  %vm2868_vm3 = vcmp.eq.s32.totalorder %v7784_v48, 7 }
 0x35b   : > { %vm2869_vm15 = vcmp.eq.s32.totalorder %v7804_v16, 7  ;;  %v3814_v59 = vsub.f32 %v3798_v37, %v2947_v2  ;;  %v4176_v3 = vsel %vm3749_vm0, 1.0, %v8470_v12  ;;  %vm3750_vm9 = vcmp.ge.s32.totalorder %v7811_v38, 0 }
 0x35c   : > { %v2745_v40 = vadd.f32 %v2681_v25, %v2542_v8  ;;  %v2746_v34 = vadd.f32 %v2682_v14, %v2543_v42  ;;  %v3829_v4 = vsel %vm3749_vm0, %v3813_v61, 0.0  ;;  %v2884_v26 = vsel %vm2868_vm3, %v8512_v54, 0.0 }
 0x35d   : > { %v2885_v41 = vsel %vm2869_vm15, %v7689_v6, 0.0  ;;  %v3844_v10 = vadd.f32 %v3843_v29, %v3829_v4  ;;  %v3900_v28 = vadd.f32 %v4176_v3, %v3899_v24  ;;  %v3830_v27 = vsel %vm3750_vm9, %v3814_v59, 0.0 }
 0x35e   : > { %v4933_v55 = vpop.eup %4932  ;;  %v4177_v9 = vsel %vm3750_vm9, 1.0, %v8470_v12  ;;  %v2948_v63 = vadd.f32 %v2884_v26, %v2745_v40  ;;  %v2949_v46 = vadd.f32 %v2885_v41, %v2746_v34  ;;  %vm3751_vm12 = vcmp.ge.s32.totalorder %v7784_v48, 0 }
 0x35f   : > { %v4935_v23 = vpop.eup %4934  ;;  %v3782_v36 = vmul.f32 0.6931472, %v4933_v55  ;;  %v3845_v0 = vadd.f32 %v3844_v10, %v3830_v27  ;;  %v3901_v17 = vadd.f32 %v4177_v9, %v3900_v28  ;;  %v4178_v6 = vsel %vm3751_vm12, 1.0, %v8470_v12 }
 0x360   : > { %v3784_v19 = vmul.f32 0.6931472, %v4935_v23  ;;  %vm3752_vm2 = vcmp.ge.s32.totalorder %v7804_v16, 0 }
 0x361   : > { %v3799_v38 = vadd.f32 %v3782_v36, %v8513_v49  ;;  %v3902_v1 = vadd.f32 %v4178_v6, %v3901_v17  ;;  %v4179_v44 = vsel %vm3752_vm2, 1.0, %v8470_v12 }
 0x362   : > { %v3800_v39 = vadd.f32 %v3784_v19, %v8514_v62 }
 0x363   : > { %v3815_v58 = vsub.f32 %v3799_v38, %v2948_v63  ;;  %v3903_v5 = vadd.f32 %v4179_v44, %v3902_v1 }
 0x364   : > { %v3816_v7 = vsub.f32 %v3800_v39, %v2949_v46 }
 0x365   : > { %v3831_v22 = vsel %vm3751_vm12, %v3815_v58, 0.0 }
 0x366   : > { %v3846_v35 = vadd.f32 %v3845_v0, %v3831_v22  ;;  %v3832_v53 = vsel %vm3752_vm2, %v3816_v7, 0.0 }
 0x368   : > { %v3847_v11 = vadd.f32 %v3846_v35, %v3832_v53 }
 0x36a   : > { %3848 = vadd.xlane.f32.xlu0 %v3847_v11 }
 0x36e   : > { %3904 = vadd.xlane.f32.xlu0 %v3903_v5 }
 0x3f3   : > { %v3849_v48 = vpop.xlane.xlu0 %3848 }
 0x3f4   : > { %v3850_v52 = vrot.slane %v3849_v48, 4 }
 0x3f6   : > { %v3851_v50 = vadd.f32 %v3850_v52, %v3849_v48 }
 0x3f7   : > { %v3905_v60 = vpop.xlane.xlu0 %3904 }
 0x3f8   : > { %v3852_v32 = vrot.slane %v3851_v50, 2  ;;  %v3906_v45 = vrot.slane %v3905_v60, 4 }
 0x3fa   : > { %v3907_v16 = vadd.f32 %v3906_v45, %v3905_v60  ;;  %v3853_v21 = vadd.f32 %v3852_v32, %v3851_v50 }
 0x3fc   : > { %v3908_v30 = vrot.slane %v3907_v16, 2  ;;  %v3854_v13 = vrot.slane %v3853_v21, 1 }
 0x3fe   : > { %v3909_v47 = vadd.f32 %v3908_v30, %v3907_v16  ;;  %v3855_v31 = vadd.f32 %v3854_v13, %v3853_v21 }
 0x400   : > { %4570 = vpush %v3855_v31  ;;  %v3910_v12 = vrot.slane %v3909_v47, 1 }
 0x402   : > { %v3911_v43 = vadd.f32 %v3910_v12, %v3909_v47 }
 0x404   : > { %4572 = vpush %v3911_v43 }
 0x431   : > { %s4571_s16 = spop %4570 }
 0x432   : > { %v3913_v18 = vstv %s4571_s16 }
 0x433   : > { %3914 = vst [vmem:[%s337_s14] sm:$0x1] %v3913_v18 }
 0x435   : > { %s4573_s25 = spop %4572 }
 0x436   : > { %v3915_v15 = vstv %s4573_s25 }
 0x437   : > { %3916 = vst [vmem:[%s340_s19] sm:$0x1] %v3915_v15 }
 0x438 PF: > { %s17_s23 = sadd.s32 1, %s4977_s23   ;;  %s8515_s21 = smov %s4973_s22 }
 0x439   : > { %p14_p5 = scmp.ge.s32.totalorder %s17_s23, 4   ;;  %s8516_s22 = smov %s8518_s24 }
 0x43b   :  { %16 = sbr.rel (!%p14_p5) target bundleno = 2 (0x2), region = 107 }

</bundles_post_ra>
